<compile_context>
chip_gen: v7x
topology: tpu7x:2x2x1
jax: 0.10.0
libtpu: 0.0.40
codegen_flags: <defaults>
</compile_context>

<pallas_src>
import jax
import jax.numpy as jnp
import numpy as np
from jax.experimental import pallas as pl
from jax.experimental.pallas import tpu as pltpu

# ------------------------- small, TPU-friendly sizes -------------------------
VOCAB = 256       # vocab_size (multiple of 128 -> lane-dense logits store)
EMB = 128         # embedding_dim
HID = 128         # hidden_dim
BATCH = 8
SEQ = 8


# --------------------------- fused forward kernel ---------------------------
def fused_lm_kernel(tok_ref, gtab_ref, whh_ref, wfc_ref, bfc_ref, out_ref):
    """Single-invocation fused forward.

    tok_ref : SMEM (B, T) int32     token ids (scalar reads)
    gtab_ref: VMEM (VOCAB, 4H) f32  folded  embedding @ W_ih + (b_ih + b_hh)
    whh_ref : VMEM (H, 4H) bf16     recurrent weights
    wfc_ref : VMEM (H, V) bf16      output projection weights
    bfc_ref : VMEM (1, V) f32       output projection bias
    out_ref : VMEM (B, T, V) f32    logits, batch-first (module layout)
    """
    B, T, V = out_ref.shape
    H = whh_ref.shape[0]

    h = jnp.zeros((B, H), jnp.float32)
    c = jnp.zeros((B, H), jnp.float32)
    hs = []
    # T is small & static: a fully static Python loop keeps every ref index
    # static except the token-row gather and gives the scheduler full visibility.
    for t in range(T):
        # Embedding lookup + input projection as one row gather from the folded
        # table (dynamic row index from SMEM tokens).
        gx = jnp.concatenate(
            [gtab_ref[pl.ds(tok_ref[b, t], 1), :] for b in range(B)], axis=0)  # (B, 4H) f32
        # Only the recurrent matmul sits on the serial dependence chain.
        # bf16 operands / f32 accumulation.
        gates = gx + jnp.dot(h.astype(jnp.bfloat16), whh_ref[...],
                             preferred_element_type=jnp.float32)
        i_g = jax.nn.sigmoid(gates[:, 0 * H:1 * H])   # gate math stays f32 (VPU/EUP)
        f_g = jax.nn.sigmoid(gates[:, 1 * H:2 * H])
        g_g = jnp.tanh(gates[:, 2 * H:3 * H])
        o_g = jax.nn.sigmoid(gates[:, 3 * H:4 * H])
        c = f_g * c + i_g * g_g
        h = o_g * jnp.tanh(c)
        hs.append(h)

    # Hoisted output projection: one (T*B, H) @ (H, V) matmul for all timesteps.
    h_all = jnp.concatenate(hs, axis=0).astype(jnp.bfloat16)            # (T*B, H) time-major
    logits = (jnp.dot(h_all, wfc_ref[...], preferred_element_type=jnp.float32)
              + bfc_ref[...]).reshape(T, B, V)                          # (T, B, V)
    # Write directly in the module's batch-first layout (no wrapper transpose).
    for b in range(B):
        out_ref[b] = logits[:, b, :]                                    # (T, V) slab per batch


# ------------------------------- forward wrapper -------------------------------
def base_language_model_forward(tokens, params):
    """tokens: (B, T) int32.  Returns logits (B, T, V) float32.  One pallas_call."""
    B, T = tokens.shape
    V = params["w_fc"].shape[1]
    return pl.pallas_call(
        fused_lm_kernel,
        out_shape=jax.ShapeDtypeStruct((B, T, V), jnp.float32),
        in_specs=[
            pl.BlockSpec(memory_space=pltpu.MemorySpace.SMEM),   # tokens
            pl.BlockSpec(memory_space=pltpu.MemorySpace.VMEM),   # folded gate table
            pl.BlockSpec(memory_space=pltpu.MemorySpace.VMEM),   # W_hh (bf16)
            pl.BlockSpec(memory_space=pltpu.MemorySpace.VMEM),   # W_fc (bf16)
            pl.BlockSpec(memory_space=pltpu.MemorySpace.VMEM),   # b_fc
        ],
        out_specs=pl.BlockSpec(memory_space=pltpu.MemorySpace.VMEM),
    )(tokens, params["gates_table"], params["w_hh"], params["w_fc"], params["b_fc"])


# ----------------------- parameter init & one-time prep -----------------------
def init_params(key):
    """Raw PyTorch-equivalent parameters (pre-transposed to x @ W layout)."""
    ks = jax.random.split(key, 7)
    s = 0.1
    w_ih = s * jax.random.normal(ks[0], (4 * HID, EMB), jnp.float32)   # (4H, E)
    w_hh = s * jax.random.normal(ks[1], (4 * HID, HID), jnp.float32)   # (4H, H)
    b_ih = s * jax.random.normal(ks[2], (4 * HID,), jnp.float32)
    b_hh = s * jax.random.normal(ks[3], (4 * HID,), jnp.float32)
    w_fc = s * jax.random.normal(ks[4], (VOCAB, HID), jnp.float32)     # (V, H)
    b_fc = s * jax.random.normal(ks[5], (VOCAB,), jnp.float32)
    emb = s * jax.random.normal(ks[6], (VOCAB, EMB), jnp.float32)
    return {
        "embedding": emb,
        "w_ih_t": w_ih.T,                        # (E, 4H)
        "w_hh_t": w_hh.T,                        # (H, 4H)
        "bias": (b_ih + b_hh)[None, :],          # (1, 4H)
        "w_fc_t": w_fc.T,                        # (H, V)
        "b_fc": b_fc[None, :],                   # (1, V)
    }


def prepare_params(raw):
    """One-time preprocessing (amortized across forwards):
    - fold Embedding -> LSTM input projection into a gather table (exact: there
      is no nonlinearity between nn.Embedding and the LSTM input matmul),
    - cast matmul weights to bf16 (kernel accumulates in f32)."""
    gates_table = raw["embedding"] @ raw["w_ih_t"] + raw["bias"]       # (VOCAB, 4H) f32
    return {
        "gates_table": gates_table.astype(jnp.float32),
        "w_hh": raw["w_hh_t"].astype(jnp.bfloat16),                    # (H, 4H)
        "w_fc": raw["w_fc_t"].astype(jnp.bfloat16),                    # (H, V)
        "b_fc": raw["b_fc"].astype(jnp.float32),                       # (1, V)
    }


# ------------------------- pure-JAX reference (f32) -------------------------
def reference_forward(tokens, raw):
    emb = raw["embedding"][tokens].astype(jnp.float32)                 # (B, T, E)
    B = emb.shape[0]
    H = raw["w_hh_t"].shape[0]

    def step(carry, x_t):
        h, c = carry
        gates = x_t @ raw["w_ih_t"] + h @ raw["w_hh_t"] + raw["bias"][0]
        i, f, g, o = jnp.split(gates, 4, axis=-1)
        i, f, g, o = jax.nn.sigmoid(i), jax.nn.sigmoid(f), jnp.tanh(g), jax.nn.sigmoid(o)
        c = f * c + i * g
        h = o * jnp.tanh(c)
        return (h, c), h

    init = (jnp.zeros((B, H), jnp.float32), jnp.zeros((B, H), jnp.float32))
    _, hs = jax.lax.scan(step, init, jnp.swapaxes(emb, 0, 1))          # (T, B, H)
    hs = jnp.swapaxes(hs, 0, 1)                                        # (B, T, H)
    return hs @ raw["w_fc_t"] + raw["b_fc"][0]


if __name__ == "__main__":
    key = jax.random.PRNGKey(0)
    pkey, tkey = jax.random.split(key)
    raw = init_params(pkey)
    params = prepare_params(raw)
    tokens = jax.random.randint(tkey, (BATCH, SEQ), 0, VOCAB, dtype=jnp.int32)

    out = jax.jit(base_language_model_forward)(tokens, params)
    out = jax.block_until_ready(out)

    ref = jax.block_until_ready(reference_forward(tokens, raw))
    np.testing.assert_allclose(np.asarray(out), np.asarray(ref), rtol=2e-2, atol=2e-2)
    assert out.shape == (BATCH, SEQ, VOCAB)

    print("KERNEL_OK")
</pallas_src>

<mosaic_0001>
module attributes {stable_mosaic.version = 11 : i64} {
  func.func @fused_lm_kernel(%arg0: memref<8x8xi32, #tpu.memory_space<smem>>, %arg1: memref<256x512xf32, #tpu.memory_space<vmem>>, %arg2: memref<128x512xbf16, #tpu.memory_space<vmem>>, %arg3: memref<128x256xbf16, #tpu.memory_space<vmem>>, %arg4: memref<1x256xf32, #tpu.memory_space<vmem>>, %arg5: memref<8x8x256xf32, #tpu.memory_space<vmem>>) attributes {dimension_semantics = [], scalar_prefetch = 0 : i64, scratch_operands = 0 : i64, tpu.core_type = #tpu.core_type<tc>} {
    %cst = arith.constant 0.000000e+00 : f32
    %0 = vector.broadcast %cst : f32 to vector<8x128xf32>
    %cst_0 = arith.constant 0.000000e+00 : f32
    %1 = vector.broadcast %cst_0 : f32 to vector<8x128xf32>
    %c0 = arith.constant 0 : index
    %c0_1 = arith.constant 0 : index
    %2 = memref.load %arg0[%c0, %c0_1] : memref<8x8xi32, #tpu.memory_space<smem>>
    %3 = arith.index_cast %2 : i32 to index
    %c0_2 = arith.constant 0 : index
    %4 = vector.load %arg1[%3, %c0_2] : memref<256x512xf32, #tpu.memory_space<vmem>>, vector<1x512xf32>
    %c1 = arith.constant 1 : index
    %c0_3 = arith.constant 0 : index
    %5 = memref.load %arg0[%c1, %c0_3] : memref<8x8xi32, #tpu.memory_space<smem>>
    %6 = arith.index_cast %5 : i32 to index
    %c0_4 = arith.constant 0 : index
    %7 = vector.load %arg1[%6, %c0_4] : memref<256x512xf32, #tpu.memory_space<vmem>>, vector<1x512xf32>
    %c2 = arith.constant 2 : index
    %c0_5 = arith.constant 0 : index
    %8 = memref.load %arg0[%c2, %c0_5] : memref<8x8xi32, #tpu.memory_space<smem>>
    %9 = arith.index_cast %8 : i32 to index
    %c0_6 = arith.constant 0 : index
    %10 = vector.load %arg1[%9, %c0_6] : memref<256x512xf32, #tpu.memory_space<vmem>>, vector<1x512xf32>
    %c3 = arith.constant 3 : index
    %c0_7 = arith.constant 0 : index
    %11 = memref.load %arg0[%c3, %c0_7] : memref<8x8xi32, #tpu.memory_space<smem>>
    %12 = arith.index_cast %11 : i32 to index
    %c0_8 = arith.constant 0 : index
    %13 = vector.load %arg1[%12, %c0_8] : memref<256x512xf32, #tpu.memory_space<vmem>>, vector<1x512xf32>
    %c4 = arith.constant 4 : index
    %c0_9 = arith.constant 0 : index
    %14 = memref.load %arg0[%c4, %c0_9] : memref<8x8xi32, #tpu.memory_space<smem>>
    %15 = arith.index_cast %14 : i32 to index
    %c0_10 = arith.constant 0 : index
    %16 = vector.load %arg1[%15, %c0_10] : memref<256x512xf32, #tpu.memory_space<vmem>>, vector<1x512xf32>
    %c5 = arith.constant 5 : index
    %c0_11 = arith.constant 0 : index
    %17 = memref.load %arg0[%c5, %c0_11] : memref<8x8xi32, #tpu.memory_space<smem>>
    %18 = arith.index_cast %17 : i32 to index
    %c0_12 = arith.constant 0 : index
    %19 = vector.load %arg1[%18, %c0_12] : memref<256x512xf32, #tpu.memory_space<vmem>>, vector<1x512xf32>
    %c6 = arith.constant 6 : index
    %c0_13 = arith.constant 0 : index
    %20 = memref.load %arg0[%c6, %c0_13] : memref<8x8xi32, #tpu.memory_space<smem>>
    %21 = arith.index_cast %20 : i32 to index
    %c0_14 = arith.constant 0 : index
    %22 = vector.load %arg1[%21, %c0_14] : memref<256x512xf32, #tpu.memory_space<vmem>>, vector<1x512xf32>
    %c7 = arith.constant 7 : index
    %c0_15 = arith.constant 0 : index
    %23 = memref.load %arg0[%c7, %c0_15] : memref<8x8xi32, #tpu.memory_space<smem>>
    %24 = arith.index_cast %23 : i32 to index
    %c0_16 = arith.constant 0 : index
    %25 = vector.load %arg1[%24, %c0_16] : memref<256x512xf32, #tpu.memory_space<vmem>>, vector<1x512xf32>
    %26 = tpu.concatenate %4, %7, %10, %13, %16, %19, %22, %25 in 0 : vector<1x512xf32>, vector<1x512xf32>, vector<1x512xf32>, vector<1x512xf32>, vector<1x512xf32>, vector<1x512xf32>, vector<1x512xf32>, vector<1x512xf32> -> vector<8x512xf32>
    %27 = arith.truncf %0 : vector<8x128xf32> to vector<8x128xbf16>
    %c0_17 = arith.constant 0 : index
    %c0_18 = arith.constant 0 : index
    %28 = vector.load %arg2[%c0_17, %c0_18] : memref<128x512xbf16, #tpu.memory_space<vmem>>, vector<128x512xbf16>
    %cst_19 = arith.constant dense<0.000000e+00> : vector<8x512xf32>
    %29 = tpu.matmul %27, %28, %cst_19 {dimension_numbers = #tpu.dot_dimension_numbers<[1], [0], [0], [1], [0, 0, 1, 1], [], []>} : vector<8x128xbf16>, vector<128x512xbf16>, vector<8x512xf32> -> vector<8x512xf32>
    %30 = arith.addf %26, %29 : vector<8x512xf32>
    %31 = vector.extract_strided_slice %30 {offsets = [0, 0], sizes = [8, 128], strides = [1, 1]} : vector<8x512xf32> to vector<8x128xf32>
    %32 = arith.negf %31 : vector<8x128xf32>
    %33 = math.exp %32 : vector<8x128xf32>
    %cst_20 = arith.constant 1.000000e+00 : f32
    %34 = vector.broadcast %cst_20 : f32 to vector<8x128xf32>
    %35 = arith.addf %34, %33 : vector<8x128xf32>
    %36 = arith.divf %34, %35 : vector<8x128xf32>
    %37 = vector.extract_strided_slice %30 {offsets = [0, 128], sizes = [8, 128], strides = [1, 1]} : vector<8x512xf32> to vector<8x128xf32>
    %38 = arith.negf %37 : vector<8x128xf32>
    %39 = math.exp %38 : vector<8x128xf32>
    %cst_21 = arith.constant 1.000000e+00 : f32
    %40 = vector.broadcast %cst_21 : f32 to vector<8x128xf32>
    %41 = arith.addf %40, %39 : vector<8x128xf32>
    %42 = arith.divf %40, %41 : vector<8x128xf32>
    %43 = vector.extract_strided_slice %30 {offsets = [0, 256], sizes = [8, 128], strides = [1, 1]} : vector<8x512xf32> to vector<8x128xf32>
    %44 = math.tanh %43 : vector<8x128xf32>
    %45 = vector.extract_strided_slice %30 {offsets = [0, 384], sizes = [8, 128], strides = [1, 1]} : vector<8x512xf32> to vector<8x128xf32>
    %46 = arith.negf %45 : vector<8x128xf32>
    %47 = math.exp %46 : vector<8x128xf32>
    %cst_22 = arith.constant 1.000000e+00 : f32
    %48 = vector.broadcast %cst_22 : f32 to vector<8x128xf32>
    %49 = arith.addf %48, %47 : vector<8x128xf32>
    %50 = arith.divf %48, %49 : vector<8x128xf32>
    %51 = arith.mulf %42, %1 : vector<8x128xf32>
    %52 = arith.mulf %36, %44 : vector<8x128xf32>
    %53 = arith.addf %51, %52 : vector<8x128xf32>
    %54 = math.tanh %53 : vector<8x128xf32>
    %55 = arith.mulf %50, %54 : vector<8x128xf32>
    %c0_23 = arith.constant 0 : index
    %c1_24 = arith.constant 1 : index
    %56 = memref.load %arg0[%c0_23, %c1_24] : memref<8x8xi32, #tpu.memory_space<smem>>
    %57 = arith.index_cast %56 : i32 to index
    %c0_25 = arith.constant 0 : index
    %58 = vector.load %arg1[%57, %c0_25] : memref<256x512xf32, #tpu.memory_space<vmem>>, vector<1x512xf32>
    %c1_26 = arith.constant 1 : index
    %c1_27 = arith.constant 1 : index
    %59 = memref.load %arg0[%c1_26, %c1_27] : memref<8x8xi32, #tpu.memory_space<smem>>
    %60 = arith.index_cast %59 : i32 to index
    %c0_28 = arith.constant 0 : index
    %61 = vector.load %arg1[%60, %c0_28] : memref<256x512xf32, #tpu.memory_space<vmem>>, vector<1x512xf32>
    %c2_29 = arith.constant 2 : index
    %c1_30 = arith.constant 1 : index
    %62 = memref.load %arg0[%c2_29, %c1_30] : memref<8x8xi32, #tpu.memory_space<smem>>
    %63 = arith.index_cast %62 : i32 to index
    %c0_31 = arith.constant 0 : index
    %64 = vector.load %arg1[%63, %c0_31] : memref<256x512xf32, #tpu.memory_space<vmem>>, vector<1x512xf32>
    %c3_32 = arith.constant 3 : index
    %c1_33 = arith.constant 1 : index
    %65 = memref.load %arg0[%c3_32, %c1_33] : memref<8x8xi32, #tpu.memory_space<smem>>
    %66 = arith.index_cast %65 : i32 to index
    %c0_34 = arith.constant 0 : index
    %67 = vector.load %arg1[%66, %c0_34] : memref<256x512xf32, #tpu.memory_space<vmem>>, vector<1x512xf32>
    %c4_35 = arith.constant 4 : index
    %c1_36 = arith.constant 1 : index
    %68 = memref.load %arg0[%c4_35, %c1_36] : memref<8x8xi32, #tpu.memory_space<smem>>
    %69 = arith.index_cast %68 : i32 to index
    %c0_37 = arith.constant 0 : index
    %70 = vector.load %arg1[%69, %c0_37] : memref<256x512xf32, #tpu.memory_space<vmem>>, vector<1x512xf32>
    %c5_38 = arith.constant 5 : index
    %c1_39 = arith.constant 1 : index
    %71 = memref.load %arg0[%c5_38, %c1_39] : memref<8x8xi32, #tpu.memory_space<smem>>
    %72 = arith.index_cast %71 : i32 to index
    %c0_40 = arith.constant 0 : index
    %73 = vector.load %arg1[%72, %c0_40] : memref<256x512xf32, #tpu.memory_space<vmem>>, vector<1x512xf32>
    %c6_41 = arith.constant 6 : index
    %c1_42 = arith.constant 1 : index
    %74 = memref.load %arg0[%c6_41, %c1_42] : memref<8x8xi32, #tpu.memory_space<smem>>
    %75 = arith.index_cast %74 : i32 to index
    %c0_43 = arith.constant 0 : index
    %76 = vector.load %arg1[%75, %c0_43] : memref<256x512xf32, #tpu.memory_space<vmem>>, vector<1x512xf32>
    %c7_44 = arith.constant 7 : index
    %c1_45 = arith.constant 1 : index
    %77 = memref.load %arg0[%c7_44, %c1_45] : memref<8x8xi32, #tpu.memory_space<smem>>
    %78 = arith.index_cast %77 : i32 to index
    %c0_46 = arith.constant 0 : index
    %79 = vector.load %arg1[%78, %c0_46] : memref<256x512xf32, #tpu.memory_space<vmem>>, vector<1x512xf32>
    %80 = tpu.concatenate %58, %61, %64, %67, %70, %73, %76, %79 in 0 : vector<1x512xf32>, vector<1x512xf32>, vector<1x512xf32>, vector<1x512xf32>, vector<1x512xf32>, vector<1x512xf32>, vector<1x512xf32>, vector<1x512xf32> -> vector<8x512xf32>
    %81 = arith.truncf %55 : vector<8x128xf32> to vector<8x128xbf16>
    %c0_47 = arith.constant 0 : index
    %c0_48 = arith.constant 0 : index
    %82 = vector.load %arg2[%c0_47, %c0_48] : memref<128x512xbf16, #tpu.memory_space<vmem>>, vector<128x512xbf16>
    %cst_49 = arith.constant dense<0.000000e+00> : vector<8x512xf32>
    %83 = tpu.matmul %81, %82, %cst_49 {dimension_numbers = #tpu.dot_dimension_numbers<[1], [0], [0], [1], [0, 0, 1, 1], [], []>} : vector<8x128xbf16>, vector<128x512xbf16>, vector<8x512xf32> -> vector<8x512xf32>
    %84 = arith.addf %80, %83 : vector<8x512xf32>
    %85 = vector.extract_strided_slice %84 {offsets = [0, 0], sizes = [8, 128], strides = [1, 1]} : vector<8x512xf32> to vector<8x128xf32>
    %86 = arith.negf %85 : vector<8x128xf32>
    %87 = math.exp %86 : vector<8x128xf32>
    %cst_50 = arith.constant 1.000000e+00 : f32
    %88 = vector.broadcast %cst_50 : f32 to vector<8x128xf32>
    %89 = arith.addf %88, %87 : vector<8x128xf32>
    %90 = arith.divf %88, %89 : vector<8x128xf32>
    %91 = vector.extract_strided_slice %84 {offsets = [0, 128], sizes = [8, 128], strides = [1, 1]} : vector<8x512xf32> to vector<8x128xf32>
    %92 = arith.negf %91 : vector<8x128xf32>
    %93 = math.exp %92 : vector<8x128xf32>
    %cst_51 = arith.constant 1.000000e+00 : f32
    %94 = vector.broadcast %cst_51 : f32 to vector<8x128xf32>
    %95 = arith.addf %94, %93 : vector<8x128xf32>
    %96 = arith.divf %94, %95 : vector<8x128xf32>
    %97 = vector.extract_strided_slice %84 {offsets = [0, 256], sizes = [8, 128], strides = [1, 1]} : vector<8x512xf32> to vector<8x128xf32>
    %98 = math.tanh %97 : vector<8x128xf32>
    %99 = vector.extract_strided_slice %84 {offsets = [0, 384], sizes = [8, 128], strides = [1, 1]} : vector<8x512xf32> to vector<8x128xf32>
    %100 = arith.negf %99 : vector<8x128xf32>
    %101 = math.exp %100 : vector<8x128xf32>
    %cst_52 = arith.constant 1.000000e+00 : f32
    %102 = vector.broadcast %cst_52 : f32 to vector<8x128xf32>
    %103 = arith.addf %102, %101 : vector<8x128xf32>
    %104 = arith.divf %102, %103 : vector<8x128xf32>
    %105 = arith.mulf %96, %53 : vector<8x128xf32>
    %106 = arith.mulf %90, %98 : vector<8x128xf32>
    %107 = arith.addf %105, %106 : vector<8x128xf32>
    %108 = math.tanh %107 : vector<8x128xf32>
    %109 = arith.mulf %104, %108 : vector<8x128xf32>
    %c0_53 = arith.constant 0 : index
    %c2_54 = arith.constant 2 : index
    %110 = memref.load %arg0[%c0_53, %c2_54] : memref<8x8xi32, #tpu.memory_space<smem>>
    %111 = arith.index_cast %110 : i32 to index
    %c0_55 = arith.constant 0 : index
    %112 = vector.load %arg1[%111, %c0_55] : memref<256x512xf32, #tpu.memory_space<vmem>>, vector<1x512xf32>
    %c1_56 = arith.constant 1 : index
    %c2_57 = arith.constant 2 : index
    %113 = memref.load %arg0[%c1_56, %c2_57] : memref<8x8xi32, #tpu.memory_space<smem>>
    %114 = arith.index_cast %113 : i32 to index
    %c0_58 = arith.constant 0 : index
    %115 = vector.load %arg1[%114, %c0_58] : memref<256x512xf32, #tpu.memory_space<vmem>>, vector<1x512xf32>
    %c2_59 = arith.constant 2 : index
    %c2_60 = arith.constant 2 : index
    %116 = memref.load %arg0[%c2_59, %c2_60] : memref<8x8xi32, #tpu.memory_space<smem>>
    %117 = arith.index_cast %116 : i32 to index
    %c0_61 = arith.constant 0 : index
    %118 = vector.load %arg1[%117, %c0_61] : memref<256x512xf32, #tpu.memory_space<vmem>>, vector<1x512xf32>
    %c3_62 = arith.constant 3 : index
    %c2_63 = arith.constant 2 : index
    %119 = memref.load %arg0[%c3_62, %c2_63] : memref<8x8xi32, #tpu.memory_space<smem>>
    %120 = arith.index_cast %119 : i32 to index
    %c0_64 = arith.constant 0 : index
    %121 = vector.load %arg1[%120, %c0_64] : memref<256x512xf32, #tpu.memory_space<vmem>>, vector<1x512xf32>
    %c4_65 = arith.constant 4 : index
    %c2_66 = arith.constant 2 : index
    %122 = memref.load %arg0[%c4_65, %c2_66] : memref<8x8xi32, #tpu.memory_space<smem>>
    %123 = arith.index_cast %122 : i32 to index
    %c0_67 = arith.constant 0 : index
    %124 = vector.load %arg1[%123, %c0_67] : memref<256x512xf32, #tpu.memory_space<vmem>>, vector<1x512xf32>
    %c5_68 = arith.constant 5 : index
    %c2_69 = arith.constant 2 : index
    %125 = memref.load %arg0[%c5_68, %c2_69] : memref<8x8xi32, #tpu.memory_space<smem>>
    %126 = arith.index_cast %125 : i32 to index
    %c0_70 = arith.constant 0 : index
    %127 = vector.load %arg1[%126, %c0_70] : memref<256x512xf32, #tpu.memory_space<vmem>>, vector<1x512xf32>
    %c6_71 = arith.constant 6 : index
    %c2_72 = arith.constant 2 : index
    %128 = memref.load %arg0[%c6_71, %c2_72] : memref<8x8xi32, #tpu.memory_space<smem>>
    %129 = arith.index_cast %128 : i32 to index
    %c0_73 = arith.constant 0 : index
    %130 = vector.load %arg1[%129, %c0_73] : memref<256x512xf32, #tpu.memory_space<vmem>>, vector<1x512xf32>
    %c7_74 = arith.constant 7 : index
    %c2_75 = arith.constant 2 : index
    %131 = memref.load %arg0[%c7_74, %c2_75] : memref<8x8xi32, #tpu.memory_space<smem>>
    %132 = arith.index_cast %131 : i32 to index
    %c0_76 = arith.constant 0 : index
    %133 = vector.load %arg1[%132, %c0_76] : memref<256x512xf32, #tpu.memory_space<vmem>>, vector<1x512xf32>
    %134 = tpu.concatenate %112, %115, %118, %121, %124, %127, %130, %133 in 0 : vector<1x512xf32>, vector<1x512xf32>, vector<1x512xf32>, vector<1x512xf32>, vector<1x512xf32>, vector<1x512xf32>, vector<1x512xf32>, vector<1x512xf32> -> vector<8x512xf32>
    %135 = arith.truncf %109 : vector<8x128xf32> to vector<8x128xbf16>
    %c0_77 = arith.constant 0 : index
    %c0_78 = arith.constant 0 : index
    %136 = vector.load %arg2[%c0_77, %c0_78] : memref<128x512xbf16, #tpu.memory_space<vmem>>, vector<128x512xbf16>
    %cst_79 = arith.constant dense<0.000000e+00> : vector<8x512xf32>
    %137 = tpu.matmul %135, %136, %cst_79 {dimension_numbers = #tpu.dot_dimension_numbers<[1], [0], [0], [1], [0, 0, 1, 1], [], []>} : vector<8x128xbf16>, vector<128x512xbf16>, vector<8x512xf32> -> vector<8x512xf32>
    %138 = arith.addf %134, %137 : vector<8x512xf32>
    %139 = vector.extract_strided_slice %138 {offsets = [0, 0], sizes = [8, 128], strides = [1, 1]} : vector<8x512xf32> to vector<8x128xf32>
    %140 = arith.negf %139 : vector<8x128xf32>
    %141 = math.exp %140 : vector<8x128xf32>
    %cst_80 = arith.constant 1.000000e+00 : f32
    %142 = vector.broadcast %cst_80 : f32 to vector<8x128xf32>
    %143 = arith.addf %142, %141 : vector<8x128xf32>
    %144 = arith.divf %142, %143 : vector<8x128xf32>
    %145 = vector.extract_strided_slice %138 {offsets = [0, 128], sizes = [8, 128], strides = [1, 1]} : vector<8x512xf32> to vector<8x128xf32>
    %146 = arith.negf %145 : vector<8x128xf32>
    %147 = math.exp %146 : vector<8x128xf32>
    %cst_81 = arith.constant 1.000000e+00 : f32
    %148 = vector.broadcast %cst_81 : f32 to vector<8x128xf32>
    %149 = arith.addf %148, %147 : vector<8x128xf32>
    %150 = arith.divf %148, %149 : vector<8x128xf32>
    %151 = vector.extract_strided_slice %138 {offsets = [0, 256], sizes = [8, 128], strides = [1, 1]} : vector<8x512xf32> to vector<8x128xf32>
    %152 = math.tanh %151 : vector<8x128xf32>
    %153 = vector.extract_strided_slice %138 {offsets = [0, 384], sizes = [8, 128], strides = [1, 1]} : vector<8x512xf32> to vector<8x128xf32>
    %154 = arith.negf %153 : vector<8x128xf32>
    %155 = math.exp %154 : vector<8x128xf32>
    %cst_82 = arith.constant 1.000000e+00 : f32
    %156 = vector.broadcast %cst_82 : f32 to vector<8x128xf32>
    %157 = arith.addf %156, %155 : vector<8x128xf32>
    %158 = arith.divf %156, %157 : vector<8x128xf32>
    %159 = arith.mulf %150, %107 : vector<8x128xf32>
    %160 = arith.mulf %144, %152 : vector<8x128xf32>
    %161 = arith.addf %159, %160 : vector<8x128xf32>
    %162 = math.tanh %161 : vector<8x128xf32>
    %163 = arith.mulf %158, %162 : vector<8x128xf32>
    %c0_83 = arith.constant 0 : index
    %c3_84 = arith.constant 3 : index
    %164 = memref.load %arg0[%c0_83, %c3_84] : memref<8x8xi32, #tpu.memory_space<smem>>
    %165 = arith.index_cast %164 : i32 to index
    %c0_85 = arith.constant 0 : index
    %166 = vector.load %arg1[%165, %c0_85] : memref<256x512xf32, #tpu.memory_space<vmem>>, vector<1x512xf32>
    %c1_86 = arith.constant 1 : index
    %c3_87 = arith.constant 3 : index
    %167 = memref.load %arg0[%c1_86, %c3_87] : memref<8x8xi32, #tpu.memory_space<smem>>
    %168 = arith.index_cast %167 : i32 to index
    %c0_88 = arith.constant 0 : index
    %169 = vector.load %arg1[%168, %c0_88] : memref<256x512xf32, #tpu.memory_space<vmem>>, vector<1x512xf32>
    %c2_89 = arith.constant 2 : index
    %c3_90 = arith.constant 3 : index
    %170 = memref.load %arg0[%c2_89, %c3_90] : memref<8x8xi32, #tpu.memory_space<smem>>
    %171 = arith.index_cast %170 : i32 to index
    %c0_91 = arith.constant 0 : index
    %172 = vector.load %arg1[%171, %c0_91] : memref<256x512xf32, #tpu.memory_space<vmem>>, vector<1x512xf32>
    %c3_92 = arith.constant 3 : index
    %c3_93 = arith.constant 3 : index
    %173 = memref.load %arg0[%c3_92, %c3_93] : memref<8x8xi32, #tpu.memory_space<smem>>
    %174 = arith.index_cast %173 : i32 to index
    %c0_94 = arith.constant 0 : index
    %175 = vector.load %arg1[%174, %c0_94] : memref<256x512xf32, #tpu.memory_space<vmem>>, vector<1x512xf32>
    %c4_95 = arith.constant 4 : index
    %c3_96 = arith.constant 3 : index
    %176 = memref.load %arg0[%c4_95, %c3_96] : memref<8x8xi32, #tpu.memory_space<smem>>
    %177 = arith.index_cast %176 : i32 to index
    %c0_97 = arith.constant 0 : index
    %178 = vector.load %arg1[%177, %c0_97] : memref<256x512xf32, #tpu.memory_space<vmem>>, vector<1x512xf32>
    %c5_98 = arith.constant 5 : index
    %c3_99 = arith.constant 3 : index
    %179 = memref.load %arg0[%c5_98, %c3_99] : memref<8x8xi32, #tpu.memory_space<smem>>
    %180 = arith.index_cast %179 : i32 to index
    %c0_100 = arith.constant 0 : index
    %181 = vector.load %arg1[%180, %c0_100] : memref<256x512xf32, #tpu.memory_space<vmem>>, vector<1x512xf32>
    %c6_101 = arith.constant 6 : index
    %c3_102 = arith.constant 3 : index
    %182 = memref.load %arg0[%c6_101, %c3_102] : memref<8x8xi32, #tpu.memory_space<smem>>
    %183 = arith.index_cast %182 : i32 to index
    %c0_103 = arith.constant 0 : index
    %184 = vector.load %arg1[%183, %c0_103] : memref<256x512xf32, #tpu.memory_space<vmem>>, vector<1x512xf32>
    %c7_104 = arith.constant 7 : index
    %c3_105 = arith.constant 3 : index
    %185 = memref.load %arg0[%c7_104, %c3_105] : memref<8x8xi32, #tpu.memory_space<smem>>
    %186 = arith.index_cast %185 : i32 to index
    %c0_106 = arith.constant 0 : index
    %187 = vector.load %arg1[%186, %c0_106] : memref<256x512xf32, #tpu.memory_space<vmem>>, vector<1x512xf32>
    %188 = tpu.concatenate %166, %169, %172, %175, %178, %181, %184, %187 in 0 : vector<1x512xf32>, vector<1x512xf32>, vector<1x512xf32>, vector<1x512xf32>, vector<1x512xf32>, vector<1x512xf32>, vector<1x512xf32>, vector<1x512xf32> -> vector<8x512xf32>
    %189 = arith.truncf %163 : vector<8x128xf32> to vector<8x128xbf16>
    %c0_107 = arith.constant 0 : index
    %c0_108 = arith.constant 0 : index
    %190 = vector.load %arg2[%c0_107, %c0_108] : memref<128x512xbf16, #tpu.memory_space<vmem>>, vector<128x512xbf16>
    %cst_109 = arith.constant dense<0.000000e+00> : vector<8x512xf32>
    %191 = tpu.matmul %189, %190, %cst_109 {dimension_numbers = #tpu.dot_dimension_numbers<[1], [0], [0], [1], [0, 0, 1, 1], [], []>} : vector<8x128xbf16>, vector<128x512xbf16>, vector<8x512xf32> -> vector<8x512xf32>
    %192 = arith.addf %188, %191 : vector<8x512xf32>
    %193 = vector.extract_strided_slice %192 {offsets = [0, 0], sizes = [8, 128], strides = [1, 1]} : vector<8x512xf32> to vector<8x128xf32>
    %194 = arith.negf %193 : vector<8x128xf32>
    %195 = math.exp %194 : vector<8x128xf32>
    %cst_110 = arith.constant 1.000000e+00 : f32
    %196 = vector.broadcast %cst_110 : f32 to vector<8x128xf32>
    %197 = arith.addf %196, %195 : vector<8x128xf32>
    %198 = arith.divf %196, %197 : vector<8x128xf32>
    %199 = vector.extract_strided_slice %192 {offsets = [0, 128], sizes = [8, 128], strides = [1, 1]} : vector<8x512xf32> to vector<8x128xf32>
    %200 = arith.negf %199 : vector<8x128xf32>
    %201 = math.exp %200 : vector<8x128xf32>
    %cst_111 = arith.constant 1.000000e+00 : f32
    %202 = vector.broadcast %cst_111 : f32 to vector<8x128xf32>
    %203 = arith.addf %202, %201 : vector<8x128xf32>
    %204 = arith.divf %202, %203 : vector<8x128xf32>
    %205 = vector.extract_strided_slice %192 {offsets = [0, 256], sizes = [8, 128], strides = [1, 1]} : vector<8x512xf32> to vector<8x128xf32>
    %206 = math.tanh %205 : vector<8x128xf32>
    %207 = vector.extract_strided_slice %192 {offsets = [0, 384], sizes = [8, 128], strides = [1, 1]} : vector<8x512xf32> to vector<8x128xf32>
    %208 = arith.negf %207 : vector<8x128xf32>
    %209 = math.exp %208 : vector<8x128xf32>
    %cst_112 = arith.constant 1.000000e+00 : f32
    %210 = vector.broadcast %cst_112 : f32 to vector<8x128xf32>
    %211 = arith.addf %210, %209 : vector<8x128xf32>
    %212 = arith.divf %210, %211 : vector<8x128xf32>
    %213 = arith.mulf %204, %161 : vector<8x128xf32>
    %214 = arith.mulf %198, %206 : vector<8x128xf32>
    %215 = arith.addf %213, %214 : vector<8x128xf32>
    %216 = math.tanh %215 : vector<8x128xf32>
    %217 = arith.mulf %212, %216 : vector<8x128xf32>
    %c0_113 = arith.constant 0 : index
    %c4_114 = arith.constant 4 : index
    %218 = memref.load %arg0[%c0_113, %c4_114] : memref<8x8xi32, #tpu.memory_space<smem>>
    %219 = arith.index_cast %218 : i32 to index
    %c0_115 = arith.constant 0 : index
    %220 = vector.load %arg1[%219, %c0_115] : memref<256x512xf32, #tpu.memory_space<vmem>>, vector<1x512xf32>
    %c1_116 = arith.constant 1 : index
    %c4_117 = arith.constant 4 : index
    %221 = memref.load %arg0[%c1_116, %c4_117] : memref<8x8xi32, #tpu.memory_space<smem>>
    %222 = arith.index_cast %221 : i32 to index
    %c0_118 = arith.constant 0 : index
    %223 = vector.load %arg1[%222, %c0_118] : memref<256x512xf32, #tpu.memory_space<vmem>>, vector<1x512xf32>
    %c2_119 = arith.constant 2 : index
    %c4_120 = arith.constant 4 : index
    %224 = memref.load %arg0[%c2_119, %c4_120] : memref<8x8xi32, #tpu.memory_space<smem>>
    %225 = arith.index_cast %224 : i32 to index
    %c0_121 = arith.constant 0 : index
    %226 = vector.load %arg1[%225, %c0_121] : memref<256x512xf32, #tpu.memory_space<vmem>>, vector<1x512xf32>
    %c3_122 = arith.constant 3 : index
    %c4_123 = arith.constant 4 : index
    %227 = memref.load %arg0[%c3_122, %c4_123] : memref<8x8xi32, #tpu.memory_space<smem>>
    %228 = arith.index_cast %227 : i32 to index
    %c0_124 = arith.constant 0 : index
    %229 = vector.load %arg1[%228, %c0_124] : memref<256x512xf32, #tpu.memory_space<vmem>>, vector<1x512xf32>
    %c4_125 = arith.constant 4 : index
    %c4_126 = arith.constant 4 : index
    %230 = memref.load %arg0[%c4_125, %c4_126] : memref<8x8xi32, #tpu.memory_space<smem>>
    %231 = arith.index_cast %230 : i32 to index
    %c0_127 = arith.constant 0 : index
    %232 = vector.load %arg1[%231, %c0_127] : memref<256x512xf32, #tpu.memory_space<vmem>>, vector<1x512xf32>
    %c5_128 = arith.constant 5 : index
    %c4_129 = arith.constant 4 : index
    %233 = memref.load %arg0[%c5_128, %c4_129] : memref<8x8xi32, #tpu.memory_space<smem>>
    %234 = arith.index_cast %233 : i32 to index
    %c0_130 = arith.constant 0 : index
    %235 = vector.load %arg1[%234, %c0_130] : memref<256x512xf32, #tpu.memory_space<vmem>>, vector<1x512xf32>
    %c6_131 = arith.constant 6 : index
    %c4_132 = arith.constant 4 : index
    %236 = memref.load %arg0[%c6_131, %c4_132] : memref<8x8xi32, #tpu.memory_space<smem>>
    %237 = arith.index_cast %236 : i32 to index
    %c0_133 = arith.constant 0 : index
    %238 = vector.load %arg1[%237, %c0_133] : memref<256x512xf32, #tpu.memory_space<vmem>>, vector<1x512xf32>
    %c7_134 = arith.constant 7 : index
    %c4_135 = arith.constant 4 : index
    %239 = memref.load %arg0[%c7_134, %c4_135] : memref<8x8xi32, #tpu.memory_space<smem>>
    %240 = arith.index_cast %239 : i32 to index
    %c0_136 = arith.constant 0 : index
    %241 = vector.load %arg1[%240, %c0_136] : memref<256x512xf32, #tpu.memory_space<vmem>>, vector<1x512xf32>
    %242 = tpu.concatenate %220, %223, %226, %229, %232, %235, %238, %241 in 0 : vector<1x512xf32>, vector<1x512xf32>, vector<1x512xf32>, vector<1x512xf32>, vector<1x512xf32>, vector<1x512xf32>, vector<1x512xf32>, vector<1x512xf32> -> vector<8x512xf32>
    %243 = arith.truncf %217 : vector<8x128xf32> to vector<8x128xbf16>
    %c0_137 = arith.constant 0 : index
    %c0_138 = arith.constant 0 : index
    %244 = vector.load %arg2[%c0_137, %c0_138] : memref<128x512xbf16, #tpu.memory_space<vmem>>, vector<128x512xbf16>
    %cst_139 = arith.constant dense<0.000000e+00> : vector<8x512xf32>
    %245 = tpu.matmul %243, %244, %cst_139 {dimension_numbers = #tpu.dot_dimension_numbers<[1], [0], [0], [1], [0, 0, 1, 1], [], []>} : vector<8x128xbf16>, vector<128x512xbf16>, vector<8x512xf32> -> vector<8x512xf32>
    %246 = arith.addf %242, %245 : vector<8x512xf32>
    %247 = vector.extract_strided_slice %246 {offsets = [0, 0], sizes = [8, 128], strides = [1, 1]} : vector<8x512xf32> to vector<8x128xf32>
    %248 = arith.negf %247 : vector<8x128xf32>
    %249 = math.exp %248 : vector<8x128xf32>
    %cst_140 = arith.constant 1.000000e+00 : f32
    %250 = vector.broadcast %cst_140 : f32 to vector<8x128xf32>
    %251 = arith.addf %250, %249 : vector<8x128xf32>
    %252 = arith.divf %250, %251 : vector<8x128xf32>
    %253 = vector.extract_strided_slice %246 {offsets = [0, 128], sizes = [8, 128], strides = [1, 1]} : vector<8x512xf32> to vector<8x128xf32>
    %254 = arith.negf %253 : vector<8x128xf32>
    %255 = math.exp %254 : vector<8x128xf32>
    %cst_141 = arith.constant 1.000000e+00 : f32
    %256 = vector.broadcast %cst_141 : f32 to vector<8x128xf32>
    %257 = arith.addf %256, %255 : vector<8x128xf32>
    %258 = arith.divf %256, %257 : vector<8x128xf32>
    %259 = vector.extract_strided_slice %246 {offsets = [0, 256], sizes = [8, 128], strides = [1, 1]} : vector<8x512xf32> to vector<8x128xf32>
    %260 = math.tanh %259 : vector<8x128xf32>
    %261 = vector.extract_strided_slice %246 {offsets = [0, 384], sizes = [8, 128], strides = [1, 1]} : vector<8x512xf32> to vector<8x128xf32>
    %262 = arith.negf %261 : vector<8x128xf32>
    %263 = math.exp %262 : vector<8x128xf32>
    %cst_142 = arith.constant 1.000000e+00 : f32
    %264 = vector.broadcast %cst_142 : f32 to vector<8x128xf32>
    %265 = arith.addf %264, %263 : vector<8x128xf32>
    %266 = arith.divf %264, %265 : vector<8x128xf32>
    %267 = arith.mulf %258, %215 : vector<8x128xf32>
    %268 = arith.mulf %252, %260 : vector<8x128xf32>
    %269 = arith.addf %267, %268 : vector<8x128xf32>
    %270 = math.tanh %269 : vector<8x128xf32>
    %271 = arith.mulf %266, %270 : vector<8x128xf32>
    %c0_143 = arith.constant 0 : index
    %c5_144 = arith.constant 5 : index
    %272 = memref.load %arg0[%c0_143, %c5_144] : memref<8x8xi32, #tpu.memory_space<smem>>
    %273 = arith.index_cast %272 : i32 to index
    %c0_145 = arith.constant 0 : index
    %274 = vector.load %arg1[%273, %c0_145] : memref<256x512xf32, #tpu.memory_space<vmem>>, vector<1x512xf32>
    %c1_146 = arith.constant 1 : index
    %c5_147 = arith.constant 5 : index
    %275 = memref.load %arg0[%c1_146, %c5_147] : memref<8x8xi32, #tpu.memory_space<smem>>
    %276 = arith.index_cast %275 : i32 to index
    %c0_148 = arith.constant 0 : index
    %277 = vector.load %arg1[%276, %c0_148] : memref<256x512xf32, #tpu.memory_space<vmem>>, vector<1x512xf32>
    %c2_149 = arith.constant 2 : index
    %c5_150 = arith.constant 5 : index
    %278 = memref.load %arg0[%c2_149, %c5_150] : memref<8x8xi32, #tpu.memory_space<smem>>
    %279 = arith.index_cast %278 : i32 to index
    %c0_151 = arith.constant 0 : index
    %280 = vector.load %arg1[%279, %c0_151] : memref<256x512xf32, #tpu.memory_space<vmem>>, vector<1x512xf32>
    %c3_152 = arith.constant 3 : index
    %c5_153 = arith.constant 5 : index
    %281 = memref.load %arg0[%c3_152, %c5_153] : memref<8x8xi32, #tpu.memory_space<smem>>
    %282 = arith.index_cast %281 : i32 to index
    %c0_154 = arith.constant 0 : index
    %283 = vector.load %arg1[%282, %c0_154] : memref<256x512xf32, #tpu.memory_space<vmem>>, vector<1x512xf32>
    %c4_155 = arith.constant 4 : index
    %c5_156 = arith.constant 5 : index
    %284 = memref.load %arg0[%c4_155, %c5_156] : memref<8x8xi32, #tpu.memory_space<smem>>
    %285 = arith.index_cast %284 : i32 to index
    %c0_157 = arith.constant 0 : index
    %286 = vector.load %arg1[%285, %c0_157] : memref<256x512xf32, #tpu.memory_space<vmem>>, vector<1x512xf32>
    %c5_158 = arith.constant 5 : index
    %c5_159 = arith.constant 5 : index
    %287 = memref.load %arg0[%c5_158, %c5_159] : memref<8x8xi32, #tpu.memory_space<smem>>
    %288 = arith.index_cast %287 : i32 to index
    %c0_160 = arith.constant 0 : index
    %289 = vector.load %arg1[%288, %c0_160] : memref<256x512xf32, #tpu.memory_space<vmem>>, vector<1x512xf32>
    %c6_161 = arith.constant 6 : index
    %c5_162 = arith.constant 5 : index
    %290 = memref.load %arg0[%c6_161, %c5_162] : memref<8x8xi32, #tpu.memory_space<smem>>
    %291 = arith.index_cast %290 : i32 to index
    %c0_163 = arith.constant 0 : index
    %292 = vector.load %arg1[%291, %c0_163] : memref<256x512xf32, #tpu.memory_space<vmem>>, vector<1x512xf32>
    %c7_164 = arith.constant 7 : index
    %c5_165 = arith.constant 5 : index
    %293 = memref.load %arg0[%c7_164, %c5_165] : memref<8x8xi32, #tpu.memory_space<smem>>
    %294 = arith.index_cast %293 : i32 to index
    %c0_166 = arith.constant 0 : index
    %295 = vector.load %arg1[%294, %c0_166] : memref<256x512xf32, #tpu.memory_space<vmem>>, vector<1x512xf32>
    %296 = tpu.concatenate %274, %277, %280, %283, %286, %289, %292, %295 in 0 : vector<1x512xf32>, vector<1x512xf32>, vector<1x512xf32>, vector<1x512xf32>, vector<1x512xf32>, vector<1x512xf32>, vector<1x512xf32>, vector<1x512xf32> -> vector<8x512xf32>
    %297 = arith.truncf %271 : vector<8x128xf32> to vector<8x128xbf16>
    %c0_167 = arith.constant 0 : index
    %c0_168 = arith.constant 0 : index
    %298 = vector.load %arg2[%c0_167, %c0_168] : memref<128x512xbf16, #tpu.memory_space<vmem>>, vector<128x512xbf16>
    %cst_169 = arith.constant dense<0.000000e+00> : vector<8x512xf32>
    %299 = tpu.matmul %297, %298, %cst_169 {dimension_numbers = #tpu.dot_dimension_numbers<[1], [0], [0], [1], [0, 0, 1, 1], [], []>} : vector<8x128xbf16>, vector<128x512xbf16>, vector<8x512xf32> -> vector<8x512xf32>
    %300 = arith.addf %296, %299 : vector<8x512xf32>
    %301 = vector.extract_strided_slice %300 {offsets = [0, 0], sizes = [8, 128], strides = [1, 1]} : vector<8x512xf32> to vector<8x128xf32>
    %302 = arith.negf %301 : vector<8x128xf32>
    %303 = math.exp %302 : vector<8x128xf32>
    %cst_170 = arith.constant 1.000000e+00 : f32
    %304 = vector.broadcast %cst_170 : f32 to vector<8x128xf32>
    %305 = arith.addf %304, %303 : vector<8x128xf32>
    %306 = arith.divf %304, %305 : vector<8x128xf32>
    %307 = vector.extract_strided_slice %300 {offsets = [0, 128], sizes = [8, 128], strides = [1, 1]} : vector<8x512xf32> to vector<8x128xf32>
    %308 = arith.negf %307 : vector<8x128xf32>
    %309 = math.exp %308 : vector<8x128xf32>
    %cst_171 = arith.constant 1.000000e+00 : f32
    %310 = vector.broadcast %cst_171 : f32 to vector<8x128xf32>
    %311 = arith.addf %310, %309 : vector<8x128xf32>
    %312 = arith.divf %310, %311 : vector<8x128xf32>
    %313 = vector.extract_strided_slice %300 {offsets = [0, 256], sizes = [8, 128], strides = [1, 1]} : vector<8x512xf32> to vector<8x128xf32>
    %314 = math.tanh %313 : vector<8x128xf32>
    %315 = vector.extract_strided_slice %300 {offsets = [0, 384], sizes = [8, 128], strides = [1, 1]} : vector<8x512xf32> to vector<8x128xf32>
    %316 = arith.negf %315 : vector<8x128xf32>
    %317 = math.exp %316 : vector<8x128xf32>
    %cst_172 = arith.constant 1.000000e+00 : f32
    %318 = vector.broadcast %cst_172 : f32 to vector<8x128xf32>
    %319 = arith.addf %318, %317 : vector<8x128xf32>
    %320 = arith.divf %318, %319 : vector<8x128xf32>
    %321 = arith.mulf %312, %269 : vector<8x128xf32>
    %322 = arith.mulf %306, %314 : vector<8x128xf32>
    %323 = arith.addf %321, %322 : vector<8x128xf32>
    %324 = math.tanh %323 : vector<8x128xf32>
    %325 = arith.mulf %320, %324 : vector<8x128xf32>
    %c0_173 = arith.constant 0 : index
    %c6_174 = arith.constant 6 : index
    %326 = memref.load %arg0[%c0_173, %c6_174] : memref<8x8xi32, #tpu.memory_space<smem>>
    %327 = arith.index_cast %326 : i32 to index
    %c0_175 = arith.constant 0 : index
    %328 = vector.load %arg1[%327, %c0_175] : memref<256x512xf32, #tpu.memory_space<vmem>>, vector<1x512xf32>
    %c1_176 = arith.constant 1 : index
    %c6_177 = arith.constant 6 : index
    %329 = memref.load %arg0[%c1_176, %c6_177] : memref<8x8xi32, #tpu.memory_space<smem>>
    %330 = arith.index_cast %329 : i32 to index
    %c0_178 = arith.constant 0 : index
    %331 = vector.load %arg1[%330, %c0_178] : memref<256x512xf32, #tpu.memory_space<vmem>>, vector<1x512xf32>
    %c2_179 = arith.constant 2 : index
    %c6_180 = arith.constant 6 : index
    %332 = memref.load %arg0[%c2_179, %c6_180] : memref<8x8xi32, #tpu.memory_space<smem>>
    %333 = arith.index_cast %332 : i32 to index
    %c0_181 = arith.constant 0 : index
    %334 = vector.load %arg1[%333, %c0_181] : memref<256x512xf32, #tpu.memory_space<vmem>>, vector<1x512xf32>
    %c3_182 = arith.constant 3 : index
    %c6_183 = arith.constant 6 : index
    %335 = memref.load %arg0[%c3_182, %c6_183] : memref<8x8xi32, #tpu.memory_space<smem>>
    %336 = arith.index_cast %335 : i32 to index
    %c0_184 = arith.constant 0 : index
    %337 = vector.load %arg1[%336, %c0_184] : memref<256x512xf32, #tpu.memory_space<vmem>>, vector<1x512xf32>
    %c4_185 = arith.constant 4 : index
    %c6_186 = arith.constant 6 : index
    %338 = memref.load %arg0[%c4_185, %c6_186] : memref<8x8xi32, #tpu.memory_space<smem>>
    %339 = arith.index_cast %338 : i32 to index
    %c0_187 = arith.constant 0 : index
    %340 = vector.load %arg1[%339, %c0_187] : memref<256x512xf32, #tpu.memory_space<vmem>>, vector<1x512xf32>
    %c5_188 = arith.constant 5 : index
    %c6_189 = arith.constant 6 : index
    %341 = memref.load %arg0[%c5_188, %c6_189] : memref<8x8xi32, #tpu.memory_space<smem>>
    %342 = arith.index_cast %341 : i32 to index
    %c0_190 = arith.constant 0 : index
    %343 = vector.load %arg1[%342, %c0_190] : memref<256x512xf32, #tpu.memory_space<vmem>>, vector<1x512xf32>
    %c6_191 = arith.constant 6 : index
    %c6_192 = arith.constant 6 : index
    %344 = memref.load %arg0[%c6_191, %c6_192] : memref<8x8xi32, #tpu.memory_space<smem>>
    %345 = arith.index_cast %344 : i32 to index
    %c0_193 = arith.constant 0 : index
    %346 = vector.load %arg1[%345, %c0_193] : memref<256x512xf32, #tpu.memory_space<vmem>>, vector<1x512xf32>
    %c7_194 = arith.constant 7 : index
    %c6_195 = arith.constant 6 : index
    %347 = memref.load %arg0[%c7_194, %c6_195] : memref<8x8xi32, #tpu.memory_space<smem>>
    %348 = arith.index_cast %347 : i32 to index
    %c0_196 = arith.constant 0 : index
    %349 = vector.load %arg1[%348, %c0_196] : memref<256x512xf32, #tpu.memory_space<vmem>>, vector<1x512xf32>
    %350 = tpu.concatenate %328, %331, %334, %337, %340, %343, %346, %349 in 0 : vector<1x512xf32>, vector<1x512xf32>, vector<1x512xf32>, vector<1x512xf32>, vector<1x512xf32>, vector<1x512xf32>, vector<1x512xf32>, vector<1x512xf32> -> vector<8x512xf32>
    %351 = arith.truncf %325 : vector<8x128xf32> to vector<8x128xbf16>
    %c0_197 = arith.constant 0 : index
    %c0_198 = arith.constant 0 : index
    %352 = vector.load %arg2[%c0_197, %c0_198] : memref<128x512xbf16, #tpu.memory_space<vmem>>, vector<128x512xbf16>
    %cst_199 = arith.constant dense<0.000000e+00> : vector<8x512xf32>
    %353 = tpu.matmul %351, %352, %cst_199 {dimension_numbers = #tpu.dot_dimension_numbers<[1], [0], [0], [1], [0, 0, 1, 1], [], []>} : vector<8x128xbf16>, vector<128x512xbf16>, vector<8x512xf32> -> vector<8x512xf32>
    %354 = arith.addf %350, %353 : vector<8x512xf32>
    %355 = vector.extract_strided_slice %354 {offsets = [0, 0], sizes = [8, 128], strides = [1, 1]} : vector<8x512xf32> to vector<8x128xf32>
    %356 = arith.negf %355 : vector<8x128xf32>
    %357 = math.exp %356 : vector<8x128xf32>
    %cst_200 = arith.constant 1.000000e+00 : f32
    %358 = vector.broadcast %cst_200 : f32 to vector<8x128xf32>
    %359 = arith.addf %358, %357 : vector<8x128xf32>
    %360 = arith.divf %358, %359 : vector<8x128xf32>
    %361 = vector.extract_strided_slice %354 {offsets = [0, 128], sizes = [8, 128], strides = [1, 1]} : vector<8x512xf32> to vector<8x128xf32>
    %362 = arith.negf %361 : vector<8x128xf32>
    %363 = math.exp %362 : vector<8x128xf32>
    %cst_201 = arith.constant 1.000000e+00 : f32
    %364 = vector.broadcast %cst_201 : f32 to vector<8x128xf32>
    %365 = arith.addf %364, %363 : vector<8x128xf32>
    %366 = arith.divf %364, %365 : vector<8x128xf32>
    %367 = vector.extract_strided_slice %354 {offsets = [0, 256], sizes = [8, 128], strides = [1, 1]} : vector<8x512xf32> to vector<8x128xf32>
    %368 = math.tanh %367 : vector<8x128xf32>
    %369 = vector.extract_strided_slice %354 {offsets = [0, 384], sizes = [8, 128], strides = [1, 1]} : vector<8x512xf32> to vector<8x128xf32>
    %370 = arith.negf %369 : vector<8x128xf32>
    %371 = math.exp %370 : vector<8x128xf32>
    %cst_202 = arith.constant 1.000000e+00 : f32
    %372 = vector.broadcast %cst_202 : f32 to vector<8x128xf32>
    %373 = arith.addf %372, %371 : vector<8x128xf32>
    %374 = arith.divf %372, %373 : vector<8x128xf32>
    %375 = arith.mulf %366, %323 : vector<8x128xf32>
    %376 = arith.mulf %360, %368 : vector<8x128xf32>
    %377 = arith.addf %375, %376 : vector<8x128xf32>
    %378 = math.tanh %377 : vector<8x128xf32>
    %379 = arith.mulf %374, %378 : vector<8x128xf32>
    %c0_203 = arith.constant 0 : index
    %c7_204 = arith.constant 7 : index
    %380 = memref.load %arg0[%c0_203, %c7_204] : memref<8x8xi32, #tpu.memory_space<smem>>
    %381 = arith.index_cast %380 : i32 to index
    %c0_205 = arith.constant 0 : index
    %382 = vector.load %arg1[%381, %c0_205] : memref<256x512xf32, #tpu.memory_space<vmem>>, vector<1x512xf32>
    %c1_206 = arith.constant 1 : index
    %c7_207 = arith.constant 7 : index
    %383 = memref.load %arg0[%c1_206, %c7_207] : memref<8x8xi32, #tpu.memory_space<smem>>
    %384 = arith.index_cast %383 : i32 to index
    %c0_208 = arith.constant 0 : index
    %385 = vector.load %arg1[%384, %c0_208] : memref<256x512xf32, #tpu.memory_space<vmem>>, vector<1x512xf32>
    %c2_209 = arith.constant 2 : index
    %c7_210 = arith.constant 7 : index
    %386 = memref.load %arg0[%c2_209, %c7_210] : memref<8x8xi32, #tpu.memory_space<smem>>
    %387 = arith.index_cast %386 : i32 to index
    %c0_211 = arith.constant 0 : index
    %388 = vector.load %arg1[%387, %c0_211] : memref<256x512xf32, #tpu.memory_space<vmem>>, vector<1x512xf32>
    %c3_212 = arith.constant 3 : index
    %c7_213 = arith.constant 7 : index
    %389 = memref.load %arg0[%c3_212, %c7_213] : memref<8x8xi32, #tpu.memory_space<smem>>
    %390 = arith.index_cast %389 : i32 to index
    %c0_214 = arith.constant 0 : index
    %391 = vector.load %arg1[%390, %c0_214] : memref<256x512xf32, #tpu.memory_space<vmem>>, vector<1x512xf32>
    %c4_215 = arith.constant 4 : index
    %c7_216 = arith.constant 7 : index
    %392 = memref.load %arg0[%c4_215, %c7_216] : memref<8x8xi32, #tpu.memory_space<smem>>
    %393 = arith.index_cast %392 : i32 to index
    %c0_217 = arith.constant 0 : index
    %394 = vector.load %arg1[%393, %c0_217] : memref<256x512xf32, #tpu.memory_space<vmem>>, vector<1x512xf32>
    %c5_218 = arith.constant 5 : index
    %c7_219 = arith.constant 7 : index
    %395 = memref.load %arg0[%c5_218, %c7_219] : memref<8x8xi32, #tpu.memory_space<smem>>
    %396 = arith.index_cast %395 : i32 to index
    %c0_220 = arith.constant 0 : index
    %397 = vector.load %arg1[%396, %c0_220] : memref<256x512xf32, #tpu.memory_space<vmem>>, vector<1x512xf32>
    %c6_221 = arith.constant 6 : index
    %c7_222 = arith.constant 7 : index
    %398 = memref.load %arg0[%c6_221, %c7_222] : memref<8x8xi32, #tpu.memory_space<smem>>
    %399 = arith.index_cast %398 : i32 to index
    %c0_223 = arith.constant 0 : index
    %400 = vector.load %arg1[%399, %c0_223] : memref<256x512xf32, #tpu.memory_space<vmem>>, vector<1x512xf32>
    %c7_224 = arith.constant 7 : index
    %c7_225 = arith.constant 7 : index
    %401 = memref.load %arg0[%c7_224, %c7_225] : memref<8x8xi32, #tpu.memory_space<smem>>
    %402 = arith.index_cast %401 : i32 to index
    %c0_226 = arith.constant 0 : index
    %403 = vector.load %arg1[%402, %c0_226] : memref<256x512xf32, #tpu.memory_space<vmem>>, vector<1x512xf32>
    %404 = tpu.concatenate %382, %385, %388, %391, %394, %397, %400, %403 in 0 : vector<1x512xf32>, vector<1x512xf32>, vector<1x512xf32>, vector<1x512xf32>, vector<1x512xf32>, vector<1x512xf32>, vector<1x512xf32>, vector<1x512xf32> -> vector<8x512xf32>
    %405 = arith.truncf %379 : vector<8x128xf32> to vector<8x128xbf16>
    %c0_227 = arith.constant 0 : index
    %c0_228 = arith.constant 0 : index
    %406 = vector.load %arg2[%c0_227, %c0_228] : memref<128x512xbf16, #tpu.memory_space<vmem>>, vector<128x512xbf16>
    %cst_229 = arith.constant dense<0.000000e+00> : vector<8x512xf32>
    %407 = tpu.matmul %405, %406, %cst_229 {dimension_numbers = #tpu.dot_dimension_numbers<[1], [0], [0], [1], [0, 0, 1, 1], [], []>} : vector<8x128xbf16>, vector<128x512xbf16>, vector<8x512xf32> -> vector<8x512xf32>
    %408 = arith.addf %404, %407 : vector<8x512xf32>
    %409 = vector.extract_strided_slice %408 {offsets = [0, 0], sizes = [8, 128], strides = [1, 1]} : vector<8x512xf32> to vector<8x128xf32>
    %410 = arith.negf %409 : vector<8x128xf32>
    %411 = math.exp %410 : vector<8x128xf32>
    %cst_230 = arith.constant 1.000000e+00 : f32
    %412 = vector.broadcast %cst_230 : f32 to vector<8x128xf32>
    %413 = arith.addf %412, %411 : vector<8x128xf32>
    %414 = arith.divf %412, %413 : vector<8x128xf32>
    %415 = vector.extract_strided_slice %408 {offsets = [0, 128], sizes = [8, 128], strides = [1, 1]} : vector<8x512xf32> to vector<8x128xf32>
    %416 = arith.negf %415 : vector<8x128xf32>
    %417 = math.exp %416 : vector<8x128xf32>
    %cst_231 = arith.constant 1.000000e+00 : f32
    %418 = vector.broadcast %cst_231 : f32 to vector<8x128xf32>
    %419 = arith.addf %418, %417 : vector<8x128xf32>
    %420 = arith.divf %418, %419 : vector<8x128xf32>
    %421 = vector.extract_strided_slice %408 {offsets = [0, 256], sizes = [8, 128], strides = [1, 1]} : vector<8x512xf32> to vector<8x128xf32>
    %422 = math.tanh %421 : vector<8x128xf32>
    %423 = vector.extract_strided_slice %408 {offsets = [0, 384], sizes = [8, 128], strides = [1, 1]} : vector<8x512xf32> to vector<8x128xf32>
    %424 = arith.negf %423 : vector<8x128xf32>
    %425 = math.exp %424 : vector<8x128xf32>
    %cst_232 = arith.constant 1.000000e+00 : f32
    %426 = vector.broadcast %cst_232 : f32 to vector<8x128xf32>
    %427 = arith.addf %426, %425 : vector<8x128xf32>
    %428 = arith.divf %426, %427 : vector<8x128xf32>
    %429 = arith.mulf %420, %377 : vector<8x128xf32>
    %430 = arith.mulf %414, %422 : vector<8x128xf32>
    %431 = arith.addf %429, %430 : vector<8x128xf32>
    %432 = math.tanh %431 : vector<8x128xf32>
    %433 = arith.mulf %428, %432 : vector<8x128xf32>
    %434 = tpu.concatenate %55, %109, %163, %217, %271, %325, %379, %433 in 0 : vector<8x128xf32>, vector<8x128xf32>, vector<8x128xf32>, vector<8x128xf32>, vector<8x128xf32>, vector<8x128xf32>, vector<8x128xf32>, vector<8x128xf32> -> vector<64x128xf32>
    %435 = arith.truncf %434 : vector<64x128xf32> to vector<64x128xbf16>
    %c0_233 = arith.constant 0 : index
    %c0_234 = arith.constant 0 : index
    %436 = vector.load %arg3[%c0_233, %c0_234] : memref<128x256xbf16, #tpu.memory_space<vmem>>, vector<128x256xbf16>
    %cst_235 = arith.constant dense<0.000000e+00> : vector<64x256xf32>
    %437 = tpu.matmul %435, %436, %cst_235 {dimension_numbers = #tpu.dot_dimension_numbers<[1], [0], [0], [1], [0, 0, 1, 1], [], []>} : vector<64x128xbf16>, vector<128x256xbf16>, vector<64x256xf32> -> vector<64x256xf32>
    %c0_236 = arith.constant 0 : index
    %c0_237 = arith.constant 0 : index
    %438 = vector.load %arg4[%c0_236, %c0_237] : memref<1x256xf32, #tpu.memory_space<vmem>>, vector<1x256xf32>
    %439 = vector.broadcast %438 : vector<1x256xf32> to vector<64x256xf32>
    %440 = arith.addf %437, %439 : vector<64x256xf32>
    %441 = vector.shape_cast %440 : vector<64x256xf32> to vector<8x8x256xf32>
    %442 = vector.extract_strided_slice %441 {offsets = [0, 0, 0], sizes = [8, 1, 256], strides = [1, 1, 1]} : vector<8x8x256xf32> to vector<8x1x256xf32>
    %443 = vector.shape_cast %442 : vector<8x1x256xf32> to vector<8x256xf32>
    %c0_238 = arith.constant 0 : index
    %c0_239 = arith.constant 0 : index
    %c0_240 = arith.constant 0 : index
    %444 = vector.load %arg5[%c0_238, %c0_239, %c0_240] : memref<8x8x256xf32, #tpu.memory_space<vmem>>, vector<1x8x256xf32>
    %445 = vector.shape_cast %444 : vector<1x8x256xf32> to vector<8x256xf32>
    %446 = vector.shape_cast %443 : vector<8x256xf32> to vector<1x8x256xf32>
    tpu.vector_store %arg5[%c0_238, %c0_239, %c0_240], %446 {strides = array<i32>} : memref<8x8x256xf32, #tpu.memory_space<vmem>>, vector<1x8x256xf32>,
    %447 = vector.extract_strided_slice %441 {offsets = [0, 1, 0], sizes = [8, 1, 256], strides = [1, 1, 1]} : vector<8x8x256xf32> to vector<8x1x256xf32>
    %448 = vector.shape_cast %447 : vector<8x1x256xf32> to vector<8x256xf32>
    %c1_241 = arith.constant 1 : index
    %c0_242 = arith.constant 0 : index
    %c0_243 = arith.constant 0 : index
    %449 = vector.load %arg5[%c1_241, %c0_242, %c0_243] : memref<8x8x256xf32, #tpu.memory_space<vmem>>, vector<1x8x256xf32>
    %450 = vector.shape_cast %449 : vector<1x8x256xf32> to vector<8x256xf32>
    %451 = vector.shape_cast %448 : vector<8x256xf32> to vector<1x8x256xf32>
    tpu.vector_store %arg5[%c1_241, %c0_242, %c0_243], %451 {strides = array<i32>} : memref<8x8x256xf32, #tpu.memory_space<vmem>>, vector<1x8x256xf32>,
    %452 = vector.extract_strided_slice %441 {offsets = [0, 2, 0], sizes = [8, 1, 256], strides = [1, 1, 1]} : vector<8x8x256xf32> to vector<8x1x256xf32>
    %453 = vector.shape_cast %452 : vector<8x1x256xf32> to vector<8x256xf32>
    %c2_244 = arith.constant 2 : index
    %c0_245 = arith.constant 0 : index
    %c0_246 = arith.constant 0 : index
    %454 = vector.load %arg5[%c2_244, %c0_245, %c0_246] : memref<8x8x256xf32, #tpu.memory_space<vmem>>, vector<1x8x256xf32>
    %455 = vector.shape_cast %454 : vector<1x8x256xf32> to vector<8x256xf32>
    %456 = vector.shape_cast %453 : vector<8x256xf32> to vector<1x8x256xf32>
    tpu.vector_store %arg5[%c2_244, %c0_245, %c0_246], %456 {strides = array<i32>} : memref<8x8x256xf32, #tpu.memory_space<vmem>>, vector<1x8x256xf32>,
    %457 = vector.extract_strided_slice %441 {offsets = [0, 3, 0], sizes = [8, 1, 256], strides = [1, 1, 1]} : vector<8x8x256xf32> to vector<8x1x256xf32>
    %458 = vector.shape_cast %457 : vector<8x1x256xf32> to vector<8x256xf32>
    %c3_247 = arith.constant 3 : index
    %c0_248 = arith.constant 0 : index
    %c0_249 = arith.constant 0 : index
    %459 = vector.load %arg5[%c3_247, %c0_248, %c0_249] : memref<8x8x256xf32, #tpu.memory_space<vmem>>, vector<1x8x256xf32>
    %460 = vector.shape_cast %459 : vector<1x8x256xf32> to vector<8x256xf32>
    %461 = vector.shape_cast %458 : vector<8x256xf32> to vector<1x8x256xf32>
    tpu.vector_store %arg5[%c3_247, %c0_248, %c0_249], %461 {strides = array<i32>} : memref<8x8x256xf32, #tpu.memory_space<vmem>>, vector<1x8x256xf32>,
    %462 = vector.extract_strided_slice %441 {offsets = [0, 4, 0], sizes = [8, 1, 256], strides = [1, 1, 1]} : vector<8x8x256xf32> to vector<8x1x256xf32>
    %463 = vector.shape_cast %462 : vector<8x1x256xf32> to vector<8x256xf32>
    %c4_250 = arith.constant 4 : index
    %c0_251 = arith.constant 0 : index
    %c0_252 = arith.constant 0 : index
    %464 = vector.load %arg5[%c4_250, %c0_251, %c0_252] : memref<8x8x256xf32, #tpu.memory_space<vmem>>, vector<1x8x256xf32>
    %465 = vector.shape_cast %464 : vector<1x8x256xf32> to vector<8x256xf32>
    %466 = vector.shape_cast %463 : vector<8x256xf32> to vector<1x8x256xf32>
    tpu.vector_store %arg5[%c4_250, %c0_251, %c0_252], %466 {strides = array<i32>} : memref<8x8x256xf32, #tpu.memory_space<vmem>>, vector<1x8x256xf32>,
    %467 = vector.extract_strided_slice %441 {offsets = [0, 5, 0], sizes = [8, 1, 256], strides = [1, 1, 1]} : vector<8x8x256xf32> to vector<8x1x256xf32>
    %468 = vector.shape_cast %467 : vector<8x1x256xf32> to vector<8x256xf32>
    %c5_253 = arith.constant 5 : index
    %c0_254 = arith.constant 0 : index
    %c0_255 = arith.constant 0 : index
    %469 = vector.load %arg5[%c5_253, %c0_254, %c0_255] : memref<8x8x256xf32, #tpu.memory_space<vmem>>, vector<1x8x256xf32>
    %470 = vector.shape_cast %469 : vector<1x8x256xf32> to vector<8x256xf32>
    %471 = vector.shape_cast %468 : vector<8x256xf32> to vector<1x8x256xf32>
    tpu.vector_store %arg5[%c5_253, %c0_254, %c0_255], %471 {strides = array<i32>} : memref<8x8x256xf32, #tpu.memory_space<vmem>>, vector<1x8x256xf32>,
    %472 = vector.extract_strided_slice %441 {offsets = [0, 6, 0], sizes = [8, 1, 256], strides = [1, 1, 1]} : vector<8x8x256xf32> to vector<8x1x256xf32>
    %473 = vector.shape_cast %472 : vector<8x1x256xf32> to vector<8x256xf32>
    %c6_256 = arith.constant 6 : index
    %c0_257 = arith.constant 0 : index
    %c0_258 = arith.constant 0 : index
    %474 = vector.load %arg5[%c6_256, %c0_257, %c0_258] : memref<8x8x256xf32, #tpu.memory_space<vmem>>, vector<1x8x256xf32>
    %475 = vector.shape_cast %474 : vector<1x8x256xf32> to vector<8x256xf32>
    %476 = vector.shape_cast %473 : vector<8x256xf32> to vector<1x8x256xf32>
    tpu.vector_store %arg5[%c6_256, %c0_257, %c0_258], %476 {strides = array<i32>} : memref<8x8x256xf32, #tpu.memory_space<vmem>>, vector<1x8x256xf32>,
    %477 = vector.extract_strided_slice %441 {offsets = [0, 7, 0], sizes = [8, 1, 256], strides = [1, 1, 1]} : vector<8x8x256xf32> to vector<8x1x256xf32>
    %478 = vector.shape_cast %477 : vector<8x1x256xf32> to vector<8x256xf32>
    %c7_259 = arith.constant 7 : index
    %c0_260 = arith.constant 0 : index
    %c0_261 = arith.constant 0 : index
    %479 = vector.load %arg5[%c7_259, %c0_260, %c0_261] : memref<8x8x256xf32, #tpu.memory_space<vmem>>, vector<1x8x256xf32>
    %480 = vector.shape_cast %479 : vector<1x8x256xf32> to vector<8x256xf32>
    %481 = vector.shape_cast %478 : vector<8x256xf32> to vector<1x8x256xf32>
    tpu.vector_store %arg5[%c7_259, %c0_260, %c0_261], %481 {strides = array<i32>} : memref<8x8x256xf32, #tpu.memory_space<vmem>>, vector<1x8x256xf32>,
    return
  }
}

</mosaic_0001>

<bundles_post_ra>
// kernel: base_language_model_forward.1
= control target key start
LH: loop header
LB: loop body
LE: loop exit
PB: predicated region body
PF: predicated region fallthrough
CT: control target
= control target key end

     0   :  { %10 = vsyncpa [#allocation5], 0  ;;  %s6261_s0 = inlined_call_operand.hbm [shape: s32[8,8], index: 0, kind: input, shape index: {}]   ;;  %s6262_s1 = inlined_call_operand.hbm [shape: f32[256,512], index: 1, kind: input, shape index: {}]   ;;  %s6263_s2 = inlined_call_operand.hbm [shape: bf16[128,512], index: 2, kind: input, shape index: {}]   ;;  %s6264_s3 = inlined_call_operand.hbm [shape: bf16[128,256], index: 3, kind: input, shape index: {}]   ;;  %s6265_s4 = inlined_call_operand.vmem [shape: f32[1,256], index: 4, kind: input, shape index: {}]   ;;  %s6266_s5 = inlined_call_operand.hbm [shape: f32[8,8,256], index: 5, kind: output, shape index: {}]  }
   0x1   :  { %11 = vsyncpa [#allocation3], 0 }
   0x2   :  { %12 = vsyncpa [#allocation8], 0 }
   0x3   :  { %13 = vsyncpa [#allocation4], 0  ;;  %s4758_s18 = smov [#allocation7]   ;;  %s4652_s22 = scalar_lea.hbm %s6263_s2, 4096 }
   0x4   :  { %s39_s19 = sshll.u32 %s4758_s18, 4  ;;  %p4653_p0 = scmp.ne.s32.totalorder %s6263_s2, %s4652_s22  ;;  %s40_s19 = int_to_ptr.vmem [resolvable:$true] %s39_s19 }
   0x5   :  { %p4656_p1 = scmp.lt.u32.totalorder %s4652_s22, %s6263_s2 }
   0x7   :  { %p4658_p2 = pnand %p4656_p1, %p4653_p0 }
   0x9   :  { %4661 = shalt.err (!%p4658_p2)
}
   0xa   :  { %s4662_s27 = scalar_lea.vmem %s40_s19, 4096  ;;  %p4667_p4 = scmp.lt.s32.totalorder %s40_s19, %s40_s19 }
   0xb   :  { %p4663_p3 = scmp.ne.s32.totalorder %s40_s19, %s4662_s27  ;;  %p4668_p5 = scmp.lt.s32.totalorder %s4662_s27, %s4662_s27 }
   0xd   :  { %p4669_p6 = por %p4668_p5, %p4667_p4 }
   0xf   :  { %p4670_p7 = pnand %p4669_p6, %p4663_p3 }
  0x11   :  { %4673 = shalt.err (!%p4670_p7)
}
  0x12   :  { %s4759_s28 = smov 256   ;;  %s4760_s29 = smov 16  }
  0x13   :  { %45 = dma.hbm_to_vmem [thread:$0]  %s6263_s2, 4096, %s40_s19, [#allocation8], %s4759_s28, %s4759_s28, %s4760_s29  }
  0x14   :  { %s4674_s9 = scalar_lea.hbm %s6261_s0, 128 }
  0x15   :  { %p4675_p8 = scmp.ne.s32.totalorder %s6261_s0, %s4674_s9  ;;  %p4678_p9 = scmp.lt.u32.totalorder %s4674_s9, %s6261_s0 }
  0x17   :  { %p4680_p10 = pnand %p4678_p9, %p4675_p8 }
  0x19   :  { %4683 = shalt.err (!%p4680_p10)
}
  0x1a   :  { %s4761_s14 = smov [#allocation2]   ;;  %s4762_s2 = smov [#allocation6]  }
  0x1b   :  { %21 = dma.hbm_to_smem %s6261_s0, 128, %s4761_s14, [#allocation5]  }
  0x1c   :  { %s27_s17 = sshll.u32 %s4762_s2, 4  ;;  %s4684_s20 = scalar_lea.hbm %s6262_s1, 16384  ;;  %s28_s17 = int_to_ptr.vmem [resolvable:$true] %s27_s17 }
  0x1d   :  { %p4685_p11 = scmp.ne.s32.totalorder %s6262_s1, %s4684_s20  ;;  %p4688_p12 = scmp.lt.u32.totalorder %s4684_s20, %s6262_s1 }
  0x1f   :  { %p4690_p13 = pnand %p4688_p12, %p4685_p11 }
  0x21   :  { %4693 = shalt.err (!%p4690_p13)
}
  0x22   :  { %s4694_s25 = scalar_lea.vmem %s28_s17, 16384  ;;  %p4699_p1 = scmp.lt.s32.totalorder %s28_s17, %s28_s17 }
  0x23   :  { %p4695_p0 = scmp.ne.s32.totalorder %s28_s17, %s4694_s25  ;;  %p4700_p2 = scmp.lt.s32.totalorder %s4694_s25, %s4694_s25 }
  0x25   :  { %p4701_p3 = por %p4700_p2, %p4699_p1 }
  0x27   :  { %p4702_p4 = pnand %p4701_p3, %p4695_p0 }
  0x29   :  { %4705 = shalt.err (!%p4702_p4)
}
  0x2a   :  { %s4763_s0 = smov 512   ;;  %s4764_s26 = smov 32  }
  0x2b   :  { %33 = dma.hbm_to_vmem [thread:$0]  %s6262_s1, 16384, %s28_s17, [#allocation3], %s4763_s0, %s4763_s0, %s4764_s26  }
  0x2c   :  { %s4765_s6 = smov [#allocation9]   ;;  %s4706_s10 = scalar_lea.hbm %s6264_s3, 2048 }
  0x2d   :  { %s51_s7 = sshll.u32 %s4765_s6, 4  ;;  %p4707_p5 = scmp.ne.s32.totalorder %s6264_s3, %s4706_s10  ;;  %s52_s7 = int_to_ptr.vmem [resolvable:$true] %s51_s7 }
  0x2e   :  { %p4710_p6 = scmp.lt.u32.totalorder %s4706_s10, %s6264_s3 }
  0x30   :  { %p4712_p7 = pnand %p4710_p6, %p4707_p5 }
  0x32   :  { %4715 = shalt.err (!%p4712_p7)
}
  0x33   :  { %s4716_s15 = scalar_lea.vmem %s52_s7, 2048  ;;  %p4721_p9 = scmp.lt.s32.totalorder %s52_s7, %s52_s7 }
  0x34   :  { %p4717_p8 = scmp.ne.s32.totalorder %s52_s7, %s4716_s15  ;;  %p4722_p10 = scmp.lt.s32.totalorder %s4716_s15, %s4716_s15 }
  0x36   :  { %p4723_p11 = por %p4722_p10, %p4721_p9 }
  0x38   :  { %p4724_p12 = pnand %p4723_p11, %p4717_p8 }
  0x3a   :  { %4727 = shalt.err (!%p4724_p12)
}
  0x3b   :  { %s4766_s1 = smov 128   ;;  %s4767_s16 = smov 8  }
  0x3c   :  { %57 = dma.hbm_to_vmem [thread:$0]  %s6264_s3, 2048, %s52_s7, [#allocation8], %s4766_s1, %s4766_s1, %s4767_s16  }
  0x3d   :  { %4750 = dma.done.wait [#allocation5], 128  }
  0x3e   :  { %4751 = vsyncadd [#allocation5], 4294967168 }
  0x3f   :  { %4752 = dma.done.wait [#allocation3], 16384  }
  0x40   :  { %4753 = vsyncadd [#allocation3], 4294950912 }
  0x41   :  { %4754 = dma.done.wait [#allocation8], 6144  }
  0x42   :  { %4755 = vsyncadd [#allocation8], 4294961152 }
  0x43   :  { %72 = sfence }
  0x44   :  { %v4851_v0 = vld [vmem:[#allocation7 + $0x4] ss:$16 sps:$4 sm:$0xff]   ;;  %v4853_v1 = vld [vmem:[#allocation7] ss:$16 sps:$4 sm:$0xff]   ;;  %v6267_v2 = vmov 0   ;;  %s74_s3 = sld [smem:[#allocation2]]  ;;  %v155_v33 = vlaneseq }
  0x45   :  { %581 = vmatprep.mubr.bf16.mxu1 %v6267_v2  ;;  %968 = vmatprep.mubr.bf16.mxu0 %v6267_v2  ;;  %v4858_v3 = vld [vmem:[#allocation7 + $0x24] ss:$16 sps:$4 sm:$0xff]   ;;  %v4862_v4 = vld [vmem:[#allocation7 + $0x20] ss:$16 sps:$4 sm:$0xff]   ;;  %v4911_v17 = vld [vmem:[#allocation7 + $0xc] ss:$16 sps:$4 sm:$0xff]  }
  0x46   :  { %549 = vmatprep.subr.bf16.mxu1 %v4851_v0  ;;  %936 = vmatprep.subr.bf16.mxu0 %v4851_v0  ;;  %v4866_v5 = vld [vmem:[#allocation7 + $0x44] ss:$16 sps:$4 sm:$0xff]   ;;  %v4870_v6 = vld [vmem:[#allocation7 + $0x40] ss:$16 sps:$4 sm:$0xff]   ;;  %v4918_v18 = vld [vmem:[#allocation7 + $0x8] ss:$16 sps:$4 sm:$0xff]  }
  0x47   :  { %550 = vmatpush1.bf16.msra.mxu1 %v4853_v1  ;;  %937 = vmatpush1.bf16.msra.mxu0 %v4853_v1  ;;  %v4874_v7 = vld [vmem:[#allocation7 + $0x64] ss:$16 sps:$4 sm:$0xff]   ;;  %v4878_v8 = vld [vmem:[#allocation7 + $0x60] ss:$16 sps:$4 sm:$0xff]   ;;  %v4922_v19 = vld [vmem:[#allocation7 + $0x2c] ss:$16 sps:$4 sm:$0xff]  }
  0x48   :  { %551 = vmatprep.subr.bf16.mxu1 %v4858_v3  ;;  %938 = vmatprep.subr.bf16.mxu0 %v4858_v3  ;;  %v4882_v9 = vld [vmem:[#allocation7 + $0x84] ss:$16 sps:$4 sm:$0xff]   ;;  %v4886_v10 = vld [vmem:[#allocation7 + $0x80] ss:$16 sps:$4 sm:$0xff]   ;;  %v4927_v20 = vld [vmem:[#allocation7 + $0x28] ss:$16 sps:$4 sm:$0xff]  }
  0x49   :  { %v4890_v11 = vld [vmem:[#allocation7 + $0xa4] ss:$16 sps:$4 sm:$0xff]   ;;  %v4894_v12 = vld [vmem:[#allocation7 + $0xa0] ss:$16 sps:$4 sm:$0xff]   ;;  %v4931_v21 = vld [vmem:[#allocation7 + $0x4c] ss:$16 sps:$4 sm:$0xff]  }
  0x4a   :  { %v4898_v13 = vld [vmem:[#allocation7 + $0xc4] ss:$16 sps:$4 sm:$0xff]   ;;  %v4902_v14 = vld [vmem:[#allocation7 + $0xc0] ss:$16 sps:$4 sm:$0xff]   ;;  %v4934_v22 = vld [vmem:[#allocation7 + $0x48] ss:$16 sps:$4 sm:$0xff]  }
  0x4b   :  { %552 = vmatpush1.bf16.msra.mxu1 %v4862_v4  ;;  %939 = vmatpush1.bf16.msra.mxu0 %v4862_v4  ;;  %v4906_v15 = vld [vmem:[#allocation7 + $0xe4] ss:$16 sps:$4 sm:$0xff]   ;;  %v4909_v16 = vld [vmem:[#allocation7 + $0xe0] ss:$16 sps:$4 sm:$0xff]   ;;  %v4937_v23 = vld [vmem:[#allocation7 + $0x6c] ss:$16 sps:$4 sm:$0xff]  }
  0x4c   :  { %553 = vmatprep.subr.bf16.mxu1 %v4866_v5  ;;  %940 = vmatprep.subr.bf16.mxu0 %v4866_v5  ;;  %v4940_v24 = vld [vmem:[#allocation7 + $0x68] ss:$16 sps:$4 sm:$0xff]   ;;  %v4943_v25 = vld [vmem:[#allocation7 + $0x8c] ss:$16 sps:$4 sm:$0xff]   ;;  %s4052_s18 = sld [smem:[#allocation2 + $0x80]]  ;;  %s75_s20 = sshra.s32 %s74_s3, 3 }
  0x4d   :  { %v4946_v26 = vld [vmem:[#allocation7 + $0x88] ss:$16 sps:$4 sm:$0xff]   ;;  %v4949_v27 = vld [vmem:[#allocation7 + $0xac] ss:$16 sps:$4 sm:$0xff]   ;;  %s4055_s19 = sld [smem:[#allocation2 + $0x100]]  ;;  %s78_s22 = sand.u32 7, %s74_s3 }
  0x4e   :  { %v4952_v28 = vld [vmem:[#allocation7 + $0xa8] ss:$16 sps:$4 sm:$0xff]   ;;  %v4955_v29 = vld [vmem:[#allocation7 + $0xcc] ss:$16 sps:$4 sm:$0xff]   ;;  %s4058_s21 = sld [smem:[#allocation2 + $0x180]]  ;;  %s4313_s23 = sshll.u32 %s75_s20, 5 }
  0x4f   :  { %554 = vmatpush1.bf16.msra.mxu1 %v4870_v6  ;;  %941 = vmatpush1.bf16.msra.mxu0 %v4870_v6  ;;  %v4958_v30 = vld [vmem:[#allocation7 + $0xc8] ss:$16 sps:$4 sm:$0xff]   ;;  %v4961_v31 = vld [vmem:[#allocation7 + $0xec] ss:$16 sps:$4 sm:$0xff]   ;;  %s4987_s0 = sld [smem:[#allocation2 + $0x200]]  ;;  %s81_s26 = sadd.s32 %s4313_s23, %s78_s22  ;;  %v4993_v34 = vshrl.u32 %v155_v33, 7 }
  0x50   :  { %555 = vmatprep.subr.bf16.mxu1 %v4874_v7  ;;  %942 = vmatprep.subr.bf16.mxu0 %v4874_v7  ;;  %v4964_v32 = vld [vmem:[#allocation7 + $0xe8] ss:$16 sps:$4 sm:$0xff]   ;;  %s4989_s27 = sld [smem:[#allocation2 + $0x280]]  ;;  %s82_s2 = scalar_lea.vmem [#allocation6], %s81_s26  ;;  %vm322_vm0 = vcmask 1040384   ;;  %vm327_vm1 = vcmask 1041408  }
  0x51   :  { %s4991_s11 = sld [smem:[#allocation2 + $0x300]]  ;;  %v4999_v35 = vld [vmem:[%s82_s2] ss:$8 sm:$0xf]  ;;  %v5002_v36 = vsub.s32 1, %v4993_v34  ;;  %v5008_v38 = vsub.s32 0, %v4993_v34 }
  0x52   :  { %s85_s24 = sshra.s32 %s4052_s18, 3  ;;  %s88_s30 = sand.u32 7, %s4052_s18  ;;  %vm332_vm2 = vcmask 1042432   ;;  %vm337_vm3 = vcmask 1043456   ;;  %vm342_vm4 = vcmask 1044480   ;;  %vm347_vm5 = vcmask 1045504  }
  0x53   :  { %556 = vmatpush1.bf16.msra.mxu1 %v4878_v8  ;;  %943 = vmatpush1.bf16.msra.mxu0 %v4878_v8  ;;  %s95_s25 = sshra.s32 %s4055_s19, 3  ;;  %s4314_s6 = sshll.u32 %s85_s24, 5  ;;  %v162_v40 = vrot.slane %v4999_v35, %v5002_v36  ;;  %v158_v42 = vrot.slane %v4999_v35, %v5008_v38  ;;  %vm352_vm6 = vcmask 1046528   ;;  %vm3570_vm7 = vcmask 1041409  }
  0x54   :  { %557 = vmatprep.subr.bf16.mxu1 %v4882_v9  ;;  %944 = vmatprep.subr.bf16.mxu0 %v4882_v9  ;;  %s98_s7 = sand.u32 7, %s4055_s19  ;;  %s4315_s8 = sshll.u32 %s95_s25, 5  ;;  %vm3573_vm8 = vcmask 1042434   ;;  %vm3576_vm9 = vcmask 1043459   ;;  %vm3579_vm10 = vcmask 1044484   ;;  %vm3582_vm11 = vcmask 1045509  }
  0x55   :  { %s105_s9 = sshra.s32 %s4058_s21, 3  ;;  %s91_s10 = sadd.s32 %s4314_s6, %s88_s30  ;;  %vm3585_vm12 = vcmask 1046534   ;;  %vm3588_vm13 = vcmask 1047559  }
  0x56   :  { %s101_s12 = sadd.s32 %s4315_s8, %s98_s7  ;;  %s108_s13 = sand.u32 7, %s4058_s21 }
  0x57   :  { %558 = vmatpush1.bf16.msra.mxu1 %v4886_v10  ;;  %945 = vmatpush1.bf16.msra.mxu0 %v4886_v10  ;;  %s4316_s14 = sshll.u32 %s105_s9, 5  ;;  %s115_s15 = sshra.s32 %s4987_s0, 3 }
  0x58   :  { %559 = vmatprep.subr.bf16.mxu1 %v4890_v11  ;;  %946 = vmatprep.subr.bf16.mxu0 %v4890_v11  ;;  %s125_s1 = sshra.s32 %s4989_s27, 3  ;;  %s4997_s16 = sld [smem:[#allocation2 + $0x380]] }
  0x59   :  { %s111_s17 = sadd.s32 %s4316_s14, %s108_s13  ;;  %s92_s3 = scalar_lea.vmem [#allocation6], %s91_s10 }
  0x5a   :  { %v5004_v37 = vld [vmem:[%s92_s3] ss:$8 sm:$0xf]  ;;  %s118_s18 = sand.u32 7, %s4987_s0  ;;  %s4317_s19 = sshll.u32 %s115_s15, 5 }
  0x5b   :  { %560 = vmatpush1.bf16.msra.mxu1 %v4894_v12  ;;  %947 = vmatpush1.bf16.msra.mxu0 %v4894_v12  ;;  %s128_s20 = sand.u32 7, %s4989_s27  ;;  %s4318_s21 = sshll.u32 %s125_s1, 5  ;;  %v183_v41 = vrot.slane %v5004_v37, %v5002_v36  ;;  %v179_v43 = vrot.slane %v5004_v37, %v5008_v38 }
  0x5c   :  { %561 = vmatprep.subr.bf16.mxu1 %v4898_v13  ;;  %948 = vmatprep.subr.bf16.mxu0 %v4898_v13  ;;  %s135_s22 = sshra.s32 %s4991_s11, 3  ;;  %s102_s23 = scalar_lea.vmem [#allocation6], %s101_s12 }
  0x5d   :  { %v5012_v39 = vld [vmem:[%s102_s23] ss:$8 sm:$0xf]  ;;  %s121_s24 = sadd.s32 %s4317_s19, %s118_s18  ;;  %s131_s25 = sadd.s32 %s4318_s21, %s128_s20  ;;  %v324_v47 = vsel %vm322_vm0, %v162_v40, %v183_v41  ;;  %v323_v48 = vsel %vm322_vm0, %v158_v42, %v179_v43 }
  0x5e   :  { %s138_s0 = sand.u32 7, %s4991_s11  ;;  %s4319_s26 = sshll.u32 %s135_s22, 5  ;;  %v204_v45 = vrot.slane %v5012_v39, %v5002_v36  ;;  %v200_v46 = vrot.slane %v5012_v39, %v5008_v38 }
  0x5f   :  { %562 = vmatpush1.bf16.msra.mxu1 %v4902_v14  ;;  %949 = vmatpush1.bf16.msra.mxu0 %v4902_v14  ;;  %s112_s27 = scalar_lea.vmem [#allocation6], %s111_s17  ;;  %s145_s30 = sshra.s32 %s4997_s16, 3 }
  0x60   :  { %563 = vmatprep.subr.bf16.mxu1 %v4906_v15  ;;  %950 = vmatprep.subr.bf16.mxu0 %v4906_v15  ;;  %v5023_v44 = vld [vmem:[%s112_s27] ss:$8 sm:$0xf]  ;;  %s141_s6 = sadd.s32 %s4319_s26, %s138_s0  ;;  %s122_s7 = scalar_lea.vmem [#allocation6], %s121_s24  ;;  %v329_v52 = vsel %vm327_vm1, %v324_v47, %v204_v45  ;;  %v328_v53 = vsel %vm327_vm1, %v323_v48, %v200_v46 }
  0x61   :  { %v5032_v49 = vld [vmem:[%s122_s7] ss:$8 sm:$0xf]  ;;  %s148_s8 = sand.u32 7, %s4997_s16  ;;  %s4320_s9 = sshll.u32 %s145_s30, 5  ;;  %v225_v50 = vrot.slane %v5023_v44, %v5002_v36  ;;  %v221_v51 = vrot.slane %v5023_v44, %v5008_v38 }
  0x62   :  { %s132_s10 = scalar_lea.vmem [#allocation6], %s131_s25  ;;  %s151_s11 = sadd.s32 %s4320_s9, %s148_s8  ;;  %v246_v55 = vrot.slane %v5032_v49, %v5002_v36  ;;  %v242_v56 = vrot.slane %v5032_v49, %v5008_v38 }
  0x63   :  { %564 = vmatpush1.bf16.msra.mxu1 %v4909_v16  ;;  %951 = vmatpush1.bf16.msra.mxu0 %v4909_v16  ;;  %v5041_v54 = vld [vmem:[%s132_s10] ss:$8 sm:$0xf]  ;;  %v334_v57 = vsel %vm332_vm2, %v329_v52, %v225_v50  ;;  %v333_v58 = vsel %vm332_vm2, %v328_v53, %v221_v51  ;;  %s142_s12 = scalar_lea.vmem [#allocation6], %s141_s6  ;;  %s152_s13 = scalar_lea.vmem [#allocation6], %s151_s11 }
  0x64   :  { %590 = vmatprep.subr.bf16.mxu1 %v4911_v17  ;;  %1323 = vmatprep.subr.bf16.mxu0 %v4851_v0  ;;  %v5049_v59 = vld [vmem:[%s142_s12] ss:$8 sm:$0xf]  ;;  %v267_v60 = vrot.slane %v5041_v54, %v5002_v36  ;;  %v263_v61 = vrot.slane %v5041_v54, %v5008_v38  ;;  %v339_v62 = vsel %vm337_vm3, %v334_v57, %v246_v55  ;;  %v5068_v55 = vsub.s32 2, %v4993_v34  ;;  %s4108_s14 = sld [smem:[#allocation2 + $0x1]] }
  0x65   :  { %v338_v63 = vsel %vm337_vm3, %v333_v58, %v242_v56  ;;  %v153_v33 = vld [vmem:[%s152_s13] ss:$8 sm:$0xf]  ;;  %v288_v40 = vrot.slane %v5049_v59, %v5002_v36  ;;  %v284_v41 = vrot.slane %v5049_v59, %v5008_v38  ;;  %v5072_v57 = vsub.s32 3, %v4993_v34  ;;  %s4111_s15 = sld [smem:[#allocation2 + $0x81]] }
  0x66   :  { %582 = vmatmul.mubr.bf16.vlgmr.msra.gmra.mrb[0].mxu1 %v6267_v2  ;;  %v344_v42 = vsel %vm342_vm4, %v339_v62, %v267_v60  ;;  %v343_v43 = vsel %vm342_vm4, %v338_v63, %v263_v61  ;;  %v309_v46 = vrot.slane %v153_v33, %v5002_v36  ;;  %v305_v48 = vrot.slane %v153_v33, %v5008_v38  ;;  %s4114_s1 = sld [smem:[#allocation2 + $0x101]] }
  0x67   :  { %591 = vmatpush1.bf16.msra.mxu1 %v4918_v18  ;;  %622 = vmatprep.mubr.bf16.mxu1 %v6267_v2  ;;  %v349_v50 = vsel %vm347_vm5, %v344_v42, %v288_v40  ;;  %v348_v52 = vsel %vm347_vm5, %v343_v43, %v284_v41  ;;  %v166_v61 = vrot.slane %v4999_v35, %v5068_v55  ;;  %s4117_s2 = sld [smem:[#allocation2 + $0x181]] }
  0x68   :  { %592 = vmatprep.subr.bf16.mxu1 %v4922_v19  ;;  %v354_v56 = vsel %vm352_vm6, %v349_v50, %v309_v46  ;;  %v353_v58 = vsel %vm352_vm6, %v348_v52, %v305_v48  ;;  %v187_v62 = vrot.slane %v5004_v37, %v5068_v55  ;;  %v170_v40 = vrot.slane %v4999_v35, %v5072_v57  ;;  %s5160_s20 = sld [smem:[#allocation2 + $0x201]] }
  0x69   :  { %v191_v41 = vrot.slane %v5004_v37, %v5072_v57  ;;  %v208_v34 = vrot.slane %v5012_v39, %v5068_v55  ;;  %v212_v46 = vrot.slane %v5012_v39, %v5072_v57  ;;  %v233_v37 = vrot.slane %v5023_v44, %v5072_v57  ;;  %s5162_s22 = sld [smem:[#allocation2 + $0x281]] }
  0x6a   :  { %v325_v43 = vsel %vm322_vm0, %v166_v61, %v187_v62  ;;  %v254_v52 = vrot.slane %v5032_v49, %v5072_v57  ;;  %v292_v61 = vrot.slane %v5049_v59, %v5068_v55  ;;  %s660_s16 = sshra.s32 %s4108_s14, 3  ;;  %s663_s17 = sand.u32 7, %s4108_s14 }
  0x6b   :  { %593 = vmatpush1.bf16.msra.mxu1 %v4927_v20  ;;  %v326_v48 = vsel %vm322_vm0, %v170_v40, %v191_v41  ;;  %v330_v35 = vsel %vm327_vm1, %v325_v43, %v208_v34  ;;  %v313_v41 = vrot.slane %v153_v33, %v5068_v55  ;;  %s4321_s3 = sshll.u32 %s660_s16, 5  ;;  %s670_s18 = sshra.s32 %s4111_s15, 3 }
  0x6c   :  { %594 = vmatprep.subr.bf16.mxu1 %v4931_v21  ;;  %v331_v50 = vsel %vm327_vm1, %v326_v48, %v212_v46  ;;  %s680_s19 = sshra.s32 %s4114_s1, 3  ;;  %s666_s21 = sadd.s32 %s4321_s3, %s663_s17 }
  0x6d   :  { %s673_s23 = sand.u32 7, %s4111_s15  ;;  %s4322_s24 = sshll.u32 %s670_s18, 5 }
  0x6e   :  { %s683_s25 = sand.u32 7, %s4114_s1  ;;  %s4323_s0 = sshll.u32 %s680_s19, 5 }
  0x6f   :  { %595 = vmatpush1.bf16.msra.mxu1 %v4934_v22  ;;  %s690_s26 = sshra.s32 %s4117_s2, 3  ;;  %s676_s27 = sadd.s32 %s4322_s24, %s673_s23 }
  0x70   :  { %596 = vmatprep.subr.bf16.mxu1 %v4937_v23  ;;  %s5164_s30 = sld [smem:[#allocation2 + $0x301]]  ;;  %s686_s6 = sadd.s32 %s4323_s0, %s683_s25 }
  0x71   :  { %s693_s7 = sand.u32 7, %s4117_s2  ;;  %s4324_s8 = sshll.u32 %s690_s26, 5 }
  0x72   :  { %s700_s9 = sshra.s32 %s5160_s20, 3  ;;  %s710_s10 = sshra.s32 %s5162_s22, 3 }
  0x73   :  { %597 = vmatpush1.bf16.msra.mxu1 %v4940_v24  ;;  %s5168_s11 = sld [smem:[#allocation2 + $0x381]]  ;;  %s667_s12 = scalar_lea.vmem [#allocation6], %s666_s21 }
  0x74   :  { %598 = vmatprep.subr.bf16.mxu1 %v4943_v25  ;;  %s696_s13 = sadd.s32 %s4324_s8, %s693_s7  ;;  %s677_s14 = scalar_lea.vmem [#allocation6], %s676_s27 }
  0x75   :  { %s703_s15 = sand.u32 7, %s5160_s20  ;;  %s4325_s1 = sshll.u32 %s700_s9, 5 }
  0x76   :  { %s713_s16 = sand.u32 7, %s5162_s22  ;;  %s4326_s17 = sshll.u32 %s710_s10, 5 }
  0x77   :  { %599 = vmatpush1.bf16.msra.mxu1 %v4946_v26  ;;  %s720_s3 = sshra.s32 %s5164_s30, 3  ;;  %s687_s18 = scalar_lea.vmem [#allocation6], %s686_s6 }
  0x78   :  { %600 = vmatprep.subr.bf16.mxu1 %v4949_v27  ;;  %s706_s2 = sadd.s32 %s4325_s1, %s703_s15  ;;  %s716_s19 = sadd.s32 %s4326_s17, %s713_s16 }
  0x79   :  { %s723_s20 = sand.u32 7, %s5164_s30  ;;  %s4327_s21 = sshll.u32 %s720_s3, 5 }
  0x7a   :  { %s697_s22 = scalar_lea.vmem [#allocation6], %s696_s13  ;;  %s730_s23 = sshra.s32 %s5168_s11, 3 }
  0x7b   :  { %601 = vmatpush1.bf16.msra.mxu1 %v4952_v28  ;;  %s726_s24 = sadd.s32 %s4327_s21, %s723_s20  ;;  %s707_s25 = scalar_lea.vmem [#allocation6], %s706_s2 }
  0x7c   :  { %602 = vmatprep.subr.bf16.mxu1 %v4955_v29  ;;  %s733_s0 = sand.u32 7, %s5168_s11  ;;  %s4328_s26 = sshll.u32 %s730_s23, 5 }
  0x7d   :  { %s717_s27 = scalar_lea.vmem [#allocation6], %s716_s19  ;;  %s736_s30 = sadd.s32 %s4328_s26, %s733_s0 }
  0x7e   :  { %s727_s6 = scalar_lea.vmem [#allocation6], %s726_s24  ;;  %s737_s7 = scalar_lea.vmem [#allocation6], %s736_s30 }
  0x7f   :  { %603 = vmatpush1.bf16.msra.mxu1 %v4958_v30  ;;  %s4135_s8 = sld [smem:[#allocation2 + $0x2]] }
  0x80   :  { %604 = vmatprep.subr.bf16.mxu1 %v4961_v31  ;;  %s4138_s9 = sld [smem:[#allocation2 + $0x82]] }
  0x81   :  { %s4141_s10 = sld [smem:[#allocation2 + $0x102]] }
  0x82   :  { %s5286_s16 = sld [smem:[#allocation2 + $0x202]] }
  0x83   :  { %605 = vmatpush1.bf16.msra.mxu1 %v4964_v32  ;;  %s5288_s3 = sld [smem:[#allocation2 + $0x282]] }
  0x84   :  { %977 = vmatprep.subr.bf16.mxu1 %v4911_v17  ;;  %s5290_s23 = sld [smem:[#allocation2 + $0x302]] }
  0x85   :  { %s1047_s11 = sshra.s32 %s4135_s8, 3  ;;  %s1050_s13 = sand.u32 7, %s4135_s8 }
  0x86   :  { %623 = vmatmul.mubr.bf16.vlgmr.msra.gmra.mrb[4].mxu1 %v6267_v2  ;;  %s1057_s15 = sshra.s32 %s4138_s9, 3  ;;  %s5294_s30 = sld [smem:[#allocation2 + $0x382]] }
  0x87   :  { %978 = vmatpush1.bf16.msra.mxu1 %v4918_v18  ;;  %1009 = vmatprep.mubr.bf16.mxu1 %v6267_v2  ;;  %s1067_s1 = sshra.s32 %s4141_s10, 3  ;;  %s4330_s2 = sshll.u32 %s1057_s15, 5 }
  0x88   :  { %979 = vmatprep.subr.bf16.mxu1 %v4922_v19  ;;  %s1070_s19 = sand.u32 7, %s4141_s10  ;;  %s4331_s20 = sshll.u32 %s1067_s1, 5 }
  0x89   :  { %s1073_s24 = sadd.s32 %s4331_s20, %s1070_s19  ;;  %s1087_s26 = sshra.s32 %s5286_s16, 3 }
  0x8a   :  { %s4333_s10 = sshll.u32 %s1087_s26, 5  ;;  %s1074_s15 = scalar_lea.vmem [#allocation6], %s1073_s24 }
  0x8b   :  { %980 = vmatpush1.bf16.msra.mxu1 %v4927_v20  ;;  %s4165_s26 = sld [smem:[#allocation2 + $0x83]] }
  0x8c   :  { %981 = vmatprep.subr.bf16.mxu1 %v4931_v21  ;;  %s1120_s20 = sand.u32 7, %s5294_s30 }
  0x8f   :  { %982 = vmatpush1.bf16.msra.mxu1 %v4934_v22 }
  0x90   :  { %983 = vmatprep.subr.bf16.mxu1 %v4937_v23 }
  0x93   :  { %984 = vmatpush1.bf16.msra.mxu1 %v4940_v24 }
  0x94   :  { %985 = vmatprep.subr.bf16.mxu1 %v4943_v25 }
  0x97   :  { %986 = vmatpush1.bf16.msra.mxu1 %v4946_v26 }
  0x98   :  { %987 = vmatprep.subr.bf16.mxu1 %v4949_v27 }
  0x9b   :  { %988 = vmatpush1.bf16.msra.mxu1 %v4952_v28 }
  0x9c   :  { %989 = vmatprep.subr.bf16.mxu1 %v4955_v29 }
  0x9f   :  { %990 = vmatpush1.bf16.msra.mxu1 %v4958_v30 }
  0xa0   :  { %991 = vmatprep.subr.bf16.mxu1 %v4961_v31 }
  0xa3   :  { %992 = vmatpush1.bf16.msra.mxu1 %v4964_v32 }
  0xa4   :  { %1364 = vmatprep.subr.bf16.mxu1 %v4911_v17 }
 0x139   :  { %v583_v45 = vpop.f32.mrb[0].mxu1 }
 0x13a   :  { %v585_v47 = vpop.f32.mrb[1].mxu1  ;;  %v631_v63 = vadd.f32 %v583_v45, %v353_v58  ;;  %v229_v45 = vrot.slane %v5023_v44, %v5068_v55  ;;  %v275_v44 = vrot.slane %v5041_v54, %v5072_v57 }
 0x13b   :  { %v587_v51 = vpop.f32.mrb[2].mxu1  ;;  %v632_v60 = vadd.f32 %v585_v47, %v354_v56  ;;  %v271_v56 = vrot.slane %v5041_v54, %v5068_v55  ;;  %v317_v54 = vrot.slane %v153_v33, %v5072_v57 }
 0x13c   :  { %v588_v53 = vpop.f32.mrb[3].mxu1  ;;  %v4105_v47 = vmul.f32 -1.442695, %v631_v63  ;;  %v250_v51 = vrot.slane %v5032_v49, %v5068_v55  ;;  %v335_v39 = vsel %vm332_vm2, %v330_v35, %v229_v45  ;;  %v296_v49 = vrot.slane %v5049_v59, %v5072_v57 }
 0x13d   :  { %v4106_v42 = vmul.f32 -1.442695, %v632_v60  ;;  %v336_v53 = vsel %vm332_vm2, %v331_v50, %v233_v37 }
 0x13e   :  { %v340_v58 = vsel %vm337_vm3, %v335_v39, %v250_v51  ;;  %v341_v60 = vsel %vm337_vm3, %v336_v53, %v254_v52 }
 0x13f   :  { %4461 = vpow2.f32 %v4106_v42  ;;  %v345_v62 = vsel %vm342_vm4, %v340_v58, %v271_v56  ;;  %v346_v63 = vsel %vm342_vm4, %v341_v60, %v275_v44 }
 0x140   :  { %4463 = vpow2.f32 %v4105_v47  ;;  %v350_v42 = vsel %vm347_vm5, %v345_v62, %v292_v61  ;;  %v351_v43 = vsel %vm347_vm5, %v346_v63, %v296_v49 }
 0x141   :  { %v355_v48 = vsel %vm352_vm6, %v350_v42, %v313_v41  ;;  %v356_v45 = vsel %vm352_vm6, %v351_v43, %v317_v54  ;;  %v688_v42 = vld [vmem:[%s687_s18] ss:$8 sm:$0xf]  ;;  %s1060_s18 = sand.u32 7, %s4138_s9  ;;  %s1090_s9 = sand.u32 7, %s5286_s16 }
 0x142   :  { %s1110_s16 = sand.u32 7, %s5290_s23 }
 0x149   :  { %v4462_v40 = vpop.eup %4461 }
 0x14a   :  { %v4464_v34 = vpop.eup %4463  ;;  %v644_v46 = vadd.f32 1.0, %v4462_v40 }
 0x14b   :  { %v638_v47 = vadd.f32 1.0, %v4464_v34  ;;  %v678_v34 = vld [vmem:[%s677_s14] ss:$8 sm:$0xf]  ;;  %s4329_s14 = sshll.u32 %s1047_s11, 5  ;;  %s1100_s11 = sand.u32 7, %s5288_s3 }
 0x14c   :  { %4465 = vrcp.f32 %v644_v46  ;;  %v764_v43 = vrot.slane %v678_v34, %v5008_v38  ;;  %s1053_s17 = sadd.s32 %s4329_s14, %s1050_s13  ;;  %s1107_s14 = sshra.s32 %s5290_s23, 3 }
 0x14d   :  { %4467 = vrcp.f32 %v638_v47  ;;  %v768_v47 = vrot.slane %v678_v34, %v5002_v36 }
 0x156   :  { %v4466_v33 = vpop.eup %4465 }
 0x157   :  { %v4468_v53 = vpop.eup %4467  ;;  %v654_v58 = vmul.f32 0.0, %v4466_v33 }
 0x159   :  { %v624_v35 = vpop.f32.mrb[4].mxu1 }
 0x15a   :  { %v633_v59 = vadd.f32 %v624_v35, %v355_v48  ;;  %v626_v37 = vpop.f32.mrb[5].mxu1  ;;  %v698_v48 = vld [vmem:[%s697_s22] ss:$8 sm:$0xf]  ;;  %s1063_s22 = sadd.s32 %s4330_s2, %s1060_s18  ;;  %s1117_s18 = sshra.s32 %s5294_s30, 3 }
 0x15b   :  { %v634_v50 = vadd.f32 %v626_v37, %v356_v45  ;;  %v628_v51 = vpop.f32.mrb[6].mxu1  ;;  %v785_v45 = vrot.slane %v688_v42, %v5008_v38  ;;  %s1064_s8 = scalar_lea.vmem [#allocation6], %s1063_s22 }
 0x15c   :  { %4469 = vtanh.f32 %v633_v59  ;;  %v629_v39 = vpop.f32.mrb[7].mxu1  ;;  %v789_v59 = vrot.slane %v688_v42, %v5002_v36  ;;  %v806_v51 = vrot.slane %v698_v48, %v5008_v38 }
 0x15d   :  { %v4107_v52 = vmul.f32 -1.442695, %v634_v50  ;;  %v708_v50 = vld [vmem:[%s707_s25] ss:$8 sm:$0xf] }
 0x15f   :  { %4471 = vpow2.f32 %v4107_v52  ;;  %v810_v52 = vrot.slane %v698_v48, %v5002_v36 }
 0x166   :  { %v4470_v56 = vpop.eup %4469 }
 0x167   :  { %v655_v44 = vmul.f32 %v4470_v56, %v4468_v53  ;;  %v776_v53 = vrot.slane %v678_v34, %v5072_v57 }
 0x169   :  { %v4472_v60 = vpop.eup %4471  ;;  %v5119_v61 = vadd.f32 %v655_v44, %v654_v58  ;;  %v718_v58 = vld [vmem:[%s717_s27] ss:$8 sm:$0xf]  ;;  %v827_v44 = vrot.slane %v708_v50, %v5008_v38  ;;  %s1097_s27 = sshra.s32 %s5288_s3, 3 }
 0x16a   :  { %v651_v62 = vadd.f32 1.0, %v4472_v60  ;;  %s4334_s13 = sshll.u32 %s1097_s27, 5  ;;  %s4168_s27 = sld [smem:[#allocation2 + $0x103]] }
 0x16b   :  { %4473 = vtanh.f32 %v5119_v61  ;;  %s1103_s1 = sadd.s32 %s4334_s13, %s1100_s11  ;;  %s5472_s11 = sld [smem:[#allocation2 + $0x203]] }
 0x16c   :  { %4475 = vrcp.f32 %v651_v62  ;;  %v831_v62 = vrot.slane %v708_v50, %v5002_v36  ;;  %s1104_s22 = scalar_lea.vmem [#allocation6], %s1103_s1 }
 0x170   :  { %s1457_s1 = sand.u32 7, %s4168_s27 }
 0x175   :  { %v4474_v49 = vpop.eup %4473 }
 0x176   :  { %v4476_v63 = vpop.eup %4475 }
 0x177   :  { %v5122_v40 = vmul.f32 %v4476_v63, %v4474_v49  ;;  %v797_v49 = vrot.slane %v688_v42, %v5072_v57 }
 0x179   :  { %v935_v41 = vpack.c.bf16 %v5122_v40, %v5122_v40 }
 0x17b   :  { %969 = vmatmul.mubr.bf16.vlgmr.msra.gmra.mrb[0].mxu0 %v935_v41  ;;  %1010 = vmatmul.mubr.bf16.vlgmr.msra.gmra.mrb[8].mxu1 %v935_v41 }
 0x17c   :  { %1324 = vmatpush1.bf16.msra.mxu0 %v4853_v1  ;;  %1365 = vmatpush1.bf16.msra.mxu1 %v4918_v18 }
 0x17d   :  { %1325 = vmatprep.subr.bf16.mxu0 %v4858_v3  ;;  %1366 = vmatprep.subr.bf16.mxu1 %v4922_v19 }
 0x17e   :  { %1355 = vmatprep.mubr.bf16.mxu0 %v6267_v2  ;;  %1396 = vmatprep.mubr.bf16.mxu1 %v6267_v2 }
 0x180   :  { %1326 = vmatpush1.bf16.msra.mxu0 %v4862_v4  ;;  %1367 = vmatpush1.bf16.msra.mxu1 %v4927_v20 }
 0x181   :  { %1327 = vmatprep.subr.bf16.mxu0 %v4866_v5  ;;  %1368 = vmatprep.subr.bf16.mxu1 %v4931_v21 }
 0x184   :  { %1328 = vmatpush1.bf16.msra.mxu0 %v4870_v6  ;;  %1369 = vmatpush1.bf16.msra.mxu1 %v4934_v22 }
 0x185   :  { %1329 = vmatprep.subr.bf16.mxu0 %v4874_v7  ;;  %1370 = vmatprep.subr.bf16.mxu1 %v4937_v23 }
 0x188   :  { %1330 = vmatpush1.bf16.msra.mxu0 %v4878_v8  ;;  %1371 = vmatpush1.bf16.msra.mxu1 %v4940_v24 }
 0x189   :  { %1331 = vmatprep.subr.bf16.mxu0 %v4882_v9  ;;  %1372 = vmatprep.subr.bf16.mxu1 %v4943_v25 }
 0x18c   :  { %1332 = vmatpush1.bf16.msra.mxu0 %v4886_v10  ;;  %1373 = vmatpush1.bf16.msra.mxu1 %v4946_v26 }
 0x18d   :  { %1333 = vmatprep.subr.bf16.mxu0 %v4890_v11  ;;  %1374 = vmatprep.subr.bf16.mxu1 %v4949_v27 }
 0x190   :  { %1334 = vmatpush1.bf16.msra.mxu0 %v4894_v12  ;;  %1375 = vmatpush1.bf16.msra.mxu1 %v4952_v28 }
 0x191   :  { %1335 = vmatprep.subr.bf16.mxu0 %v4898_v13  ;;  %1376 = vmatprep.subr.bf16.mxu1 %v4955_v29 }
 0x194   :  { %1336 = vmatpush1.bf16.msra.mxu0 %v4902_v14  ;;  %1377 = vmatpush1.bf16.msra.mxu1 %v4958_v30 }
 0x195   :  { %1337 = vmatprep.subr.bf16.mxu0 %v4906_v15  ;;  %1378 = vmatprep.subr.bf16.mxu1 %v4961_v31 }
 0x198   :  { %1338 = vmatpush1.bf16.msra.mxu0 %v4909_v16  ;;  %1379 = vmatpush1.bf16.msra.mxu1 %v4964_v32 }
 0x199   :  { %1710 = vmatprep.subr.bf16.mxu0 %v4851_v0  ;;  %1751 = vmatprep.subr.bf16.mxu1 %v4911_v17  ;;  %v5170_v0 = vld [vmem:[%s667_s12] ss:$8 sm:$0xf]  ;;  %s4144_s12 = sld [smem:[#allocation2 + $0x182]] }
 0x19a   :  { %v743_v54 = vrot.slane %v5170_v0, %v5008_v38  ;;  %v747_v46 = vrot.slane %v5170_v0, %v5002_v36  ;;  %v755_v33 = vrot.slane %v5170_v0, %v5072_v57 }
 0x19c   :  { %v907_v35 = vsel %vm322_vm0, %v743_v54, %v764_v43  ;;  %v908_v37 = vsel %vm322_vm0, %v747_v46, %v768_v47  ;;  %v910_v41 = vsel %vm322_vm0, %v755_v33, %v776_v53  ;;  %v728_v54 = vld [vmem:[%s727_s6] ss:$8 sm:$0xf]  ;;  %v848_v43 = vrot.slane %v718_v58, %v5008_v38  ;;  %s1054_s6 = scalar_lea.vmem [#allocation6], %s1053_s17  ;;  %s4335_s17 = sshll.u32 %s1107_s14, 5 }
 0x19d   :  { %v911_v39 = vsel %vm327_vm1, %v907_v35, %v785_v45  ;;  %v912_v56 = vsel %vm327_vm1, %v908_v37, %v789_v59  ;;  %v751_v46 = vrot.slane %v5170_v0, %v5068_v55  ;;  %v772_v47 = vrot.slane %v678_v34, %v5068_v55  ;;  %s1113_s2 = sadd.s32 %s4335_s17, %s1110_s16  ;;  %s5474_s14 = sld [smem:[#allocation2 + $0x283]] }
 0x19e   :  { %v915_v60 = vsel %vm332_vm2, %v911_v39, %v806_v51  ;;  %v916_v63 = vsel %vm332_vm2, %v912_v56, %v810_v52  ;;  %v852_v35 = vrot.slane %v718_v58, %v5002_v36  ;;  %v818_v59 = vrot.slane %v698_v48, %v5072_v57  ;;  %v738_v39 = vld [vmem:[%s737_s7] ss:$8 sm:$0xf]  ;;  %s1114_s24 = scalar_lea.vmem [#allocation6], %s1113_s2 }
 0x19f   :  { %v919_v45 = vsel %vm337_vm3, %v915_v60, %v827_v44  ;;  %v920_v37 = vsel %vm337_vm3, %v916_v63, %v831_v62  ;;  %v914_v51 = vsel %vm327_vm1, %v910_v41, %v797_v49  ;;  %v869_v52 = vrot.slane %v728_v54, %v5008_v38  ;;  %s1077_s21 = sshra.s32 %s4144_s12, 3  ;;  %s1080_s25 = sand.u32 7, %s4144_s12 }
 0x1a0   :  { %v793_v33 = vrot.slane %v688_v42, %v5068_v55  ;;  %v923_v0 = vsel %vm342_vm4, %v919_v45, %v848_v43  ;;  %v909_v34 = vsel %vm322_vm0, %v751_v46, %v772_v47  ;;  %v873_v53 = vrot.slane %v728_v54, %v5002_v36  ;;  %s4332_s0 = sshll.u32 %s1077_s21, 5  ;;  %s1093_s12 = sadd.s32 %s4333_s10, %s1090_s9 }
 0x1a1   :  { %v839_v56 = vrot.slane %v708_v50, %v5072_v57  ;;  %v924_v44 = vsel %vm342_vm4, %v920_v37, %v852_v35  ;;  %v918_v60 = vsel %vm332_vm2, %v914_v51, %v818_v59  ;;  %v890_v62 = vrot.slane %v738_v39, %v5008_v38  ;;  %s1083_s7 = sadd.s32 %s4332_s0, %s1080_s25  ;;  %s1094_s19 = scalar_lea.vmem [#allocation6], %s1093_s12 }
 0x1a2   :  { %v814_v49 = vrot.slane %v698_v48, %v5068_v55  ;;  %v927_v63 = vsel %vm347_vm5, %v923_v0, %v869_v52  ;;  %v913_v42 = vsel %vm327_vm1, %v909_v34, %v793_v33  ;;  %v894_v41 = vrot.slane %v738_v39, %v5002_v36  ;;  %s1084_s3 = scalar_lea.vmem [#allocation6], %s1083_s7  ;;  %s4336_s21 = sshll.u32 %s1117_s18, 5 }
 0x1a3   :  { %v860_v43 = vrot.slane %v718_v58, %v5072_v57  ;;  %v928_v46 = vsel %vm347_vm5, %v924_v44, %v873_v53  ;;  %v922_v47 = vsel %vm337_vm3, %v918_v60, %v839_v56  ;;  %v835_v45 = vrot.slane %v708_v50, %v5068_v55  ;;  %s1123_s23 = sadd.s32 %s4336_s21, %s1120_s20  ;;  %s4162_s0 = sld [smem:[#allocation2 + $0x3]] }
 0x1a4   :  { %v931_v35 = vsel %vm352_vm6, %v927_v63, %v890_v62  ;;  %v917_v59 = vsel %vm332_vm2, %v913_v42, %v814_v49  ;;  %v881_v48 = vrot.slane %v728_v54, %v5072_v57  ;;  %v932_v37 = vsel %vm352_vm6, %v928_v46, %v894_v41  ;;  %s1124_s25 = scalar_lea.vmem [#allocation6], %s1123_s23  ;;  %s1444_s9 = sshra.s32 %s4165_s26, 3 }
 0x1a5   :  { %v926_v51 = vsel %vm342_vm4, %v922_v47, %v860_v43  ;;  %v856_v33 = vrot.slane %v718_v58, %v5068_v55  ;;  %v921_v53 = vsel %vm337_vm3, %v917_v59, %v835_v45  ;;  %v902_v50 = vrot.slane %v738_v39, %v5072_v57  ;;  %s1454_s10 = sshra.s32 %s4168_s27, 3  ;;  %s4338_s12 = sshll.u32 %s1444_s9, 5 }
 0x1a6   :  { %v930_v62 = vsel %vm347_vm5, %v926_v51, %v881_v48  ;;  %v877_v41 = vrot.slane %v728_v54, %v5068_v55  ;;  %s4339_s16 = sshll.u32 %s1454_s10, 5  ;;  %s5476_s18 = sld [smem:[#allocation2 + $0x303]] }
 0x1a7   :  { %v925_v58 = vsel %vm342_vm4, %v921_v53, %v856_v33  ;;  %v934_v45 = vsel %vm352_vm6, %v930_v62, %v902_v50  ;;  %s1460_s2 = sadd.s32 %s4339_s16, %s1457_s1  ;;  %s1474_s21 = sshra.s32 %s5472_s11, 3 }
 0x1a8   :  { %v929_v59 = vsel %vm347_vm5, %v925_v58, %v877_v41  ;;  %s5480_s23 = sld [smem:[#allocation2 + $0x383]]  ;;  %s4341_s27 = sshll.u32 %s1474_s21, 5 }
 0x1a9   :  { %s1434_s30 = sshra.s32 %s4162_s0, 3  ;;  %s1437_s7 = sand.u32 7, %s4162_s0 }
 0x1aa   :  { %s1461_s9 = scalar_lea.vmem [#allocation6], %s1460_s2  ;;  %s4192_s21 = sld [smem:[#allocation2 + $0x84]] }
 0x1ae   :  { %s1507_s16 = sand.u32 7, %s5480_s23 }
 0x24e   :  { %v970_v52 = vpop.f32.mrb[0].mxu0  ;;  %v1011_v0 = vpop.f32.mrb[8].mxu1 }
 0x24f   :  { %v1018_v34 = vadd.f32 %v970_v52, %v931_v35  ;;  %v972_v56 = vpop.f32.mrb[1].mxu0  ;;  %v1013_v44 = vpop.f32.mrb[9].mxu1  ;;  %v898_v35 = vrot.slane %v738_v39, %v5068_v55 }
 0x250   :  { %v1019_v60 = vadd.f32 %v972_v56, %v932_v37  ;;  %v974_v49 = vpop.f32.mrb[2].mxu0  ;;  %v1015_v63 = vpop.f32.mrb[10].mxu1  ;;  %v1021_v37 = vadd.f32 %v1013_v44, %v934_v45 }
 0x251   :  { %v4132_v42 = vmul.f32 -1.442695, %v1018_v34  ;;  %v975_v43 = vpop.f32.mrb[3].mxu0  ;;  %v1016_v46 = vpop.f32.mrb[11].mxu1  ;;  %v933_v48 = vsel %vm352_vm6, %v929_v59, %v898_v35 }
 0x252   :  { %v4133_v47 = vmul.f32 -1.442695, %v1019_v60  ;;  %v4134_v51 = vmul.f32 -1.442695, %v1021_v37  ;;  %v1020_v52 = vadd.f32 %v1011_v0, %v933_v48 }
 0x253   :  { %4477 = vpow2.f32 %v4132_v42  ;;  %v1125_v35 = vld [vmem:[%s1124_s25] ss:$8 sm:$0xf] }
 0x254   :  { %4479 = vpow2.f32 %v4133_v47 }
 0x255   :  { %4481 = vpow2.f32 %v4134_v51 }
 0x256   :  { %4483 = vtanh.f32 %v1020_v52 }
 0x25d   :  { %v4478_v34 = vpop.eup %4477 }
 0x25e   :  { %v4480_v54 = vpop.eup %4479  ;;  %v1025_v56 = vadd.f32 1.0, %v4478_v34 }
 0x25f   :  { %v1031_v33 = vadd.f32 1.0, %v4480_v54  ;;  %v4482_v53 = vpop.eup %4481 }
 0x260   :  { %4485 = vrcp.f32 %v1025_v56  ;;  %v4484_v50 = vpop.eup %4483  ;;  %v1038_v49 = vadd.f32 1.0, %v4482_v53 }
 0x261   :  { %4487 = vrcp.f32 %v1031_v33  ;;  %v1277_v33 = vrot.slane %v1125_v35, %v5008_v38 }
 0x262   :  { %4489 = vrcp.f32 %v1038_v49 }
 0x26a   :  { %v4486_v60 = vpop.eup %4485 }
 0x26b   :  { %v4488_v39 = vpop.eup %4487  ;;  %v1042_v62 = vmul.f32 %v4486_v60, %v4484_v50 }
 0x26c   :  { %v1041_v44 = vmul.f32 %v4488_v39, %v5119_v61  ;;  %v4490_v0 = vpop.eup %4489  ;;  %v1281_v39 = vrot.slane %v1125_v35, %v5002_v36 }
 0x26e   :  { %v5243_v63 = vadd.f32 %v1042_v62, %v1041_v44 }
 0x270   :  { %4491 = vtanh.f32 %v5243_v63 }
 0x27a   :  { %v4492_v42 = vpop.eup %4491 }
 0x27b   :  { %v5246_v41 = vmul.f32 %v4492_v42, %v4490_v0 }
 0x27d   :  { %6272 = vst [vmem:[#allocation15_spill] sm:$0xff] %v5246_v41  ;;  %v1322_v43 = vpack.c.bf16 %v5246_v41, %v5246_v41 }
 0x27f   :  { %1356 = vmatmul.mubr.bf16.vlgmr.msra.gmra.mrb[4].mxu0 %v1322_v43  ;;  %1397 = vmatmul.mubr.bf16.vlgmr.msra.gmra.mrb[12].mxu1 %v1322_v43 }
 0x280   :  { %1711 = vmatpush1.bf16.msra.mxu0 %v4853_v1  ;;  %1752 = vmatpush1.bf16.msra.mxu1 %v4918_v18  ;;  %v5282_v1 = vld [vmem:[#allocation7 + $0x4] ss:$16 sps:$4 sm:$0xff]  }
 0x281   :  { %1712 = vmatprep.subr.bf16.mxu0 %v4858_v3  ;;  %1753 = vmatprep.subr.bf16.mxu1 %v4922_v19  ;;  %v5296_v3 = vld [vmem:[%s1054_s6] ss:$8 sm:$0xf]  ;;  %s4171_s6 = sld [smem:[#allocation2 + $0x183]] }
 0x282   :  { %1742 = vmatprep.mubr.bf16.mxu0 %v6267_v2  ;;  %1783 = vmatprep.mubr.bf16.mxu1 %v6267_v2  ;;  %v1142_v19 = vrot.slane %v5296_v3, %v5072_v57 }
 0x284   :  { %1713 = vmatpush1.bf16.msra.mxu0 %v4862_v4  ;;  %1754 = vmatpush1.bf16.msra.mxu1 %v4927_v20  ;;  %v1065_v4 = vld [vmem:[%s1064_s8] ss:$8 sm:$0xf]  ;;  %s4337_s8 = sshll.u32 %s1434_s30, 5  ;;  %s1487_s30 = sand.u32 7, %s5474_s14 }
 0x285   :  { %1714 = vmatprep.subr.bf16.mxu0 %v4866_v5  ;;  %1755 = vmatprep.subr.bf16.mxu1 %v4931_v21  ;;  %v1075_v5 = vld [vmem:[%s1074_s15] ss:$8 sm:$0xf]  ;;  %v1163_v20 = vrot.slane %v1065_v4, %v5072_v57  ;;  %s1440_s13 = sadd.s32 %s4337_s8, %s1437_s7  ;;  %s1447_s15 = sand.u32 7, %s4165_s26 }
 0x286   :  { %v1180_v37 = vrot.slane %v1075_v5, %v5068_v55  ;;  %s1477_s26 = sand.u32 7, %s5472_s11  ;;  %s1494_s8 = sshra.s32 %s5476_s18, 3 }
 0x287   :  { %s1464_s17 = sshra.s32 %s4171_s6, 3  ;;  %s1497_s11 = sand.u32 7, %s5476_s18 }
 0x288   :  { %1715 = vmatpush1.bf16.msra.mxu0 %v4870_v6  ;;  %1756 = vmatpush1.bf16.msra.mxu1 %v4934_v22  ;;  %v1130_v6 = vrot.slane %v5296_v3, %v5008_v38  ;;  %v1105_v22 = vld [vmem:[%s1104_s22] ss:$8 sm:$0xf]  ;;  %s4340_s20 = sshll.u32 %s1464_s17, 5  ;;  %s1484_s22 = sshra.s32 %s5474_s14, 3 }
 0x289   :  { %1716 = vmatprep.subr.bf16.mxu0 %v4874_v7  ;;  %1757 = vmatprep.subr.bf16.mxu1 %v4937_v23  ;;  %v1151_v7 = vrot.slane %v1065_v4, %v5008_v38  ;;  %v1239_v46 = vrot.slane %v1105_v22, %v5002_v36  ;;  %v1247_v62 = vrot.slane %v1105_v22, %v5072_v57  ;;  %s4342_s7 = sshll.u32 %s1484_s22, 5  ;;  %s4195_s22 = sld [smem:[#allocation2 + $0x104]] }
 0x28a   :  { %s1490_s10 = sadd.s32 %s4342_s7, %s1487_s30  ;;  %s5596_s30 = sld [smem:[#allocation2 + $0x204]] }
 0x28c   :  { %1717 = vmatpush1.bf16.msra.mxu0 %v4878_v8  ;;  %1758 = vmatpush1.bf16.msra.mxu1 %v4940_v24  ;;  %v1134_v8 = vrot.slane %v5296_v3, %v5002_v36 }
 0x28d   :  { %1718 = vmatprep.subr.bf16.mxu0 %v4882_v9  ;;  %1759 = vmatprep.subr.bf16.mxu1 %v4943_v25  ;;  %v1155_v9 = vrot.slane %v1065_v4, %v5002_v36 }
 0x290   :  { %1719 = vmatpush1.bf16.msra.mxu0 %v4886_v10  ;;  %1760 = vmatpush1.bf16.msra.mxu1 %v4946_v26  ;;  %v1085_v10 = vld [vmem:[%s1084_s3] ss:$8 sm:$0xf]  ;;  %v1184_v26 = vrot.slane %v1075_v5, %v5072_v57  ;;  %s1450_s3 = sadd.s32 %s4338_s12, %s1447_s15  ;;  %s1504_s15 = sshra.s32 %s5480_s23, 3 }
 0x291   :  { %1720 = vmatprep.subr.bf16.mxu0 %v4890_v11  ;;  %1761 = vmatprep.subr.bf16.mxu1 %v4949_v27  ;;  %v1172_v11 = vrot.slane %v1075_v5, %v5008_v38  ;;  %v1197_v18 = vrot.slane %v1085_v10, %v5002_v36  ;;  %v1205_v58 = vrot.slane %v1085_v10, %v5072_v57  ;;  %s1451_s0 = scalar_lea.vmem [#allocation6], %s1450_s3  ;;  %s4344_s17 = sshll.u32 %s1504_s15, 5 }
 0x292   :  { %v1201_v53 = vrot.slane %v1085_v10, %v5068_v55  ;;  %s1491_s3 = scalar_lea.vmem [#allocation6], %s1490_s10  ;;  %s1510_s18 = sadd.s32 %s4344_s17, %s1507_s16 }
 0x293   :  { %s1844_s10 = sand.u32 7, %s4195_s22  ;;  %s5600_s15 = sld [smem:[#allocation2 + $0x304]] }
 0x294   :  { %1721 = vmatpush1.bf16.msra.mxu0 %v4894_v12  ;;  %1762 = vmatpush1.bf16.msra.mxu1 %v4952_v28  ;;  %v1294_v12 = vsel %vm322_vm0, %v1130_v6, %v1151_v7  ;;  %v1297_v28 = vsel %vm322_vm0, %v1142_v19, %v1163_v20  ;;  %v1243_v7 = vrot.slane %v1105_v22, %v5068_v55  ;;  %s1861_s17 = sshra.s32 %s5596_s30, 3 }
 0x295   :  { %1722 = vmatprep.subr.bf16.mxu0 %v4898_v13  ;;  %1763 = vmatprep.subr.bf16.mxu1 %v4955_v29  ;;  %v1176_v13 = vrot.slane %v1075_v5, %v5002_v36  ;;  %v1115_v29 = vld [vmem:[%s1114_s24] ss:$8 sm:$0xf]  ;;  %v1301_v45 = vsel %vm327_vm1, %v1297_v28, %v1184_v26  ;;  %s1441_s24 = scalar_lea.vmem [#allocation6], %s1440_s13  ;;  %s4343_s13 = sshll.u32 %s1494_s8, 5 }
 0x296   :  { %v1256_v59 = vrot.slane %v1115_v29, %v5008_v38  ;;  %v1260_v52 = vrot.slane %v1115_v29, %v5002_v36  ;;  %v1305_v56 = vsel %vm332_vm2, %v1301_v45, %v1205_v58  ;;  %v1264_v19 = vrot.slane %v1115_v29, %v5068_v55  ;;  %s1500_s12 = sadd.s32 %s4343_s13, %s1497_s11  ;;  %s5598_s8 = sld [smem:[#allocation2 + $0x284]] }
 0x297   :  { %s1501_s2 = scalar_lea.vmem [#allocation6], %s1500_s12 }
 0x298   :  { %1723 = vmatpush1.bf16.msra.mxu0 %v4902_v14  ;;  %1764 = vmatpush1.bf16.msra.mxu1 %v4958_v30  ;;  %v1295_v14 = vsel %vm322_vm0, %v1134_v8, %v1155_v9  ;;  %v1235_v30 = vrot.slane %v1105_v22, %v5008_v38 }
 0x299   :  { %1724 = vmatprep.subr.bf16.mxu0 %v4906_v15  ;;  %1765 = vmatprep.subr.bf16.mxu1 %v4961_v31  ;;  %v1095_v15 = vld [vmem:[%s1094_s19] ss:$8 sm:$0xf]  ;;  %v1299_v21 = vsel %vm327_vm1, %v1295_v14, %v1176_v13  ;;  %v1138_v31 = vrot.slane %v5296_v3, %v5068_v55  ;;  %v1268_v3 = vrot.slane %v1115_v29, %v5072_v57  ;;  %s1467_s19 = sand.u32 7, %s4171_s6  ;;  %s1480_s6 = sadd.s32 %s4341_s27, %s1477_s26 }
 0x29a   :  { %v1214_v23 = vrot.slane %v1095_v15, %v5008_v38  ;;  %v1218_v25 = vrot.slane %v1095_v15, %v5002_v36  ;;  %v1303_v27 = vsel %vm332_vm2, %v1299_v21, %v1197_v18  ;;  %v1226_v34 = vrot.slane %v1095_v15, %v5072_v57  ;;  %s1470_s25 = sadd.s32 %s4340_s20, %s1467_s19  ;;  %s1481_s1 = scalar_lea.vmem [#allocation6], %s1480_s6 }
 0x29b   :  { %v1222_v0 = vrot.slane %v1095_v15, %v5068_v55  ;;  %s1471_s14 = scalar_lea.vmem [#allocation6], %s1470_s25  ;;  %s1511_s19 = scalar_lea.vmem [#allocation6], %s1510_s18 }
 0x29c   :  { %1725 = vmatpush1.bf16.msra.mxu0 %v4909_v16  ;;  %1766 = vmatpush1.bf16.msra.mxu1 %v4964_v32  ;;  %v1193_v16 = vrot.slane %v1085_v10, %v5008_v38  ;;  %v1159_v32 = vrot.slane %v1065_v4, %v5068_v55  ;;  %v1307_v47 = vsel %vm337_vm3, %v1303_v27, %v1218_v25  ;;  %s4189_s20 = sld [smem:[#allocation2 + $0x4]]  ;;  %s1831_s26 = sshra.s32 %s4192_s21, 3 }
 0x29d   :  { %2097 = vmatprep.subr.bf16.mxu0 %v5282_v1  ;;  %2138 = vmatprep.subr.bf16.mxu1 %v4911_v17  ;;  %v1298_v17 = vsel %vm327_vm1, %v1294_v12, %v1172_v11  ;;  %v1311_v54 = vsel %vm342_vm4, %v1307_v47, %v1239_v46  ;;  %v1309_v44 = vsel %vm337_vm3, %v1305_v56, %v1226_v34  ;;  %s1841_s27 = sshra.s32 %s4195_s22, 3  ;;  %s4346_s6 = sshll.u32 %s1831_s26, 5 }
 0x29e   :  { %v1302_v24 = vsel %vm332_vm2, %v1298_v17, %v1193_v16  ;;  %v1296_v51 = vsel %vm322_vm0, %v1138_v31, %v1159_v32  ;;  %v1315_v49 = vsel %vm347_vm5, %v1311_v54, %v1260_v52  ;;  %v1313_v5 = vsel %vm342_vm4, %v1309_v44, %v1247_v62  ;;  %v5396_v62 = vld [vmem:[#allocation7 + $0x44] ss:$16 sps:$4 sm:$0xff]   ;;  %v5402_v44 = vld [vmem:[#allocation7 + $0x40] ss:$16 sps:$4 sm:$0xff]   ;;  %s4347_s11 = sshll.u32 %s1841_s27, 5  ;;  %s5604_s18 = sld [smem:[#allocation2 + $0x384]] }
 0x29f   :  { %v1306_v61 = vsel %vm337_vm3, %v1302_v24, %v1214_v23  ;;  %v1300_v60 = vsel %vm327_vm1, %v1296_v51, %v1180_v37  ;;  %v1319_v4 = vsel %vm352_vm6, %v1315_v49, %v1281_v39  ;;  %v1289_v12 = vrot.slane %v1125_v35, %v5072_v57  ;;  %v5393_v39 = vld [vmem:[#allocation7 + $0x28] ss:$16 sps:$4 sm:$0xff]   ;;  %v5399_v49 = vld [vmem:[#allocation7 + $0x4c] ss:$16 sps:$4 sm:$0xff]   ;;  %s1847_s12 = sadd.s32 %s4347_s11, %s1844_s10  ;;  %s4349_s22 = sshll.u32 %s1861_s17, 5 }
 0x2a0   :  { %v1310_v48 = vsel %vm342_vm4, %v1306_v61, %v1235_v30  ;;  %v1304_v43 = vsel %vm332_vm2, %v1300_v60, %v1201_v53  ;;  %v1317_v15 = vsel %vm347_vm5, %v1313_v5, %v1268_v3  ;;  %v1285_v25 = vrot.slane %v1125_v35, %v5068_v55  ;;  %v5379_v53 = vld [vmem:[#allocation7 + $0x8] ss:$16 sps:$4 sm:$0xff]   ;;  %v5390_v60 = vld [vmem:[#allocation7 + $0x20] ss:$16 sps:$4 sm:$0xff]   ;;  %v5420_v5 = vld [vmem:[#allocation7 + $0x84] ss:$16 sps:$4 sm:$0xff]  }
 0x2a1   :  { %v1314_v50 = vsel %vm347_vm5, %v1310_v48, %v1256_v59  ;;  %v1308_v10 = vsel %vm337_vm3, %v1304_v43, %v1222_v0  ;;  %v1321_v24 = vsel %vm352_vm6, %v1317_v15, %v1289_v12  ;;  %v5405_v0 = vld [vmem:[#allocation7 + $0x48] ss:$16 sps:$4 sm:$0xff]   ;;  %v5411_v43 = vld [vmem:[#allocation7 + $0x6c] ss:$16 sps:$4 sm:$0xff]   ;;  %v5414_v3 = vld [vmem:[#allocation7 + $0x60] ss:$16 sps:$4 sm:$0xff]  }
 0x2a2   :  { %v1318_v42 = vsel %vm352_vm6, %v1314_v50, %v1277_v33  ;;  %v1312_v22 = vsel %vm342_vm4, %v1308_v10, %v1243_v7  ;;  %v5376_v33 = vld [vmem:[#allocation7] ss:$16 sps:$4 sm:$0xff]   ;;  %v5385_v50 = vld [vmem:[#allocation7 + $0x2c] ss:$16 sps:$4 sm:$0xff]   ;;  %v5441_v12 = vld [vmem:[#allocation7 + $0xa8] ss:$16 sps:$4 sm:$0xff]  }
 0x2a3   :  { %v1316_v26 = vsel %vm347_vm5, %v1312_v22, %v1264_v19  ;;  %v5426_v7 = vld [vmem:[#allocation7 + $0x80] ss:$16 sps:$4 sm:$0xff]   ;;  %v5435_v10 = vld [vmem:[#allocation7 + $0xac] ss:$16 sps:$4 sm:$0xff]   ;;  %s1821_s23 = sshra.s32 %s4189_s20, 3  ;;  %s1824_s25 = sand.u32 7, %s4189_s20 }
 0x2a4   :  { %v1320_v28 = vsel %vm352_vm6, %v1316_v26, %v1285_v25  ;;  %v5450_v15 = vld [vmem:[#allocation7 + $0xc0] ss:$16 sps:$4 sm:$0xff]   ;;  %s1848_s26 = scalar_lea.vmem [#allocation6], %s1847_s12  ;;  %s1894_s11 = sand.u32 7, %s5604_s18 }
 0x2a5   :  { %v5462_v19 = vld [vmem:[#allocation7 + $0xe0] ss:$16 sps:$4 sm:$0xff]   ;;  %s4219_s17 = sld [smem:[#allocation2 + $0x85]] }
 0x2a6   :  { %v5482_v22 = vld [vmem:[%s1441_s24] ss:$8 sm:$0xf]  ;;  %s4198_s24 = sld [smem:[#allocation2 + $0x184]] }
 0x2a7   :  { %v1517_v25 = vrot.slane %v5482_v22, %v5008_v38 }
 0x2ac   :  { %s1851_s13 = sshra.s32 %s4198_s24, 3 }
 0x2ad   :  { %s4348_s16 = sshll.u32 %s1851_s13, 5 }
 0x352   :  { %v1357_v6 = vpop.f32.mrb[4].mxu0  ;;  %v1398_v8 = vpop.f32.mrb[12].mxu1 }
 0x353   :  { %v1405_v9 = vadd.f32 %v1357_v6, %v1318_v42  ;;  %v1359_v11 = vpop.f32.mrb[5].mxu0  ;;  %v1400_v13 = vpop.f32.mrb[13].mxu1  ;;  %v1407_v31 = vadd.f32 %v1398_v8, %v1320_v28  ;;  %v5408_v42 = vld [vmem:[#allocation7 + $0x64] ss:$16 sps:$4 sm:$0xff]   ;;  %v5423_v6 = vld [vmem:[#allocation7 + $0x8c] ss:$16 sps:$4 sm:$0xff]  }
 0x354   :  { %v1406_v14 = vadd.f32 %v1359_v11, %v1319_v4  ;;  %v1361_v16 = vpop.f32.mrb[6].mxu0  ;;  %v1402_v17 = vpop.f32.mrb[14].mxu1  ;;  %v1408_v27 = vadd.f32 %v1400_v13, %v1321_v24  ;;  %v5417_v4 = vld [vmem:[#allocation7 + $0x68] ss:$16 sps:$4 sm:$0xff]   ;;  %v5438_v11 = vld [vmem:[#allocation7 + $0xa0] ss:$16 sps:$4 sm:$0xff]  }
 0x355   :  { %v4159_v18 = vmul.f32 -1.442695, %v1405_v9  ;;  %v1362_v20 = vpop.f32.mrb[7].mxu0  ;;  %v1403_v21 = vpop.f32.mrb[15].mxu1  ;;  %v5429_v8 = vld [vmem:[#allocation7 + $0x88] ss:$16 sps:$4 sm:$0xff]  }
 0x356   :  { %v4160_v23 = vmul.f32 -1.442695, %v1406_v14  ;;  %v4161_v30 = vmul.f32 -1.442695, %v1408_v27  ;;  %v5432_v9 = vld [vmem:[#allocation7 + $0xa4] ss:$16 sps:$4 sm:$0xff]   ;;  %v1521_v27 = vrot.slane %v5482_v22, %v5002_v36 }
 0x357   :  { %4493 = vpow2.f32 %v4159_v18  ;;  %v5444_v13 = vld [vmem:[#allocation7 + $0xc4] ss:$16 sps:$4 sm:$0xff]   ;;  %v5447_v14 = vld [vmem:[#allocation7 + $0xcc] ss:$16 sps:$4 sm:$0xff]   ;;  %v5453_v16 = vld [vmem:[#allocation7 + $0xc8] ss:$16 sps:$4 sm:$0xff]  }
 0x358   :  { %4495 = vpow2.f32 %v4160_v23  ;;  %v5456_v17 = vld [vmem:[#allocation7 + $0xe4] ss:$16 sps:$4 sm:$0xff]   ;;  %v5459_v18 = vld [vmem:[#allocation7 + $0xec] ss:$16 sps:$4 sm:$0xff]   ;;  %v5465_v20 = vld [vmem:[#allocation7 + $0xe8] ss:$16 sps:$4 sm:$0xff]  }
 0x359   :  { %4497 = vpow2.f32 %v4161_v30  ;;  %v5469_v21 = vld [vmem:[#allocation7 + $0xc] ss:$16 sps:$4 sm:$0xff]   ;;  %v1452_v23 = vld [vmem:[%s1451_s0] ss:$8 sm:$0xf]  ;;  %s4345_s0 = sshll.u32 %s1821_s23, 5 }
 0x35a   :  { %4499 = vtanh.f32 %v1407_v31  ;;  %v1462_v24 = vld [vmem:[%s1461_s9] ss:$8 sm:$0xf]  ;;  %v1538_v26 = vrot.slane %v1452_v23, %v5008_v38  ;;  %v1542_v28 = vrot.slane %v1452_v23, %v5002_v36  ;;  %s1827_s7 = sadd.s32 %s4345_s0, %s1824_s25  ;;  %s1834_s9 = sand.u32 7, %s4192_s21 }
 0x35b   :  { %v1472_v30 = vld [vmem:[%s1471_s14] ss:$8 sm:$0xf]  ;;  %v1559_v31 = vrot.slane %v1462_v24, %v5008_v38  ;;  %s1837_s14 = sadd.s32 %s4346_s6, %s1834_s9  ;;  %s1864_s21 = sand.u32 7, %s5596_s30 }
 0x35c   :  { %s1838_s20 = scalar_lea.vmem [#allocation6], %s1837_s14  ;;  %s1874_s23 = sand.u32 7, %s5598_s8 }
 0x35d   :  { %s1881_s0 = sshra.s32 %s5600_s15, 3  ;;  %s1884_s30 = sand.u32 7, %s5600_s15 }
 0x35e   :  { %s1891_s9 = sshra.s32 %s5604_s18, 3 }
 0x35f   :  { %s4352_s13 = sshll.u32 %s1891_s9, 5  ;;  %s5723_s9 = sld [smem:[#allocation2 + $0x305]] }
 0x360   :  { %s1897_s15 = sadd.s32 %s4352_s13, %s1894_s11 }
 0x361   :  { %v4494_v32 = vpop.eup %4493 }
 0x362   :  { %v4496_v29 = vpop.eup %4495  ;;  %v1412_v61 = vadd.f32 1.0, %v4494_v32  ;;  %v1681_v32 = vsel %vm322_vm0, %v1517_v25, %v1538_v26  ;;  %v1571_v25 = vrot.slane %v1462_v24, %v5072_v57 }
 0x363   :  { %v1418_v46 = vadd.f32 1.0, %v4496_v29  ;;  %v4498_v58 = vpop.eup %4497  ;;  %v1563_v29 = vrot.slane %v1462_v24, %v5002_v36 }
 0x364   :  { %4501 = vrcp.f32 %v1412_v61  ;;  %v4500_v47 = vpop.eup %4499  ;;  %v1425_v37 = vadd.f32 1.0, %v4498_v58  ;;  %v1682_v61 = vsel %vm322_vm0, %v1521_v27, %v1542_v28  ;;  %v1580_v58 = vrot.slane %v1472_v30, %v5008_v38  ;;  %v1502_v28 = vld [vmem:[%s1501_s2] ss:$8 sm:$0xf]  ;;  %s1828_s2 = scalar_lea.vmem [#allocation6], %s1827_s7  ;;  %s4351_s7 = sshll.u32 %s1881_s0, 5 }
 0x365   :  { %4503 = vrcp.f32 %v1418_v46  ;;  %v1482_v46 = vld [vmem:[%s1481_s1] ss:$8 sm:$0xf]  ;;  %s1854_s1 = sand.u32 7, %s4198_s24  ;;  %s1867_s24 = sadd.s32 %s4349_s22, %s1864_s21 }
 0x366   :  { %4505 = vrcp.f32 %v1425_v37  ;;  %v1686_v37 = vsel %vm327_vm1, %v1682_v61, %v1563_v29  ;;  %v1546_v29 = vrot.slane %v1452_v23, %v5068_v55  ;;  %s1887_s6 = sadd.s32 %s4351_s7, %s1884_s30  ;;  %s1868_s10 = scalar_lea.vmem [#allocation6], %s1867_s24 }
 0x367   :  { %s1888_s12 = scalar_lea.vmem [#allocation6], %s1887_s6  ;;  %s2218_s21 = sshra.s32 %s4219_s17, 3 }
 0x368   :  { %s5721_s0 = sld [smem:[#allocation2 + $0x285]]  ;;  %s4354_s24 = sshll.u32 %s2218_s21, 5 }
 0x36e   :  { %v4502_v45 = vpop.eup %4501 }
 0x36f   :  { %v4504_v35 = vpop.eup %4503  ;;  %v1429_v59 = vmul.f32 %v4502_v45, %v4500_v47  ;;  %v1685_v47 = vsel %vm327_vm1, %v1681_v32, %v1559_v31  ;;  %v1584_v45 = vrot.slane %v1472_v30, %v5002_v36  ;;  %v1525_v32 = vrot.slane %v5482_v22, %v5068_v55 }
 0x370   :  { %v1428_v48 = vmul.f32 %v4504_v35, %v5243_v63  ;;  %v4506_v52 = vpop.eup %4505  ;;  %v5382_v63 = vld [vmem:[#allocation7 + $0x24] ss:$16 sps:$4 sm:$0xff]   ;;  %v1529_v35 = vrot.slane %v5482_v22, %v5072_v57 }
 0x371   :  { %v1690_v26 = vsel %vm332_vm2, %v1686_v37, %v1584_v45  ;;  %v1567_v37 = vrot.slane %v1462_v24, %v5068_v55 }
 0x372   :  { %v5369_v51 = vadd.f32 %v1429_v59, %v1428_v48  ;;  %v1550_v59 = vrot.slane %v1452_v23, %v5072_v57  ;;  %v1492_v48 = vld [vmem:[%s1491_s3] ss:$8 sm:$0xf]  ;;  %v1683_v23 = vsel %vm322_vm0, %v1525_v32, %v1546_v29  ;;  %s1871_s3 = sshra.s32 %s5598_s8, 3 }
 0x373   :  { %v1622_v31 = vrot.slane %v1492_v48, %v5008_v38  ;;  %v1687_v24 = vsel %vm327_vm1, %v1683_v23, %v1567_v37  ;;  %v1634_v32 = vrot.slane %v1492_v48, %v5072_v57  ;;  %s4350_s25 = sshll.u32 %s1871_s3, 5  ;;  %s4222_s3 = sld [smem:[#allocation2 + $0x105]] }
 0x374   :  { %4507 = vtanh.f32 %v5369_v51  ;;  %v1684_v27 = vsel %vm322_vm0, %v1529_v35, %v1550_v59  ;;  %v1512_v35 = vld [vmem:[%s1511_s19] ss:$8 sm:$0xf]  ;;  %v1643_v59 = vrot.slane %v1502_v28, %v5008_v38  ;;  %s1857_s19 = sadd.s32 %s4348_s16, %s1854_s1  ;;  %s1877_s27 = sadd.s32 %s4350_s25, %s1874_s23 }
 0x375   :  { %v1688_v45 = vsel %vm327_vm1, %v1684_v27, %v1571_v25  ;;  %v1664_v25 = vrot.slane %v1512_v35, %v5008_v38  ;;  %s1858_s8 = scalar_lea.vmem [#allocation6], %s1857_s19  ;;  %s1878_s14 = scalar_lea.vmem [#allocation6], %s1877_s27 }
 0x376   :  { %s1898_s1 = scalar_lea.vmem [#allocation6], %s1897_s15  ;;  %s4216_s16 = sld [smem:[#allocation2 + $0x5]] }
 0x377   :  { %s5719_s23 = sld [smem:[#allocation2 + $0x205]] }
 0x378   :  { %s5727_s15 = sld [smem:[#allocation2 + $0x385]] }
 0x379   :  { %s2228_s22 = sshra.s32 %s4222_s3, 3  ;;  %s2231_s27 = sand.u32 7, %s4222_s3 }
 0x37a   :  { %s4355_s30 = sshll.u32 %s2228_s22, 5 }
 0x37b   :  { %s2234_s6 = sadd.s32 %s4355_s30, %s2231_s27 }
 0x37c   :  { %s2208_s18 = sshra.s32 %s4216_s16, 3  ;;  %s2211_s19 = sand.u32 7, %s4216_s16 }
 0x37d   :  { %s2248_s13 = sshra.s32 %s5719_s23, 3  ;;  %s2235_s21 = scalar_lea.vmem [#allocation6], %s2234_s6 }
 0x37e   :  { %v4508_v34 = vpop.eup %4507  ;;  %s4357_s3 = sshll.u32 %s2248_s13, 5  ;;  %s2281_s30 = sand.u32 7, %s5727_s15 }
 0x37f   :  { %v5372_v54 = vmul.f32 %v4508_v34, %v4506_v52  ;;  %v1601_v52 = vrot.slane %v1482_v46, %v5008_v38  ;;  %v1689_v34 = vsel %vm332_vm2, %v1685_v47, %v1580_v58  ;;  %v1626_v58 = vrot.slane %v1492_v48, %v5002_v36  ;;  %s4246_s13 = sld [smem:[#allocation2 + $0x86]] }
 0x380   :  { %v1592_v47 = vrot.slane %v1472_v30, %v5072_v57 }
 0x381   :  { %6273 = vst [vmem:[#allocation16_spill] sm:$0xff] %v5372_v54  ;;  %v1709_v56 = vpack.c.bf16 %v5372_v54, %v5372_v54  ;;  %v1693_v61 = vsel %vm337_vm3, %v1689_v34, %v1601_v52  ;;  %v1647_v52 = vrot.slane %v1502_v28, %v5002_v36  ;;  %v1613_v34 = vrot.slane %v1482_v46, %v5072_v57 }
 0x382   :  { %v1697_v22 = vsel %vm342_vm4, %v1693_v61, %v1622_v31  ;;  %v1668_v31 = vrot.slane %v1512_v35, %v5002_v36 }
 0x383   :  { %1743 = vmatmul.mubr.bf16.vlgmr.msra.gmra.mrb[8].mxu0 %v1709_v56  ;;  %1784 = vmatmul.mubr.bf16.vlgmr.msra.gmra.mrb[16].mxu1 %v1709_v56  ;;  %v1605_v56 = vrot.slane %v1482_v46, %v5002_v36  ;;  %v1701_v27 = vsel %vm347_vm5, %v1697_v22, %v1643_v59  ;;  %v1630_v22 = vrot.slane %v1492_v48, %v5068_v55 }
 0x384   :  { %2098 = vmatpush1.bf16.msra.mxu0 %v5376_v33  ;;  %2139 = vmatpush1.bf16.msra.mxu1 %v5379_v53 }
 0x385   :  { %2099 = vmatprep.subr.bf16.mxu0 %v5382_v63  ;;  %2140 = vmatprep.subr.bf16.mxu1 %v5385_v50 }
 0x386   :  { %2129 = vmatprep.mubr.bf16.mxu0 %v6267_v2  ;;  %2170 = vmatprep.mubr.bf16.mxu1 %v6267_v2  ;;  %v1694_v2 = vsel %vm337_vm3, %v1690_v26, %v1605_v56  ;;  %v1692_v56 = vsel %vm332_vm2, %v1688_v45, %v1592_v47  ;;  %v1588_v26 = vrot.slane %v1472_v30, %v5068_v55 }
 0x387   :  { %v1698_v54 = vsel %vm342_vm4, %v1694_v2, %v1626_v58  ;;  %v1696_v61 = vsel %vm337_vm3, %v1692_v56, %v1613_v34  ;;  %v1609_v2 = vrot.slane %v1482_v46, %v5068_v55  ;;  %v1705_v58 = vsel %vm352_vm6, %v1701_v27, %v1664_v25 }
 0x388   :  { %2100 = vmatpush1.bf16.msra.mxu0 %v5390_v60  ;;  %2141 = vmatpush1.bf16.msra.mxu1 %v5393_v39  ;;  %v1702_v29 = vsel %vm347_vm5, %v1698_v54, %v1647_v52  ;;  %v1691_v47 = vsel %vm332_vm2, %v1687_v24, %v1588_v26  ;;  %v1655_v30 = vrot.slane %v1502_v28, %v5072_v57 }
 0x389   :  { %2101 = vmatprep.subr.bf16.mxu0 %v5396_v62  ;;  %2142 = vmatprep.subr.bf16.mxu1 %v5399_v49  ;;  %v1706_v45 = vsel %vm352_vm6, %v1702_v29, %v1668_v31  ;;  %v1700_v59 = vsel %vm342_vm4, %v1696_v61, %v1634_v32  ;;  %v1695_v54 = vsel %vm337_vm3, %v1691_v47, %v1609_v2 }
 0x38a   :  { %v1676_v46 = vrot.slane %v1512_v35, %v5072_v57  ;;  %v1704_v25 = vsel %vm347_vm5, %v1700_v59, %v1655_v30  ;;  %v1651_v31 = vrot.slane %v1502_v28, %v5068_v55  ;;  %v1699_v48 = vsel %vm342_vm4, %v1695_v54, %v1630_v22 }
 0x38c   :  { %2102 = vmatpush1.bf16.msra.mxu0 %v5402_v44  ;;  %2143 = vmatpush1.bf16.msra.mxu1 %v5405_v0  ;;  %v1708_v2 = vsel %vm352_vm6, %v1704_v25, %v1676_v46  ;;  %v1703_v47 = vsel %vm347_vm5, %v1699_v48, %v1651_v31  ;;  %v1849_v48 = vld [vmem:[%s1848_s26] ss:$8 sm:$0xf]  ;;  %s2221_s26 = sand.u32 7, %s4219_s17  ;;  %s2251_s17 = sand.u32 7, %s5719_s23 }
 0x38d   :  { %2103 = vmatprep.subr.bf16.mxu0 %v5408_v42  ;;  %2144 = vmatprep.subr.bf16.mxu1 %v5411_v43  ;;  %s2271_s23 = sand.u32 7, %s5723_s9 }
 0x390   :  { %2104 = vmatpush1.bf16.msra.mxu0 %v5414_v3  ;;  %2145 = vmatpush1.bf16.msra.mxu1 %v5417_v4 }
 0x391   :  { %2105 = vmatprep.subr.bf16.mxu0 %v5420_v5  ;;  %2146 = vmatprep.subr.bf16.mxu1 %v5423_v6 }
 0x394   :  { %2106 = vmatpush1.bf16.msra.mxu0 %v5426_v7  ;;  %2147 = vmatpush1.bf16.msra.mxu1 %v5429_v8 }
 0x395   :  { %2107 = vmatprep.subr.bf16.mxu0 %v5432_v9  ;;  %2148 = vmatprep.subr.bf16.mxu1 %v5435_v10 }
 0x398   :  { %2108 = vmatpush1.bf16.msra.mxu0 %v5438_v11  ;;  %2149 = vmatpush1.bf16.msra.mxu1 %v5441_v12 }
 0x399   :  { %2109 = vmatprep.subr.bf16.mxu0 %v5444_v13  ;;  %2150 = vmatprep.subr.bf16.mxu1 %v5447_v14 }
 0x39c   :  { %2110 = vmatpush1.bf16.msra.mxu0 %v5450_v15  ;;  %2151 = vmatpush1.bf16.msra.mxu1 %v5453_v16 }
 0x39d   :  { %2111 = vmatprep.subr.bf16.mxu0 %v5456_v17  ;;  %2152 = vmatprep.subr.bf16.mxu1 %v5459_v18 }
 0x3a0   :  { %2112 = vmatpush1.bf16.msra.mxu0 %v5462_v19  ;;  %2153 = vmatpush1.bf16.msra.mxu1 %v5465_v20 }
 0x3a1   :  { %2484 = vmatprep.subr.bf16.mxu0 %v5282_v1  ;;  %2525 = vmatprep.subr.bf16.mxu1 %v5469_v21 }
 0x456   :  { %v1744_v37 = vpop.f32.mrb[8].mxu0  ;;  %v1785_v23 = vpop.f32.mrb[16].mxu1 }
 0x457   :  { %v1792_v41 = vadd.f32 %v1744_v37, %v1705_v58  ;;  %v1746_v52 = vpop.f32.mrb[9].mxu0  ;;  %v1787_v34 = vpop.f32.mrb[17].mxu1  ;;  %v1672_v58 = vrot.slane %v1512_v35, %v5068_v55 }
 0x458   :  { %v1793_v56 = vadd.f32 %v1746_v52, %v1706_v45  ;;  %v1748_v26 = vpop.f32.mrb[10].mxu0  ;;  %v1789_v27 = vpop.f32.mrb[18].mxu1  ;;  %v1795_v45 = vadd.f32 %v1787_v34, %v1708_v2 }
 0x459   :  { %v4186_v24 = vmul.f32 -1.442695, %v1792_v41  ;;  %v1749_v32 = vpop.f32.mrb[11].mxu0  ;;  %v1790_v29 = vpop.f32.mrb[19].mxu1  ;;  %v1707_v30 = vsel %vm352_vm6, %v1703_v47, %v1672_v58 }
 0x45a   :  { %v4187_v61 = vmul.f32 -1.442695, %v1793_v56  ;;  %v4188_v59 = vmul.f32 -1.442695, %v1795_v45  ;;  %v1794_v41 = vadd.f32 %v1785_v23, %v1707_v30  ;;  %v1946_v30 = vrot.slane %v1849_v48, %v5008_v38 }
 0x45b   :  { %4509 = vpow2.f32 %v4186_v24  ;;  %v1839_v29 = vld [vmem:[%s1838_s20] ss:$8 sm:$0xf]  ;;  %s4353_s20 = sshll.u32 %s2208_s18, 5  ;;  %s2261_s18 = sand.u32 7, %s5721_s0 }
 0x45c   :  { %4511 = vpow2.f32 %v4187_v61  ;;  %v1925_v2 = vrot.slane %v1839_v29, %v5008_v38  ;;  %v1929_v47 = vrot.slane %v1839_v29, %v5002_v36  ;;  %v1859_v45 = vld [vmem:[%s1858_s8] ss:$8 sm:$0xf]  ;;  %s2214_s25 = sadd.s32 %s4353_s20, %s2211_s19  ;;  %s2224_s8 = sadd.s32 %s4354_s24, %s2221_s26 }
 0x45d   :  { %4513 = vpow2.f32 %v4188_v59  ;;  %s2225_s16 = scalar_lea.vmem [#allocation6], %s2224_s8  ;;  %s2268_s20 = sshra.s32 %s5723_s9, 3 }
 0x45e   :  { %4515 = vtanh.f32 %v1794_v41  ;;  %v1950_v41 = vrot.slane %v1849_v48, %v5002_v36  ;;  %s2278_s26 = sshra.s32 %s5727_s15, 3 }
 0x465   :  { %v4510_v37 = vpop.eup %4509 }
 0x466   :  { %v4512_v28 = vpop.eup %4511  ;;  %v1799_v52 = vadd.f32 1.0, %v4510_v37 }
 0x467   :  { %v1805_v22 = vadd.f32 1.0, %v4512_v28  ;;  %v4514_v54 = vpop.eup %4513  ;;  %v1869_v28 = vld [vmem:[%s1868_s10] ss:$8 sm:$0xf] }
 0x468   :  { %4517 = vrcp.f32 %v1799_v52  ;;  %v4516_v46 = vpop.eup %4515  ;;  %v1812_v26 = vadd.f32 1.0, %v4514_v54  ;;  %v1967_v52 = vrot.slane %v1859_v45, %v5008_v38  ;;  %v1971_v54 = vrot.slane %v1859_v45, %v5002_v36 }
 0x469   :  { %4519 = vrcp.f32 %v1805_v22 }
 0x46a   :  { %4521 = vrcp.f32 %v1812_v26  ;;  %v1988_v26 = vrot.slane %v1869_v28, %v5008_v38 }
 0x472   :  { %v4518_v56 = vpop.eup %4517 }
 0x473   :  { %v4520_v35 = vpop.eup %4519  ;;  %v1816_v25 = vmul.f32 %v4518_v56, %v4516_v46  ;;  %v1937_v56 = vrot.slane %v1839_v29, %v5072_v57 }
 0x474   :  { %v1815_v34 = vmul.f32 %v4520_v35, %v5369_v51  ;;  %v4522_v23 = vpop.eup %4521  ;;  %v6275_v51 = vmov 0  }
 0x476   :  { %v5555_v27 = vadd.f32 %v1816_v25, %v1815_v34  ;;  %v1879_v25 = vld [vmem:[%s1878_s14] ss:$8 sm:$0xf]  ;;  %s2258_s14 = sshra.s32 %s5721_s0, 3 }
 0x477   :  { %s4358_s19 = sshll.u32 %s2258_s14, 5  ;;  %s4249_s14 = sld [smem:[#allocation2 + $0x106]] }
 0x478   :  { %4523 = vtanh.f32 %v5555_v27  ;;  %s2264_s22 = sadd.s32 %s4358_s19, %s2261_s18  ;;  %s5811_s18 = sld [smem:[#allocation2 + $0x206]] }
 0x479   :  { %s2265_s8 = scalar_lea.vmem [#allocation6], %s2264_s22 }
 0x47d   :  { %s2618_s22 = sand.u32 7, %s4249_s14 }
 0x482   :  { %v4524_v24 = vpop.eup %4523 }
 0x483   :  { %v5558_v31 = vmul.f32 %v4524_v24, %v4522_v23  ;;  %v1992_v23 = vrot.slane %v1869_v28, %v5002_v36  ;;  %v1958_v24 = vrot.slane %v1849_v48, %v5072_v57 }
 0x485   :  { %6274 = vst [vmem:[#allocation17_spill] sm:$0xff] %v5558_v31  ;;  %v2096_v32 = vpack.c.bf16 %v5558_v31, %v5558_v31 }
 0x487   :  { %2130 = vmatmul.mubr.bf16.vlgmr.msra.gmra.mrb[12].mxu0 %v2096_v32  ;;  %2171 = vmatmul.mubr.bf16.vlgmr.msra.gmra.mrb[20].mxu1 %v2096_v32 }
 0x488   :  { %2485 = vmatpush1.bf16.msra.mxu0 %v5376_v33  ;;  %2526 = vmatpush1.bf16.msra.mxu1 %v5379_v53 }
 0x489   :  { %2486 = vmatprep.subr.bf16.mxu0 %v5382_v63  ;;  %2527 = vmatprep.subr.bf16.mxu1 %v5385_v50 }
 0x48a   :  { %2516 = vmatprep.mubr.bf16.mxu0 %v6275_v51  ;;  %2557 = vmatprep.mubr.bf16.mxu1 %v6275_v51 }
 0x48c   :  { %2487 = vmatpush1.bf16.msra.mxu0 %v5390_v60  ;;  %2528 = vmatpush1.bf16.msra.mxu1 %v5393_v39 }
 0x48d   :  { %2488 = vmatprep.subr.bf16.mxu0 %v5396_v62  ;;  %2529 = vmatprep.subr.bf16.mxu1 %v5399_v49 }
 0x490   :  { %2489 = vmatpush1.bf16.msra.mxu0 %v5402_v44  ;;  %2530 = vmatpush1.bf16.msra.mxu1 %v5405_v0 }
 0x491   :  { %2490 = vmatprep.subr.bf16.mxu0 %v5408_v42  ;;  %2531 = vmatprep.subr.bf16.mxu1 %v5411_v43 }
 0x494   :  { %2491 = vmatpush1.bf16.msra.mxu0 %v5414_v3  ;;  %2532 = vmatpush1.bf16.msra.mxu1 %v5417_v4 }
 0x495   :  { %2492 = vmatprep.subr.bf16.mxu0 %v5420_v5  ;;  %2533 = vmatprep.subr.bf16.mxu1 %v5423_v6 }
 0x498   :  { %2493 = vmatpush1.bf16.msra.mxu0 %v5426_v7  ;;  %2534 = vmatpush1.bf16.msra.mxu1 %v5429_v8 }
 0x499   :  { %2494 = vmatprep.subr.bf16.mxu0 %v5432_v9  ;;  %2535 = vmatprep.subr.bf16.mxu1 %v5435_v10 }
 0x49c   :  { %2495 = vmatpush1.bf16.msra.mxu0 %v5438_v11  ;;  %2536 = vmatpush1.bf16.msra.mxu1 %v5441_v12 }
 0x49d   :  { %2496 = vmatprep.subr.bf16.mxu0 %v5444_v13  ;;  %2537 = vmatprep.subr.bf16.mxu1 %v5447_v14 }
 0x4a0   :  { %2497 = vmatpush1.bf16.msra.mxu0 %v5450_v15  ;;  %2538 = vmatpush1.bf16.msra.mxu1 %v5453_v16 }
 0x4a1   :  { %2498 = vmatprep.subr.bf16.mxu0 %v5456_v17  ;;  %2539 = vmatprep.subr.bf16.mxu1 %v5459_v18 }
 0x4a4   :  { %2499 = vmatpush1.bf16.msra.mxu0 %v5462_v19  ;;  %2540 = vmatpush1.bf16.msra.mxu1 %v5465_v20 }
 0x4a5   :  { %2871 = vmatprep.subr.bf16.mxu0 %v5282_v1  ;;  %2912 = vmatprep.subr.bf16.mxu1 %v5469_v21  ;;  %v5606_v1 = vld [vmem:[%s1828_s2] ss:$8 sm:$0xf]  ;;  %s4225_s2 = sld [smem:[#allocation2 + $0x185]] }
 0x4a6   :  { %v1904_v61 = vrot.slane %v5606_v1, %v5008_v38  ;;  %v1908_v58 = vrot.slane %v5606_v1, %v5002_v36  ;;  %v1916_v46 = vrot.slane %v5606_v1, %v5072_v57 }
 0x4a8   :  { %v2068_v59 = vsel %vm322_vm0, %v1904_v61, %v1925_v2  ;;  %v2069_v37 = vsel %vm322_vm0, %v1908_v58, %v1929_v47  ;;  %v2071_v61 = vsel %vm322_vm0, %v1916_v46, %v1937_v56  ;;  %v1889_v2 = vld [vmem:[%s1888_s12] ss:$8 sm:$0xf]  ;;  %v2009_v58 = vrot.slane %v1879_v25, %v5008_v38  ;;  %s2215_s12 = scalar_lea.vmem [#allocation6], %s2214_s25  ;;  %s4359_s25 = sshll.u32 %s2268_s20, 5 }
 0x4a9   :  { %v2072_v22 = vsel %vm327_vm1, %v2068_v59, %v1946_v30  ;;  %v2073_v35 = vsel %vm327_vm1, %v2069_v37, %v1950_v41  ;;  %v1912_v47 = vrot.slane %v5606_v1, %v5068_v55  ;;  %v1933_v30 = vrot.slane %v1839_v29, %v5068_v55  ;;  %s2274_s24 = sadd.s32 %s4359_s25, %s2271_s23  ;;  %s5813_s20 = sld [smem:[#allocation2 + $0x286]] }
 0x4aa   :  { %v2076_v34 = vsel %vm332_vm2, %v2072_v22, %v1967_v52  ;;  %v2077_v32 = vsel %vm332_vm2, %v2073_v35, %v1971_v54  ;;  %v2013_v41 = vrot.slane %v1879_v25, %v5002_v36  ;;  %v1979_v37 = vrot.slane %v1859_v45, %v5072_v57  ;;  %v1899_v54 = vld [vmem:[%s1898_s1] ss:$8 sm:$0xf]  ;;  %s2275_s6 = scalar_lea.vmem [#allocation6], %s2274_s24 }
 0x4ab   :  { %v2080_v59 = vsel %vm337_vm3, %v2076_v34, %v1988_v26  ;;  %v2081_v52 = vsel %vm337_vm3, %v2077_v32, %v1992_v23  ;;  %v2075_v22 = vsel %vm327_vm1, %v2071_v61, %v1958_v24  ;;  %v2030_v46 = vrot.slane %v1889_v2, %v5008_v38  ;;  %s2238_s7 = sshra.s32 %s4225_s2, 3  ;;  %s2241_s10 = sand.u32 7, %s4225_s2 }
 0x4ac   :  { %v1954_v56 = vrot.slane %v1849_v48, %v5068_v55  ;;  %v2084_v1 = vsel %vm342_vm4, %v2080_v59, %v2009_v58  ;;  %v2070_v29 = vsel %vm322_vm0, %v1912_v47, %v1933_v30  ;;  %v2034_v35 = vrot.slane %v1889_v2, %v5002_v36  ;;  %s4356_s11 = sshll.u32 %s2238_s7, 5  ;;  %s2254_s2 = sadd.s32 %s4357_s3, %s2251_s17 }
 0x4ad   :  { %v2000_v26 = vrot.slane %v1869_v28, %v5072_v57  ;;  %v2085_v34 = vsel %vm342_vm4, %v2081_v52, %v2013_v41  ;;  %v2079_v23 = vsel %vm332_vm2, %v2075_v22, %v1979_v37  ;;  %v2051_v24 = vrot.slane %v1899_v54, %v5008_v38  ;;  %s2244_s1 = sadd.s32 %s4356_s11, %s2241_s10  ;;  %s2255_s27 = scalar_lea.vmem [#allocation6], %s2254_s2 }
 0x4ae   :  { %v1975_v32 = vrot.slane %v1859_v45, %v5068_v55  ;;  %v2088_v61 = vsel %vm347_vm5, %v2084_v1, %v2030_v46  ;;  %v2074_v48 = vsel %vm327_vm1, %v2070_v29, %v1954_v56  ;;  %v2055_v58 = vrot.slane %v1899_v54, %v5002_v36  ;;  %s2245_s0 = scalar_lea.vmem [#allocation6], %s2244_s1  ;;  %s4360_s7 = sshll.u32 %s2278_s26, 5 }
 0x4af   :  { %v2021_v47 = vrot.slane %v1879_v25, %v5072_v57  ;;  %v2089_v30 = vsel %vm347_vm5, %v2085_v34, %v2034_v35  ;;  %v2083_v59 = vsel %vm337_vm3, %v2079_v23, %v2000_v26  ;;  %v1996_v41 = vrot.slane %v1869_v28, %v5068_v55  ;;  %s2284_s9 = sadd.s32 %s4360_s7, %s2281_s30  ;;  %s4243_s11 = sld [smem:[#allocation2 + $0x6]] }
 0x4b0   :  { %v2092_v37 = vsel %vm352_vm6, %v2088_v61, %v2051_v24  ;;  %v2078_v52 = vsel %vm332_vm2, %v2074_v48, %v1975_v32  ;;  %v2042_v45 = vrot.slane %v1889_v2, %v5072_v57  ;;  %v2093_v22 = vsel %vm352_vm6, %v2089_v30, %v2055_v58  ;;  %s2285_s10 = scalar_lea.vmem [#allocation6], %s2284_s9  ;;  %s2605_s17 = sshra.s32 %s4246_s13, 3 }
 0x4b1   :  { %v2087_v46 = vsel %vm342_vm4, %v2083_v59, %v2021_v47  ;;  %v2017_v1 = vrot.slane %v1879_v25, %v5068_v55  ;;  %v2082_v35 = vsel %vm337_vm3, %v2078_v52, %v1996_v41  ;;  %v2063_v28 = vrot.slane %v1899_v54, %v5072_v57  ;;  %s2615_s3 = sshra.s32 %s4249_s14, 3  ;;  %s4362_s2 = sshll.u32 %s2605_s17, 5 }
 0x4b2   :  { %v2091_v24 = vsel %vm347_vm5, %v2087_v46, %v2042_v45  ;;  %v2038_v58 = vrot.slane %v1889_v2, %v5068_v55  ;;  %s4363_s23 = sshll.u32 %s2615_s3, 5  ;;  %s5815_s26 = sld [smem:[#allocation2 + $0x306]] }
 0x4b3   :  { %v2086_v25 = vsel %vm342_vm4, %v2082_v35, %v2017_v1  ;;  %v2095_v41 = vsel %vm352_vm6, %v2091_v24, %v2063_v28  ;;  %s2621_s24 = sadd.s32 %s4363_s23, %s2618_s22  ;;  %s2635_s7 = sshra.s32 %s5811_s18, 3 }
 0x4b4   :  { %v2090_v52 = vsel %vm347_vm5, %v2086_v25, %v2038_v58  ;;  %s5819_s9 = sld [smem:[#allocation2 + $0x386]]  ;;  %s4365_s14 = sshll.u32 %s2635_s7, 5 }
 0x4b5   :  { %s2595_s15 = sshra.s32 %s4243_s11, 3  ;;  %s2598_s1 = sand.u32 7, %s4243_s11 }
 0x4b6   :  { %s2622_s17 = scalar_lea.vmem [#allocation6], %s2621_s24  ;;  %s4273_s7 = sld [smem:[#allocation2 + $0x87]] }
 0x4ba   :  { %s2668_s23 = sand.u32 7, %s5819_s9 }
 0x55a   :  { %v2131_v56 = vpop.f32.mrb[12].mxu0  ;;  %v2172_v29 = vpop.f32.mrb[20].mxu1 }
 0x55b   :  { %v2179_v31 = vadd.f32 %v2131_v56, %v2092_v37  ;;  %v2133_v26 = vpop.f32.mrb[13].mxu0  ;;  %v2174_v34 = vpop.f32.mrb[21].mxu1  ;;  %v2059_v37 = vrot.slane %v1899_v54, %v5068_v55 }
 0x55c   :  { %v2180_v23 = vadd.f32 %v2133_v26, %v2093_v22  ;;  %v2135_v32 = vpop.f32.mrb[14].mxu0  ;;  %v2176_v61 = vpop.f32.mrb[22].mxu1  ;;  %v2182_v22 = vadd.f32 %v2174_v34, %v2095_v41 }
 0x55d   :  { %v4213_v48 = vmul.f32 -1.442695, %v2179_v31  ;;  %v2136_v47 = vpop.f32.mrb[15].mxu0  ;;  %v2177_v30 = vpop.f32.mrb[23].mxu1  ;;  %v2094_v45 = vsel %vm352_vm6, %v2090_v52, %v2059_v37 }
 0x55e   :  { %v4214_v59 = vmul.f32 -1.442695, %v2180_v23  ;;  %v4215_v46 = vmul.f32 -1.442695, %v2182_v22  ;;  %v2181_v31 = vadd.f32 %v2172_v29, %v2094_v45 }
 0x55f   :  { %4525 = vpow2.f32 %v4213_v48  ;;  %v2286_v37 = vld [vmem:[%s2285_s10] ss:$8 sm:$0xf] }
 0x560   :  { %4527 = vpow2.f32 %v4214_v59 }
 0x561   :  { %4529 = vpow2.f32 %v4215_v46 }
 0x562   :  { %4531 = vtanh.f32 %v2181_v31 }
 0x569   :  { %v4526_v56 = vpop.eup %4525 }
 0x56a   :  { %v4528_v2 = vpop.eup %4527  ;;  %v2186_v26 = vadd.f32 1.0, %v4526_v56 }
 0x56b   :  { %v2192_v1 = vadd.f32 1.0, %v4528_v2  ;;  %v4530_v35 = vpop.eup %4529 }
 0x56c   :  { %4533 = vrcp.f32 %v2186_v26  ;;  %v4532_v28 = vpop.eup %4531  ;;  %v2199_v32 = vadd.f32 1.0, %v4530_v35 }
 0x56d   :  { %4535 = vrcp.f32 %v2192_v1  ;;  %v2438_v1 = vrot.slane %v2286_v37, %v5008_v38 }
 0x56e   :  { %4537 = vrcp.f32 %v2199_v32 }
 0x576   :  { %v4534_v23 = vpop.eup %4533 }
 0x577   :  { %v4536_v54 = vpop.eup %4535  ;;  %v2203_v24 = vmul.f32 %v4534_v23, %v4532_v28 }
 0x578   :  { %v2202_v34 = vmul.f32 %v4536_v54, %v5555_v27  ;;  %v4538_v29 = vpop.eup %4537  ;;  %v2442_v54 = vrot.slane %v2286_v37, %v5002_v36 }
 0x57a   :  { %v5679_v61 = vadd.f32 %v2203_v24, %v2202_v34 }
 0x57c   :  { %4539 = vtanh.f32 %v5679_v61 }
 0x586   :  { %v4540_v48 = vpop.eup %4539 }
 0x587   :  { %v5682_v58 = vmul.f32 %v4540_v48, %v4538_v29 }
 0x589   :  { %v2483_v47 = vpack.c.bf16 %v5682_v58, %v5682_v58 }
 0x58b   :  { %2517 = vmatmul.mubr.bf16.vlgmr.msra.gmra.mrb[16].mxu0 %v2483_v47  ;;  %2558 = vmatmul.mubr.bf16.vlgmr.msra.gmra.mrb[24].mxu1 %v2483_v47 }
 0x58c   :  { %2872 = vmatpush1.bf16.msra.mxu0 %v5376_v33  ;;  %2913 = vmatpush1.bf16.msra.mxu1 %v5379_v53  ;;  %v4621_v33 = vld [vmem:[#allocation7 + $0x4] ss:$16 sps:$4 sm:$0xff]   ;;  %v5729_v53 = vld [vmem:[%s2215_s12] ss:$8 sm:$0xf]  ;;  %s4252_s12 = sld [smem:[#allocation2 + $0x186]] }
 0x58d   :  { %2873 = vmatprep.subr.bf16.mxu0 %v5382_v63  ;;  %2914 = vmatprep.subr.bf16.mxu1 %v5385_v50  ;;  %v2226_v63 = vld [vmem:[%s2225_s16] ss:$8 sm:$0xf]  ;;  %s4361_s16 = sshll.u32 %s2595_s15, 5  ;;  %s2648_s15 = sand.u32 7, %s5813_s20 }
 0x58e   :  { %2903 = vmatprep.mubr.bf16.mxu0 %v6275_v51  ;;  %2944 = vmatprep.mubr.bf16.mxu1 %v6275_v51  ;;  %v2236_v50 = vld [vmem:[%s2235_s21] ss:$8 sm:$0xf]  ;;  %s2601_s19 = sadd.s32 %s4361_s16, %s2598_s1  ;;  %s2608_s21 = sand.u32 7, %s4246_s13 }
 0x58f   :  { %v2341_v22 = vrot.slane %v2236_v50, %v5068_v55  ;;  %s2638_s13 = sand.u32 7, %s5811_s18  ;;  %s2655_s16 = sshra.s32 %s5815_s26, 3 }
 0x590   :  { %2874 = vmatpush1.bf16.msra.mxu0 %v5390_v60  ;;  %2915 = vmatpush1.bf16.msra.mxu1 %v5393_v39  ;;  %v2291_v60 = vrot.slane %v5729_v53, %v5008_v38  ;;  %v2312_v39 = vrot.slane %v2226_v63, %v5008_v38  ;;  %s2658_s18 = sand.u32 7, %s5815_s26 }
 0x591   :  { %2875 = vmatprep.subr.bf16.mxu0 %v5396_v62  ;;  %2916 = vmatprep.subr.bf16.mxu1 %v5399_v49  ;;  %v2295_v62 = vrot.slane %v5729_v53, %v5002_v36  ;;  %v2316_v49 = vrot.slane %v2226_v63, %v5002_v36 }
 0x592   :  { %s2625_s25 = sshra.s32 %s4252_s12, 3 }
 0x593   :  { %s4364_s30 = sshll.u32 %s2625_s25, 5 }
 0x594   :  { %2876 = vmatpush1.bf16.msra.mxu0 %v5402_v44  ;;  %2917 = vmatpush1.bf16.msra.mxu1 %v5405_v0  ;;  %v2246_v44 = vld [vmem:[%s2245_s0] ss:$8 sm:$0xf]  ;;  %v2333_v0 = vrot.slane %v2236_v50, %v5008_v38  ;;  %s2611_s0 = sadd.s32 %s4362_s2, %s2608_s21  ;;  %s2665_s21 = sshra.s32 %s5819_s9, 3 }
 0x595   :  { %2877 = vmatprep.subr.bf16.mxu0 %v5408_v42  ;;  %2918 = vmatprep.subr.bf16.mxu1 %v5411_v43  ;;  %v2455_v42 = vsel %vm322_vm0, %v2291_v60, %v2312_v39  ;;  %v2337_v43 = vrot.slane %v2236_v50, %v5002_v36  ;;  %v2366_v25 = vrot.slane %v2246_v44, %v5072_v57  ;;  %s2612_s11 = scalar_lea.vmem [#allocation6], %s2611_s0  ;;  %s4368_s25 = sshll.u32 %s2665_s21, 5 }
 0x596   :  { %v2362_v35 = vrot.slane %v2246_v44, %v5068_v55  ;;  %s2671_s26 = sadd.s32 %s4368_s25, %s2668_s23  ;;  %s5915_s21 = sld [smem:[#allocation2 + $0x307]] }
 0x598   :  { %2878 = vmatpush1.bf16.msra.mxu0 %v5414_v3  ;;  %2919 = vmatpush1.bf16.msra.mxu1 %v5417_v4  ;;  %v2456_v3 = vsel %vm322_vm0, %v2295_v62, %v2316_v49  ;;  %v2256_v4 = vld [vmem:[%s2255_s27] ss:$8 sm:$0xf]  ;;  %s2628_s27 = sand.u32 7, %s4252_s12  ;;  %s2641_s12 = sadd.s32 %s4365_s14, %s2638_s13 }
 0x599   :  { %2879 = vmatprep.subr.bf16.mxu0 %v5420_v5  ;;  %2920 = vmatprep.subr.bf16.mxu1 %v5423_v6  ;;  %v2354_v5 = vrot.slane %v2246_v44, %v5008_v38  ;;  %v2459_v6 = vsel %vm327_vm1, %v2455_v42, %v2333_v0  ;;  %v2387_v56 = vrot.slane %v2256_v4, %v5072_v57  ;;  %s2631_s10 = sadd.s32 %s4364_s30, %s2628_s27  ;;  %s2642_s22 = scalar_lea.vmem [#allocation6], %s2641_s12 }
 0x59a   :  { %v2383_v29 = vrot.slane %v2256_v4, %v5068_v55  ;;  %v2450_v0 = vrot.slane %v2286_v37, %v5072_v57  ;;  %s2672_s27 = scalar_lea.vmem [#allocation6], %s2671_s26  ;;  %s4270_s30 = sld [smem:[#allocation2 + $0x7]] }
 0x59b   :  { %s2992_s13 = sshra.s32 %s4273_s7, 3  ;;  %s5919_s26 = sld [smem:[#allocation2 + $0x387]] }
 0x59c   :  { %2880 = vmatpush1.bf16.msra.mxu0 %v5426_v7  ;;  %2921 = vmatpush1.bf16.msra.mxu1 %v5429_v8  ;;  %v2358_v7 = vrot.slane %v2246_v44, %v5002_v36  ;;  %v2303_v8 = vrot.slane %v5729_v53, %v5072_v57  ;;  %s4370_s12 = sshll.u32 %s2992_s13, 5 }
 0x59d   :  { %2881 = vmatprep.subr.bf16.mxu0 %v5432_v9  ;;  %2922 = vmatprep.subr.bf16.mxu1 %v5435_v10  ;;  %v2324_v9 = vrot.slane %v2226_v63, %v5072_v57  ;;  %v2460_v10 = vsel %vm327_vm1, %v2456_v3, %v2337_v43 }
 0x5a0   :  { %2882 = vmatpush1.bf16.msra.mxu0 %v5438_v11  ;;  %2923 = vmatpush1.bf16.msra.mxu1 %v5441_v12  ;;  %v2266_v11 = vld [vmem:[%s2265_s8] ss:$8 sm:$0xf]  ;;  %v2375_v12 = vrot.slane %v2256_v4, %v5008_v38  ;;  %s2645_s8 = sshra.s32 %s5813_s20, 3  ;;  %s2632_s20 = scalar_lea.vmem [#allocation6], %s2631_s10 }
 0x5a1   :  { %2883 = vmatprep.subr.bf16.mxu0 %v5444_v13  ;;  %2924 = vmatprep.subr.bf16.mxu1 %v5447_v14  ;;  %v2463_v13 = vsel %vm332_vm2, %v2459_v6, %v2354_v5  ;;  %v2379_v14 = vrot.slane %v2256_v4, %v5002_v36  ;;  %v2400_v30 = vrot.slane %v2266_v11, %v5002_v36  ;;  %s4366_s1 = sshll.u32 %s2645_s8, 5  ;;  %s4276_s8 = sld [smem:[#allocation2 + $0x107]] }
 0x5a2   :  { %v2467_v27 = vsel %vm337_vm3, %v2463_v13, %v2375_v12  ;;  %v2408_v24 = vrot.slane %v2266_v11, %v5072_v57  ;;  %v2404_v60 = vrot.slane %v2266_v11, %v5068_v55  ;;  %v2446_v13 = vrot.slane %v2286_v37, %v5068_v55  ;;  %s2651_s3 = sadd.s32 %s4366_s1, %s2648_s15  ;;  %s2982_s9 = sshra.s32 %s4270_s30, 3 }
 0x5a3   :  { %s2652_s0 = scalar_lea.vmem [#allocation6], %s2651_s3  ;;  %s2985_s10 = sand.u32 7, %s4270_s30 }
 0x5a4   :  { %2884 = vmatpush1.bf16.msra.mxu0 %v5450_v15  ;;  %2925 = vmatpush1.bf16.msra.mxu1 %v5453_v16  ;;  %v2345_v15 = vrot.slane %v2236_v50, %v5072_v57  ;;  %v2464_v16 = vsel %vm332_vm2, %v2460_v10, %v2358_v7  ;;  %s5911_s15 = sld [smem:[#allocation2 + $0x207]] }
 0x5a5   :  { %2885 = vmatprep.subr.bf16.mxu0 %v5456_v17  ;;  %2926 = vmatprep.subr.bf16.mxu1 %v5459_v18  ;;  %v2458_v17 = vsel %vm322_vm0, %v2303_v8, %v2324_v9  ;;  %v2276_v18 = vld [vmem:[%s2275_s6] ss:$8 sm:$0xf]  ;;  %v2468_v59 = vsel %vm337_vm3, %v2464_v16, %v2379_v14  ;;  %s2602_s6 = scalar_lea.vmem [#allocation6], %s2601_s19  ;;  %s4367_s19 = sshll.u32 %s2655_s16, 5 }
 0x5a6   :  { %v2462_v41 = vsel %vm327_vm1, %v2458_v17, %v2345_v15  ;;  %v2417_v52 = vrot.slane %v2276_v18, %v5008_v38  ;;  %v2421_v31 = vrot.slane %v2276_v18, %v5002_v36  ;;  %v2472_v2 = vsel %vm342_vm4, %v2468_v59, %v2400_v30  ;;  %s2661_s2 = sadd.s32 %s4367_s19, %s2658_s18  ;;  %s5913_s16 = sld [smem:[#allocation2 + $0x287]] }
 0x5a7   :  { %v2466_v26 = vsel %vm332_vm2, %v2462_v41, %v2366_v25  ;;  %v2425_v7 = vrot.slane %v2276_v18, %v5068_v55  ;;  %s2662_s24 = scalar_lea.vmem [#allocation6], %s2661_s2  ;;  %s3002_s14 = sshra.s32 %s4276_s8, 3 }
 0x5a8   :  { %2886 = vmatpush1.bf16.msra.mxu0 %v5462_v19  ;;  %2927 = vmatpush1.bf16.msra.mxu1 %v5465_v20  ;;  %v2396_v19 = vrot.slane %v2266_v11, %v5008_v38  ;;  %v2299_v20 = vrot.slane %v5729_v53, %v5068_v55  ;;  %v2476_v32 = vsel %vm347_vm5, %v2472_v2, %v2421_v31  ;;  %s3005_s3 = sand.u32 7, %s4276_s8  ;;  %s4371_s18 = sshll.u32 %s3002_s14, 5 }
 0x5a9   :  { %3258 = vmatprep.subr.bf16.mxu0 %v4621_v33  ;;  %3299 = vmatprep.subr.bf16.mxu1 %v5469_v21  ;;  %v2320_v21 = vrot.slane %v2226_v63, %v5068_v55  ;;  %v2470_v34 = vsel %vm337_vm3, %v2466_v26, %v2387_v56  ;;  %v2429_v33 = vrot.slane %v2276_v18, %v5072_v57  ;;  %v4622_v26 = vld [vmem:[#allocation7] ss:$16 sps:$4 sm:$0xff]   ;;  %s3008_s2 = sadd.s32 %s4371_s18, %s3005_s3  ;;  %s3055_s18 = sand.u32 7, %s5919_s26 }
 0x5aa   :  { %v2471_v45 = vsel %vm342_vm4, %v2467_v27, %v2396_v19  ;;  %v2480_v53 = vsel %vm352_vm6, %v2476_v32, %v2442_v54  ;;  %v2474_v63 = vsel %vm342_vm4, %v2470_v34, %v2408_v24  ;;  %v4628_v54 = vld [vmem:[#allocation7 + $0x44] ss:$16 sps:$4 sm:$0xff]   ;;  %v4629_v24 = vld [vmem:[#allocation7 + $0x4c] ss:$16 sps:$4 sm:$0xff]   ;;  %v4630_v32 = vld [vmem:[#allocation7 + $0x40] ss:$16 sps:$4 sm:$0xff]  }
 0x5ab   :  { %v2457_v46 = vsel %vm322_vm0, %v2299_v20, %v2320_v21  ;;  %v2475_v28 = vsel %vm347_vm5, %v2471_v45, %v2417_v52  ;;  %v2478_v3 = vsel %vm347_vm5, %v2474_v63, %v2429_v33  ;;  %v4631_v34 = vld [vmem:[#allocation7 + $0x48] ss:$16 sps:$4 sm:$0xff]   ;;  %v4637_v63 = vld [vmem:[#allocation7 + $0x8c] ss:$16 sps:$4 sm:$0xff]   ;;  %s3022_s25 = sshra.s32 %s5911_s15, 3  ;;  %s3009_s13 = scalar_lea.vmem [#allocation6], %s3008_s2 }
 0x5ac   :  { %v2461_v23 = vsel %vm327_vm1, %v2457_v46, %v2341_v22  ;;  %v2479_v48 = vsel %vm352_vm6, %v2475_v28, %v2438_v1  ;;  %v2482_v12 = vsel %vm352_vm6, %v2478_v3, %v2450_v0  ;;  %v4623_v1 = vld [vmem:[#allocation7 + $0x8] ss:$16 sps:$4 sm:$0xff]   ;;  %v4626_v28 = vld [vmem:[#allocation7 + $0x20] ss:$16 sps:$4 sm:$0xff]   ;;  %v4644_v0 = vld [vmem:[#allocation7 + $0xc4] ss:$16 sps:$4 sm:$0xff]  }
 0x5ad   :  { %v2465_v47 = vsel %vm332_vm2, %v2461_v23, %v2362_v35  ;;  %v4624_v35 = vld [vmem:[#allocation7 + $0x24] ss:$16 sps:$4 sm:$0xff]   ;;  %v4627_v23 = vld [vmem:[#allocation7 + $0x28] ss:$16 sps:$4 sm:$0xff]   ;;  %s4373_s8 = sshll.u32 %s3022_s25, 5 }
 0x5ae   :  { %v2469_v49 = vsel %vm337_vm3, %v2465_v47, %v2383_v29  ;;  %v4632_v29 = vld [vmem:[#allocation7 + $0x64] ss:$16 sps:$4 sm:$0xff]   ;;  %v4634_v47 = vld [vmem:[#allocation7 + $0x60] ss:$16 sps:$4 sm:$0xff]   ;;  %v4635_v33 = vld [vmem:[#allocation7 + $0x68] ss:$16 sps:$4 sm:$0xff]  }
 0x5af   :  { %v2473_v10 = vsel %vm342_vm4, %v2469_v49, %v2404_v60  ;;  %v4639_v60 = vld [vmem:[#allocation7 + $0x88] ss:$16 sps:$4 sm:$0xff]   ;;  %v4642_v49 = vld [vmem:[#allocation7 + $0xa0] ss:$16 sps:$4 sm:$0xff]  }
 0x5b0   :  { %v2477_v14 = vsel %vm347_vm5, %v2473_v10, %v2425_v7  ;;  %v4647_v3 = vld [vmem:[#allocation7 + $0xc8] ss:$16 sps:$4 sm:$0xff]  }
 0x5b1   :  { %v2481_v16 = vsel %vm352_vm6, %v2477_v14, %v2446_v13  ;;  %v4651_v7 = vld [vmem:[#allocation7 + $0xe8] ss:$16 sps:$4 sm:$0xff]  }
 0x5b2   :  { %v2613_v10 = vld [vmem:[%s2612_s11] ss:$8 sm:$0xf]  ;;  %s4369_s11 = sshll.u32 %s2982_s9, 5  ;;  %s3035_s9 = sand.u32 7, %s5913_s16 }
 0x5b3   :  { %v2699_v13 = vrot.slane %v2613_v10, %v5008_v38  ;;  %s2988_s1 = sadd.s32 %s4369_s11, %s2985_s10  ;;  %s3042_s11 = sshra.s32 %s5915_s21, 3 }
 0x65e   :  { %v2518_v50 = vpop.f32.mrb[16].mxu0  ;;  %v2559_v39 = vpop.f32.mrb[24].mxu1 }
 0x65f   :  { %v2566_v62 = vadd.f32 %v2518_v50, %v2479_v48  ;;  %v2520_v44 = vpop.f32.mrb[17].mxu0  ;;  %v2561_v42 = vpop.f32.mrb[25].mxu1  ;;  %v2568_v19 = vadd.f32 %v2559_v39, %v2481_v16  ;;  %v4633_v48 = vld [vmem:[#allocation7 + $0x6c] ss:$16 sps:$4 sm:$0xff]   ;;  %v4638_v50 = vld [vmem:[#allocation7 + $0x80] ss:$16 sps:$4 sm:$0xff]  }
 0x660   :  { %v2567_v43 = vadd.f32 %v2520_v44, %v2480_v53  ;;  %v2522_v4 = vpop.f32.mrb[18].mxu0  ;;  %v2563_v5 = vpop.f32.mrb[26].mxu1  ;;  %v2569_v15 = vadd.f32 %v2561_v42, %v2482_v12  ;;  %v4636_v53 = vld [vmem:[#allocation7 + $0x84] ss:$16 sps:$4 sm:$0xff]   ;;  %v4643_v44 = vld [vmem:[#allocation7 + $0xa8] ss:$16 sps:$4 sm:$0xff]  }
 0x661   :  { %v4240_v6 = vmul.f32 -1.442695, %v2566_v62  ;;  %v2523_v8 = vpop.f32.mrb[19].mxu0  ;;  %v2564_v9 = vpop.f32.mrb[27].mxu1  ;;  %v4640_v39 = vld [vmem:[#allocation7 + $0xa4] ss:$16 sps:$4 sm:$0xff]  }
 0x662   :  { %v4241_v11 = vmul.f32 -1.442695, %v2567_v43  ;;  %v4242_v17 = vmul.f32 -1.442695, %v2569_v15  ;;  %v4641_v62 = vld [vmem:[#allocation7 + $0xac] ss:$16 sps:$4 sm:$0xff]   ;;  %v2703_v15 = vrot.slane %v2613_v10, %v5002_v36 }
 0x663   :  { %4541 = vpow2.f32 %v4240_v6  ;;  %v4645_v42 = vld [vmem:[#allocation7 + $0xcc] ss:$16 sps:$4 sm:$0xff]   ;;  %v4646_v43 = vld [vmem:[#allocation7 + $0xc0] ss:$16 sps:$4 sm:$0xff]   ;;  %v4648_v4 = vld [vmem:[#allocation7 + $0xe4] ss:$16 sps:$4 sm:$0xff]  }
 0x664   :  { %4543 = vpow2.f32 %v4241_v11  ;;  %v4649_v5 = vld [vmem:[#allocation7 + $0xec] ss:$16 sps:$4 sm:$0xff]   ;;  %v4650_v6 = vld [vmem:[#allocation7 + $0xe0] ss:$16 sps:$4 sm:$0xff]  }
 0x665   :  { %4545 = vpow2.f32 %v4242_v17  ;;  %v4439_v8 = vld [vmem:[#allocation9 + $0x4] ss:$8 sps:$4 sm:$0xff]   ;;  %v5821_v9 = vld [vmem:[%s2602_s6] ss:$8 sm:$0xf]  ;;  %s4279_s6 = sld [smem:[#allocation2 + $0x187]] }
 0x666   :  { %4547 = vtanh.f32 %v2568_v19  ;;  %v2623_v11 = vld [vmem:[%s2622_s17] ss:$8 sm:$0xf]  ;;  %v2678_v12 = vrot.slane %v5821_v9, %v5008_v38  ;;  %v2682_v14 = vrot.slane %v5821_v9, %v5002_v36  ;;  %s2995_s17 = sand.u32 7, %s4273_s7  ;;  %s3025_s7 = sand.u32 7, %s5911_s15 }
 0x667   :  { %v2633_v16 = vld [vmem:[%s2632_s20] ss:$8 sm:$0xf]  ;;  %v2720_v17 = vrot.slane %v2623_v11, %v5008_v38  ;;  %s2998_s20 = sadd.s32 %s4370_s12, %s2995_s17  ;;  %s4375_s15 = sshll.u32 %s3042_s11, 5 }
 0x668   :  { %v2842_v19 = vsel %vm322_vm0, %v2678_v12, %v2699_v13  ;;  %s2999_s30 = scalar_lea.vmem [#allocation6], %s2998_s20 }
 0x66b   :  { %s3012_s19 = sshra.s32 %s4279_s6, 3 }
 0x66c   :  { %s4372_s23 = sshll.u32 %s3012_s19, 5 }
 0x66d   :  { %v4542_v20 = vpop.eup %4541 }
 0x66e   :  { %v4544_v18 = vpop.eup %4543  ;;  %v2573_v21 = vadd.f32 1.0, %v4542_v20  ;;  %v2724_v20 = vrot.slane %v2623_v11, %v5002_v36 }
 0x66f   :  { %v2579_v27 = vadd.f32 1.0, %v4544_v18  ;;  %v4546_v30 = vpop.eup %4545  ;;  %v2843_v18 = vsel %vm322_vm0, %v2682_v14, %v2703_v15 }
 0x670   :  { %4549 = vrcp.f32 %v2573_v21  ;;  %v4548_v25 = vpop.eup %4547  ;;  %v2586_v52 = vadd.f32 1.0, %v4546_v30  ;;  %v2643_v21 = vld [vmem:[%s2642_s22] ss:$8 sm:$0xf]  ;;  %v2846_v30 = vsel %vm327_vm1, %v2842_v19, %v2720_v17  ;;  %s3015_s22 = sand.u32 7, %s4279_s6  ;;  %s3028_s6 = sadd.s32 %s4373_s8, %s3025_s7 }
 0x671   :  { %4551 = vrcp.f32 %v2579_v27  ;;  %v2741_v27 = vrot.slane %v2633_v16, %v5008_v38  ;;  %s3029_s3 = scalar_lea.vmem [#allocation6], %s3028_s6 }
 0x672   :  { %4553 = vrcp.f32 %v2586_v52  ;;  %v2653_v52 = vld [vmem:[%s2652_s0] ss:$8 sm:$0xf]  ;;  %s3032_s0 = sshra.s32 %s5913_s16, 3  ;;  %s3052_s16 = sshra.s32 %s5919_s26, 3 }
 0x673   :  { %v2791_v13 = vrot.slane %v2653_v52, %v5068_v55  ;;  %s4374_s10 = sshll.u32 %s3032_s0, 5  ;;  %s4376_s19 = sshll.u32 %s3052_s16, 5 }
 0x674   :  { %s3038_s14 = sadd.s32 %s4374_s10, %s3035_s9 }
 0x675   :  { %s3039_s20 = scalar_lea.vmem [#allocation6], %s3038_s14 }
 0x67a   :  { %v4550_v59 = vpop.eup %4549 }
 0x67b   :  { %v4552_v41 = vpop.eup %4551  ;;  %v2590_v37 = vmul.f32 %v4550_v59, %v4548_v25  ;;  %v2745_v25 = vrot.slane %v2633_v16, %v5002_v36  ;;  %v2690_v59 = vrot.slane %v5821_v9, %v5072_v57 }
 0x67c   :  { %v2589_v22 = vmul.f32 %v4552_v41, %v5679_v61  ;;  %v4554_v46 = vpop.eup %4553  ;;  %v4625_v61 = vld [vmem:[#allocation7 + $0x2c] ss:$16 sps:$4 sm:$0xff]   ;;  %v2711_v41 = vrot.slane %v2613_v10, %v5072_v57 }
 0x67e   :  { %v5802_v45 = vadd.f32 %v2590_v37, %v2589_v22  ;;  %v2847_v37 = vsel %vm327_vm1, %v2843_v18, %v2724_v20  ;;  %v2762_v22 = vrot.slane %v2643_v21, %v5008_v38 }
 0x680   :  { %4555 = vtanh.f32 %v5802_v45 }
 0x68a   :  { %v4556_v31 = vpop.eup %4555 }
 0x68b   :  { %v5805_v56 = vmul.f32 %v4556_v31, %v4554_v46  ;;  %v2850_v46 = vsel %vm332_vm2, %v2846_v30, %v2741_v27  ;;  %v2766_v31 = vrot.slane %v2643_v21, %v5002_v36 }
 0x68d   :  { %v2870_v2 = vpack.c.bf16 %v5805_v56, %v5805_v56 }
 0x68f   :  { %2904 = vmatmul.mubr.bf16.vlgmr.msra.gmra.mrb[20].mxu0 %v2870_v2  ;;  %2945 = vmatmul.mubr.bf16.vlgmr.msra.gmra.mrb[28].mxu1 %v2870_v2  ;;  %v2732_v2 = vrot.slane %v2623_v11, %v5072_v57 }
 0x690   :  { %3259 = vmatpush1.bf16.msra.mxu0 %v4622_v26  ;;  %3300 = vmatpush1.bf16.msra.mxu1 %v4623_v1  ;;  %v2851_v26 = vsel %vm332_vm2, %v2847_v37, %v2745_v25  ;;  %v2845_v1 = vsel %vm322_vm0, %v2690_v59, %v2711_v41 }
 0x691   :  { %3260 = vmatprep.subr.bf16.mxu0 %v4624_v35  ;;  %3301 = vmatprep.subr.bf16.mxu1 %v4625_v61  ;;  %v2663_v35 = vld [vmem:[%s2662_s24] ss:$8 sm:$0xf]  ;;  %v2783_v61 = vrot.slane %v2653_v52, %v5008_v38  ;;  %s2989_s24 = scalar_lea.vmem [#allocation6], %s2988_s1  ;;  %s3045_s1 = sand.u32 7, %s5915_s21 }
 0x692   :  { %3290 = vmatprep.mubr.bf16.mxu0 %v6275_v51  ;;  %3331 = vmatprep.mubr.bf16.mxu1 %v6275_v51  ;;  %v2812_v59 = vrot.slane %v2663_v35, %v5068_v55  ;;  %s3048_s12 = sadd.s32 %s4375_s15, %s3045_s1  ;;  %s3058_s21 = sadd.s32 %s4376_s19, %s3055_s18 }
 0x693   :  { %s3049_s2 = scalar_lea.vmem [#allocation6], %s3048_s12 }
 0x694   :  { %3261 = vmatpush1.bf16.msra.mxu0 %v4626_v28  ;;  %3302 = vmatpush1.bf16.msra.mxu1 %v4627_v23  ;;  %v2686_v28 = vrot.slane %v5821_v9, %v5068_v55  ;;  %v2707_v23 = vrot.slane %v2613_v10, %v5068_v55  ;;  %v2816_v9 = vrot.slane %v2663_v35, %v5072_v57 }
 0x695   :  { %3262 = vmatprep.subr.bf16.mxu0 %v4628_v54  ;;  %3303 = vmatprep.subr.bf16.mxu1 %v4629_v24  ;;  %v2854_v54 = vsel %vm337_vm3, %v2850_v46, %v2762_v22  ;;  %v2787_v24 = vrot.slane %v2653_v52, %v5002_v36 }
 0x698   :  { %3263 = vmatpush1.bf16.msra.mxu0 %v4630_v32  ;;  %3304 = vmatpush1.bf16.msra.mxu1 %v4631_v34  ;;  %v2753_v32 = vrot.slane %v2633_v16, %v5072_v57  ;;  %v2855_v34 = vsel %vm337_vm3, %v2851_v26, %v2766_v31 }
 0x699   :  { %3264 = vmatprep.subr.bf16.mxu0 %v4632_v29  ;;  %3305 = vmatprep.subr.bf16.mxu1 %v4633_v48  ;;  %v2849_v29 = vsel %vm327_vm1, %v2845_v1, %v2732_v2  ;;  %v2673_v48 = vld [vmem:[%s2672_s27] ss:$8 sm:$0xf]  ;;  %s3018_s27 = sadd.s32 %s4372_s23, %s3015_s22  ;;  %s3059_s22 = scalar_lea.vmem [#allocation6], %s3058_s21 }
 0x69a   :  { %v2837_v19 = vrot.slane %v2673_v48, %v5072_v57  ;;  %v2833_v31 = vrot.slane %v2673_v48, %v5068_v55  ;;  %s3019_s17 = scalar_lea.vmem [#allocation6], %s3018_s27 }
 0x69c   :  { %3265 = vmatpush1.bf16.msra.mxu0 %v4634_v47  ;;  %3306 = vmatpush1.bf16.msra.mxu1 %v4635_v33  ;;  %v2804_v47 = vrot.slane %v2663_v35, %v5008_v38  ;;  %v2728_v33 = vrot.slane %v2623_v11, %v5068_v55 }
 0x69d   :  { %3266 = vmatprep.subr.bf16.mxu0 %v4636_v53  ;;  %3307 = vmatprep.subr.bf16.mxu1 %v4637_v63  ;;  %v2858_v53 = vsel %vm342_vm4, %v2854_v54, %v2783_v61  ;;  %v2844_v63 = vsel %vm322_vm0, %v2686_v28, %v2707_v23 }
 0x6a0   :  { %3267 = vmatpush1.bf16.msra.mxu0 %v4638_v50  ;;  %3308 = vmatpush1.bf16.msra.mxu1 %v4639_v60  ;;  %v2808_v50 = vrot.slane %v2663_v35, %v5002_v36  ;;  %v2774_v60 = vrot.slane %v2643_v21, %v5072_v57 }
 0x6a1   :  { %3268 = vmatprep.subr.bf16.mxu0 %v4640_v39  ;;  %3309 = vmatprep.subr.bf16.mxu1 %v4641_v62  ;;  %v2859_v39 = vsel %vm342_vm4, %v2855_v34, %v2787_v24  ;;  %v2853_v62 = vsel %vm332_vm2, %v2849_v29, %v2753_v32 }
 0x6a4   :  { %3269 = vmatpush1.bf16.msra.mxu0 %v4642_v49  ;;  %3310 = vmatpush1.bf16.msra.mxu1 %v4643_v44  ;;  %v2825_v49 = vrot.slane %v2673_v48, %v5008_v38  ;;  %v2749_v44 = vrot.slane %v2633_v16, %v5068_v55 }
 0x6a5   :  { %3270 = vmatprep.subr.bf16.mxu0 %v4644_v0  ;;  %3311 = vmatprep.subr.bf16.mxu1 %v4645_v42  ;;  %v2862_v0 = vsel %vm347_vm5, %v2858_v53, %v2804_v47  ;;  %v2848_v42 = vsel %vm327_vm1, %v2844_v63, %v2728_v33 }
 0x6a8   :  { %3271 = vmatpush1.bf16.msra.mxu0 %v4646_v43  ;;  %3312 = vmatpush1.bf16.msra.mxu1 %v4647_v3  ;;  %v2829_v43 = vrot.slane %v2673_v48, %v5002_v36  ;;  %v2795_v3 = vrot.slane %v2653_v52, %v5072_v57 }
 0x6a9   :  { %3272 = vmatprep.subr.bf16.mxu0 %v4648_v4  ;;  %3313 = vmatprep.subr.bf16.mxu1 %v4649_v5  ;;  %v2863_v4 = vsel %vm347_vm5, %v2859_v39, %v2808_v50  ;;  %v2857_v5 = vsel %vm337_vm3, %v2853_v62, %v2774_v60  ;;  %v4437_v62 = vld [vmem:[#allocation9] ss:$8 sps:$4 sm:$0xff]  }
 0x6aa   :  { %v2867_v10 = vsel %vm352_vm6, %v2863_v4, %v2829_v43  ;;  %v2861_v11 = vsel %vm342_vm4, %v2857_v5, %v2795_v3  ;;  %v4448_v43 = vld [vmem:[#allocation9 + $0x34] ss:$8 sps:$4 sm:$0xff]   ;;  %v4446_v3 = vld [vmem:[#allocation9 + $0x30] ss:$8 sps:$4 sm:$0xff]   ;;  %v4451_v4 = vld [vmem:[#allocation9 + $0x44] ss:$8 sps:$4 sm:$0xff]  }
 0x6ab   :  { %v4449_v5 = vld [vmem:[#allocation9 + $0x40] ss:$8 sps:$4 sm:$0xff]  }
 0x6ac   :  { %3273 = vmatpush1.bf16.msra.mxu0 %v4650_v6  ;;  %3314 = vmatpush1.bf16.msra.mxu1 %v4651_v7  ;;  %v2770_v6 = vrot.slane %v2643_v21, %v5068_v55  ;;  %v2866_v7 = vsel %vm352_vm6, %v2862_v0, %v2825_v49  ;;  %v2865_v21 = vsel %vm347_vm5, %v2861_v11, %v2816_v9  ;;  %v4440_v0 = vld [vmem:[#allocation9 + $0x10] ss:$8 sps:$4 sm:$0xff]   ;;  %v4455_v9 = vld [vmem:[#allocation9 + $0x60] ss:$8 sps:$4 sm:$0xff]  }
 0x6ad   :  { %3480 = vmatprep.subr.bf16.mxu0 %v4439_v8  ;;  %v2852_v8 = vsel %vm332_vm2, %v2848_v42, %v2749_v44  ;;  %v2869_v46 = vsel %vm352_vm6, %v2865_v21, %v2837_v19  ;;  %v4442_v44 = vld [vmem:[#allocation9 + $0x14] ss:$8 sps:$4 sm:$0xff]   ;;  %v4443_v42 = vld [vmem:[#allocation9 + $0x20] ss:$8 sps:$4 sm:$0xff]   ;;  %v4458_v11 = vld [vmem:[#allocation9 + $0x70] ss:$8 sps:$4 sm:$0xff]  }
 0x6ae   :  { %v2856_v16 = vsel %vm337_vm3, %v2852_v8, %v2770_v6  ;;  %v4454_v6 = vld [vmem:[#allocation9 + $0x54] ss:$8 sps:$4 sm:$0xff]   ;;  %v4457_v8 = vld [vmem:[#allocation9 + $0x64] ss:$8 sps:$4 sm:$0xff]  }
 0x6af   :  { %v2860_v52 = vsel %vm342_vm4, %v2856_v16, %v2791_v13  ;;  %v3020_v21 = vld [vmem:[%s3019_s17] ss:$8 sm:$0xf] }
 0x6b0   :  { %v2864_v2 = vsel %vm347_vm5, %v2860_v52, %v2812_v59 }
 0x6b1   :  { %v2868_v1 = vsel %vm352_vm6, %v2864_v2, %v2833_v31 }
 0x762   :  { %v2905_v12 = vpop.f32.mrb[20].mxu0  ;;  %v2946_v14 = vpop.f32.mrb[28].mxu1 }
 0x763   :  { %v2953_v15 = vadd.f32 %v2905_v12, %v2866_v7  ;;  %v2907_v17 = vpop.f32.mrb[21].mxu0  ;;  %v2948_v20 = vpop.f32.mrb[29].mxu1  ;;  %v2955_v28 = vadd.f32 %v2946_v14, %v2868_v1  ;;  %v4452_v7 = vld [vmem:[#allocation9 + $0x50] ss:$8 sps:$4 sm:$0xff]   ;;  %v6276_v12 = vld [vmem:[#allocation15_spill] sm:$0xff]  ;;  %v6277_v14 = vld [vmem:[#allocation16_spill] sm:$0xff] }
 0x764   :  { %v2954_v18 = vadd.f32 %v2907_v17, %v2867_v10  ;;  %v2909_v27 = vpop.f32.mrb[22].mxu0  ;;  %v2950_v30 = vpop.f32.mrb[30].mxu1  ;;  %v2956_v26 = vadd.f32 %v2948_v20, %v2869_v46  ;;  %v4460_v10 = vld [vmem:[#allocation9 + $0x74] ss:$8 sps:$4 sm:$0xff]   ;;  %v3368_v13 = vpack.c.bf16 %v6276_v12, %v5122_v40  ;;  %v3370_v17 = vpack.c.bf16 %v5805_v56, %v5682_v58 }
 0x765   :  { %v4267_v25 = vmul.f32 -1.442695, %v2953_v15  ;;  %v2910_v41 = vpop.f32.mrb[23].mxu0  ;;  %v2951_v37 = vpop.f32.mrb[31].mxu1  ;;  %v6278_v15 = vld [vmem:[#allocation17_spill] sm:$0xff] }
 0x766   :  { %v4268_v22 = vmul.f32 -1.442695, %v2954_v18  ;;  %v4269_v61 = vmul.f32 -1.442695, %v2956_v26  ;;  %v3369_v16 = vpack.c.bf16 %v6278_v15, %v6277_v14  ;;  %v3128_v37 = vrot.slane %v3020_v21, %v5008_v38 }
 0x767   :  { %4557 = vpow2.f32 %v4267_v25  ;;  %v2990_v40 = vld [vmem:[%s2989_s24] ss:$8 sm:$0xf] }
 0x768   :  { %4559 = vpow2.f32 %v4268_v22  ;;  %v3010_v58 = vld [vmem:[%s3009_s13] ss:$8 sm:$0xf]  ;;  %v3065_v56 = vrot.slane %v2990_v40, %v5008_v38  ;;  %v3069_v20 = vrot.slane %v2990_v40, %v5002_v36  ;;  %v3132_v22 = vrot.slane %v3020_v21, %v5002_v36 }
 0x769   :  { %4561 = vpow2.f32 %v4269_v61  ;;  %v3107_v27 = vrot.slane %v3010_v58, %v5008_v38  ;;  %v3111_v25 = vrot.slane %v3010_v58, %v5002_v36  ;;  %v3030_v41 = vld [vmem:[%s3029_s3] ss:$8 sm:$0xf]  ;;  %v3077_v31 = vrot.slane %v2990_v40, %v5072_v57 }
 0x76a   :  { %4563 = vtanh.f32 %v2955_v28  ;;  %v3040_v26 = vld [vmem:[%s3039_s20] ss:$8 sm:$0xf]  ;;  %v3149_v1 = vrot.slane %v3030_v41, %v5008_v38  ;;  %v3153_v28 = vrot.slane %v3030_v41, %v5002_v36 }
 0x76b   :  { %v3178_v15 = vrot.slane %v3040_v26, %v5068_v55 }
 0x771   :  { %v4558_v23 = vpop.eup %4557 }
 0x772   :  { %v4560_v35 = vpop.eup %4559  ;;  %v2960_v54 = vadd.f32 1.0, %v4558_v23  ;;  %v3073_v23 = vrot.slane %v2990_v40, %v5068_v55 }
 0x773   :  { %v2966_v24 = vadd.f32 1.0, %v4560_v35  ;;  %v4562_v32 = vpop.eup %4561 }
 0x774   :  { %4565 = vrcp.f32 %v2960_v54  ;;  %v4564_v34 = vpop.eup %4563  ;;  %v2973_v33 = vadd.f32 1.0, %v4562_v32  ;;  %v3050_v32 = vld [vmem:[%s3049_s2] ss:$8 sm:$0xf] }
 0x775   :  { %4567 = vrcp.f32 %v2966_v24  ;;  %v3119_v24 = vrot.slane %v3010_v58, %v5072_v57 }
 0x776   :  { %4569 = vrcp.f32 %v2973_v33  ;;  %v3115_v33 = vrot.slane %v3010_v58, %v5068_v55 }
 0x77e   :  { %v4566_v29 = vpop.eup %4565 }
 0x77f   :  { %v4568_v48 = vpop.eup %4567  ;;  %v2977_v47 = vmul.f32 %v4566_v29, %v4564_v34  ;;  %v3170_v34 = vrot.slane %v3040_v26, %v5008_v38 }
 0x780   :  { %v2976_v53 = vmul.f32 %v4568_v48, %v5802_v45  ;;  %v4570_v50 = vpop.eup %4569  ;;  %v4445_v45 = vld [vmem:[#allocation9 + $0x24] ss:$8 sps:$4 sm:$0xff]  }
 0x782   :  { %v5894_v63 = vadd.f32 %v2977_v47, %v2976_v53  ;;  %v3174_v47 = vrot.slane %v3040_v26, %v5002_v36 }
 0x784   :  { %4571 = vtanh.f32 %v5894_v63 }
 0x78e   :  { %v4572_v60 = vpop.eup %4571 }
 0x78f   :  { %v5897_v39 = vmul.f32 %v4572_v60, %v4570_v50  ;;  %v3140_v50 = vrot.slane %v3020_v21, %v5072_v57  ;;  %v3060_v60 = vld [vmem:[%s3059_s22] ss:$8 sm:$0xf] }
 0x791   :  { %v3257_v49 = vpack.c.bf16 %v5897_v39, %v5897_v39 }
 0x793   :  { %3291 = vmatmul.mubr.bf16.vlgmr.msra.gmra.mrb[24].mxu0 %v3257_v49  ;;  %3332 = vmatmul.mubr.bf16.vlgmr.msra.gmra.mrb[32].mxu1 %v3257_v49 }
 0x794   :  { %3481 = vmatpush1.bf16.msra.mxu0 %v4437_v62  ;;  %3512 = vmatprep.mubr.bf16.mxu0 %v6275_v51  ;;  %v3191_v62 = vrot.slane %v3050_v32, %v5008_v38 }
 0x795   :  { %3482 = vmatprep.subr.bf16.mxu0 %v4442_v44 }
 0x798   :  { %3483 = vmatpush1.bf16.msra.mxu0 %v4440_v0 }
 0x799   :  { %3484 = vmatprep.subr.bf16.mxu0 %v4445_v45  ;;  %v3195_v45 = vrot.slane %v3050_v32, %v5002_v36 }
 0x79c   :  { %3485 = vmatpush1.bf16.msra.mxu0 %v4443_v42  ;;  %v3136_v42 = vrot.slane %v3020_v21, %v5068_v55  ;;  %v3199_v21 = vrot.slane %v3050_v32, %v5068_v55 }
 0x79d   :  { %3486 = vmatprep.subr.bf16.mxu0 %v4448_v43 }
 0x7a0   :  { %3487 = vmatpush1.bf16.msra.mxu0 %v4446_v3  ;;  %v3161_v3 = vrot.slane %v3030_v41, %v5072_v57 }
 0x7a1   :  { %3488 = vmatprep.subr.bf16.mxu0 %v4451_v4  ;;  %v3212_v4 = vrot.slane %v3060_v60, %v5008_v38 }
 0x7a4   :  { %3489 = vmatpush1.bf16.msra.mxu0 %v4449_v5 }
 0x7a5   :  { %3490 = vmatprep.subr.bf16.mxu0 %v4454_v6 }
 0x7a8   :  { %3491 = vmatpush1.bf16.msra.mxu0 %v4452_v7 }
 0x7a9   :  { %3492 = vmatprep.subr.bf16.mxu0 %v4457_v8  ;;  %v3216_v8 = vrot.slane %v3060_v60, %v5002_v36 }
 0x7ac   :  { %3493 = vmatpush1.bf16.msra.mxu0 %v4455_v9  ;;  %v3157_v9 = vrot.slane %v3030_v41, %v5068_v55 }
 0x7ad   :  { %3494 = vmatprep.subr.bf16.mxu0 %v4460_v10 }
 0x7b0   :  { %3495 = vmatpush1.bf16.msra.mxu0 %v4458_v11  ;;  %v3182_v11 = vrot.slane %v3040_v26, %v5072_v57 }
 0x7b3   :  { %3513 = vmatmul.mubr.bf16.vlgmr.msra.gmra.mrb[28].mxu0 %v3368_v13 }
 0x7b4   :  { %3522 = vmatprep.mubr.bf16.mxu0 %v6275_v51 }
 0x7bb   :  { %3523 = vmatmul.mubr.bf16.gmra.mrb[32].mxu0 %v3369_v16 }
 0x7bc   :  { %3532 = vmatprep.mubr.bf16.mxu0 %v6275_v51 }
 0x7c3   :  { %3533 = vmatmul.mubr.bf16.gmra.mrb[36].mxu0 %v3370_v17  ;;  %v3203_v17 = vrot.slane %v3050_v32, %v5072_v57 }
 0x7c4   :  { %3542 = vmatprep.mubr.bf16.mxu0 %v6275_v51  ;;  %v3000_v51 = vld [vmem:[%s2999_s30] ss:$8 sm:$0xf] }
 0x7c5   :  { %v3086_v19 = vrot.slane %v3000_v51, %v5008_v38  ;;  %v3090_v18 = vrot.slane %v3000_v51, %v5002_v36  ;;  %v3098_v2 = vrot.slane %v3000_v51, %v5072_v57  ;;  %v3094_v35 = vrot.slane %v3000_v51, %v5068_v55 }
 0x7c7   :  { %v3229_v30 = vsel %vm322_vm0, %v3065_v56, %v3086_v19  ;;  %v3230_v59 = vsel %vm322_vm0, %v3069_v20, %v3090_v18  ;;  %v3232_v29 = vsel %vm322_vm0, %v3077_v31, %v3098_v2  ;;  %v3231_v49 = vsel %vm322_vm0, %v3073_v23, %v3094_v35 }
 0x7c8   :  { %v3233_v52 = vsel %vm327_vm1, %v3229_v30, %v3107_v27  ;;  %v3234_v46 = vsel %vm327_vm1, %v3230_v59, %v3111_v25  ;;  %v3236_v44 = vsel %vm327_vm1, %v3232_v29, %v3119_v24  ;;  %v3235_v5 = vsel %vm327_vm1, %v3231_v49, %v3115_v33 }
 0x7c9   :  { %v3237_v61 = vsel %vm332_vm2, %v3233_v52, %v3128_v37  ;;  %v3238_v54 = vsel %vm332_vm2, %v3234_v46, %v3132_v22  ;;  %v3240_v6 = vsel %vm332_vm2, %v3236_v44, %v3140_v50  ;;  %v3239_v12 = vsel %vm332_vm2, %v3235_v5, %v3136_v42 }
 0x7ca   :  { %v3241_v48 = vsel %vm337_vm3, %v3237_v61, %v3149_v1  ;;  %v3242_v53 = vsel %vm337_vm3, %v3238_v54, %v3153_v28  ;;  %v3244_v13 = vsel %vm337_vm3, %v3240_v6, %v3161_v3  ;;  %v3243_v51 = vsel %vm337_vm3, %v3239_v12, %v3157_v9 }
 0x7cb   :  { %v3245_v0 = vsel %vm342_vm4, %v3241_v48, %v3170_v34  ;;  %v3246_v43 = vsel %vm342_vm4, %v3242_v53, %v3174_v47  ;;  %v3248_v56 = vsel %vm342_vm4, %v3244_v13, %v3182_v11  ;;  %v3224_v30 = vrot.slane %v3060_v60, %v5072_v57 }
 0x7cc   :  { %v3249_v7 = vsel %vm347_vm5, %v3245_v0, %v3191_v62  ;;  %v3250_v10 = vsel %vm347_vm5, %v3246_v43, %v3195_v45  ;;  %v3247_v37 = vsel %vm342_vm4, %v3243_v51, %v3178_v15  ;;  %v3252_v52 = vsel %vm347_vm5, %v3248_v56, %v3203_v17 }
 0x7cd   :  { %v3253_v14 = vsel %vm352_vm6, %v3249_v7, %v3212_v4  ;;  %v3254_v16 = vsel %vm352_vm6, %v3250_v10, %v3216_v8  ;;  %v3220_v2 = vrot.slane %v3060_v60, %v5068_v55  ;;  %v3251_v26 = vsel %vm347_vm5, %v3247_v37, %v3199_v21  ;;  %v3388_v55 = vld [vmem:[%s6265_s4] sm:$0x3]  ;;  %s4769_s4 = smov [#allocation10]  }
 0x7ce   :  { %v3256_v1 = vsel %vm352_vm6, %v3252_v52, %v3224_v30  ;;  %v5991_v53 = vrot.slane %v3388_v55, %v5008_v38  ;;  %v5995_v62 = vrot.slane %v3388_v55, %v5002_v36  ;;  %s3844_s0 = sshll.u32 %s4769_s4, 4  ;;  %s3845_s0 = int_to_ptr.vmem [resolvable:$true] %s3844_s0 }
 0x7cf   :  { %v3255_v57 = vsel %vm352_vm6, %v3251_v26, %v3220_v2  ;;  %s4728_s26 = scalar_lea.vmem %s3845_s0, 2048  ;;  %p4733_p0 = scmp.lt.s32.totalorder %s3845_s0, %s3845_s0 }
 0x7d0   :  { %p4729_p13 = scmp.ne.s32.totalorder %s3845_s0, %s4728_s26  ;;  %p4734_p1 = scmp.lt.s32.totalorder %s4728_s26, %s4728_s26 }
 0x7d2   :  { %p4735_p2 = por %p4734_p1, %p4733_p0 }
 0x7d4   :  { %p4736_p3 = pnand %p4735_p2, %p4729_p13 }
 0x866   :  { %v3292_v40 = vpop.f32.mrb[24].mxu0  ;;  %v3333_v58 = vpop.f32.mrb[32].mxu1 }
 0x867   :  { %v3340_v19 = vadd.f32 %v3292_v40, %v3253_v14  ;;  %v3294_v20 = vpop.f32.mrb[25].mxu0  ;;  %v3335_v18 = vpop.f32.mrb[33].mxu1  ;;  %v3342_v28 = vadd.f32 %v3333_v58, %v3255_v57 }
 0x868   :  { %v3341_v27 = vadd.f32 %v3294_v20, %v3254_v16  ;;  %v3296_v25 = vpop.f32.mrb[26].mxu0  ;;  %v3337_v59 = vpop.f32.mrb[34].mxu1  ;;  %v3343_v61 = vadd.f32 %v3335_v18, %v3256_v1 }
 0x869   :  { %v4294_v41 = vmul.f32 -1.442695, %v3340_v19  ;;  %v3297_v22 = vpop.f32.mrb[27].mxu0  ;;  %v3338_v46 = vpop.f32.mrb[35].mxu1 }
 0x86a   :  { %v4295_v31 = vmul.f32 -1.442695, %v3341_v27  ;;  %v4296_v23 = vmul.f32 -1.442695, %v3343_v61 }
 0x86b   :  { %4573 = vpow2.f32 %v4294_v41 }
 0x86c   :  { %4575 = vpow2.f32 %v4295_v31 }
 0x86d   :  { %4577 = vtanh.f32 %v3342_v28 }
 0x86e   :  { %4579 = vpow2.f32 %v4296_v23 }
 0x875   :  { %v4574_v35 = vpop.eup %4573 }
 0x876   :  { %v4576_v54 = vpop.eup %4575  ;;  %v3347_v24 = vadd.f32 1.0, %v4574_v35 }
 0x877   :  { %v3353_v32 = vadd.f32 1.0, %v4576_v54  ;;  %v4578_v34 = vpop.eup %4577 }
 0x878   :  { %4581 = vrcp.f32 %v3347_v24  ;;  %v4580_v29 = vpop.eup %4579 }
 0x879   :  { %4583 = vrcp.f32 %v3353_v32  ;;  %v3360_v60 = vadd.f32 1.0, %v4580_v29 }
 0x87b   :  { %4585 = vrcp.f32 %v3360_v60 }
 0x882   :  { %v4582_v48 = vpop.eup %4581 }
 0x883   :  { %v4584_v47 = vpop.eup %4583  ;;  %v3364_v33 = vmul.f32 %v4582_v48, %v4578_v34 }
 0x884   :  { %v3363_v50 = vmul.f32 %v4584_v47, %v5894_v63 }
 0x885   :  { %v6044_v26 = vpop.eup %4585 }
 0x886   :  { %v3514_v49 = vpop.f32.mrb[28].mxu0  ;;  %v3365_v44 = vadd.f32 %v3364_v33, %v3363_v50 }
 0x887   :  { %v5998_v0 = vadd.f32 %v3514_v49, %v5991_v53  ;;  %v3516_v45 = vpop.f32.mrb[29].mxu0 }
 0x888   :  { %v6001_v42 = vadd.f32 %v3516_v45, %v5995_v62  ;;  %v3518_v43 = vpop.f32.mrb[30].mxu0  ;;  %4587 = vtanh.f32 %v3365_v44 }
 0x889   :  { %v3520_v38 = vpop.f32.mrb[31].mxu0  ;;  %v3608_v63 = vrot.slane %v5998_v0, 1  ;;  %v3641_v3 = vrot.slane %v5998_v0, 2  ;;  %v3674_v36 = vrot.slane %v5998_v0, 3  ;;  %v3707_v4 = vrot.slane %v5998_v0, 4 }
 0x88a   :  { %v3740_v5 = vrot.slane %v5998_v0, 5  ;;  %v3773_v6 = vrot.slane %v5998_v0, 6  ;;  %v3806_v7 = vrot.slane %v5998_v0, 7  ;;  %v3622_v8 = vrot.slane %v6001_v42, 1 }
 0x88b   :  { %v3655_v9 = vrot.slane %v6001_v42, 2  ;;  %v3688_v10 = vrot.slane %v6001_v42, 3  ;;  %v6014_v11 = vadd.f32 %v3518_v43, %v5991_v53  ;;  %v6017_v12 = vadd.f32 %v3520_v38, %v5995_v62 }
 0x88c   :  { %v3721_v13 = vrot.slane %v6001_v42, 4  ;;  %v3754_v14 = vrot.slane %v6001_v42, 5  ;;  %v3787_v15 = vrot.slane %v6001_v42, 6  ;;  %v3820_v16 = vrot.slane %v6001_v42, 7 }
 0x88d   :  { %v3569_v17 = vrot.slane %v6014_v11, 7  ;;  %v3609_v40 = vsel %vm3570_vm7, %v6014_v11, %v3608_v63  ;;  %v3642_v51 = vrot.slane %v6014_v11, 1  ;;  %v3675_v58 = vrot.slane %v6014_v11, 2 }
 0x88e   :  { %v3524_v56 = vpop.f32.mrb[32].mxu0  ;;  %v3708_v19 = vrot.slane %v6014_v11, 3  ;;  %v3741_v20 = vrot.slane %v6014_v11, 4  ;;  %v3774_v18 = vrot.slane %v6014_v11, 5  ;;  %v3807_v21 = vrot.slane %v6014_v11, 6 }
 0x88f   :  { %v3526_v27 = vpop.f32.mrb[33].mxu0  ;;  %v3571_v30 = vsel %vm3570_vm7, %v3569_v17, %v5998_v0  ;;  %v3590_v25 = vrot.slane %v6017_v12, 7  ;;  %v3623_v59 = vsel %vm3570_vm7, %v6017_v12, %v3622_v8  ;;  %v3656_v41 = vrot.slane %v6017_v12, 1 }
 0x890   :  { %v3528_v37 = vpop.f32.mrb[34].mxu0  ;;  %v6039_v52 = vsel %vm3570_vm7, %v3708_v19, %v3707_v4  ;;  %v3742_v22 = vsel %vm3570_vm7, %v3741_v20, %v3740_v5  ;;  %v3775_v46 = vsel %vm3570_vm7, %v3774_v18, %v3773_v6  ;;  %v3808_v31 = vsel %vm3570_vm7, %v3807_v21, %v3806_v7 }
 0x891   :  { %v3530_v2 = vpop.f32.mrb[35].mxu0  ;;  %v3591_v1 = vsel %vm3570_vm7, %v3590_v25, %v6001_v42  ;;  %v3689_v57 = vrot.slane %v6017_v12, 2  ;;  %v3722_v61 = vrot.slane %v6017_v12, 3  ;;  %v3755_v28 = vrot.slane %v6017_v12, 4 }
 0x892   :  { %v6051_v23 = vpop.eup %4587  ;;  %v3788_v35 = vrot.slane %v6017_v12, 5  ;;  %v3821_v54 = vrot.slane %v6017_v12, 6  ;;  %v6056_v24 = vadd.f32 %v3524_v56, %v5991_v53  ;;  %v3643_v32 = vsel %vm3570_vm7, %v3642_v51, %v3641_v3 }
 0x893   :  { %v6060_v34 = vsel %vm3570_vm7, %v3722_v61, %v3721_v13  ;;  %v3756_v55 = vsel %vm3570_vm7, %v3755_v28, %v3754_v14  ;;  %v6064_v29 = vadd.f32 %v3526_v27, %v5995_v62  ;;  %v3657_v48 = vsel %vm3570_vm7, %v3656_v41, %v3655_v9 }
 0x894   :  { %v3789_v47 = vsel %vm3570_vm7, %v3788_v35, %v3787_v15  ;;  %v3822_v33 = vsel %vm3570_vm7, %v3821_v54, %v3820_v16  ;;  %v3572_v50 = vrot.slane %v6056_v24, 6  ;;  %v3610_v60 = vrot.slane %v6056_v24, 7 }
 0x895   :  { %v3644_v49 = vsel %vm3573_vm8, %v6056_v24, %v3643_v32  ;;  %v3677_v44 = vrot.slane %v6056_v24, 1  ;;  %v3710_v45 = vrot.slane %v6056_v24, 2  ;;  %v3743_v43 = vrot.slane %v6056_v24, 3 }
 0x896   :  { %v3534_v38 = vpop.f32.mrb[36].mxu0  ;;  %v3574_v63 = vsel %vm3573_vm8, %v3572_v50, %v3571_v30  ;;  %v3611_v3 = vsel %vm3573_vm8, %v3610_v60, %v3609_v40  ;;  %v3776_v4 = vrot.slane %v6056_v24, 4  ;;  %v3809_v5 = vrot.slane %v6056_v24, 5 }
 0x897   :  { %v3536_v6 = vpop.f32.mrb[37].mxu0  ;;  %v6081_v7 = vsel %vm3573_vm8, %v3743_v43, %v3742_v22  ;;  %v3592_v8 = vrot.slane %v6064_v29, 6  ;;  %v3624_v9 = vrot.slane %v6064_v29, 7  ;;  %v3658_v12 = vsel %vm3573_vm8, %v6064_v29, %v3657_v48 }
 0x898   :  { %v3538_v13 = vpop.f32.mrb[38].mxu0  ;;  %v3777_v14 = vsel %vm3573_vm8, %v3776_v4, %v3775_v46  ;;  %v3810_v15 = vsel %vm3573_vm8, %v3809_v5, %v3808_v31  ;;  %v3691_v16 = vrot.slane %v6064_v29, 1  ;;  %v3724_v17 = vrot.slane %v6064_v29, 2 }
 0x899   :  { %v6091_v40 = vpop.f32.mrb[39].mxu0  ;;  %v3593_v51 = vsel %vm3573_vm8, %v3592_v8, %v3591_v1  ;;  %v3625_v56 = vsel %vm3573_vm8, %v3624_v9, %v3623_v59  ;;  %v3757_v19 = vrot.slane %v6064_v29, 3  ;;  %v3790_v20 = vrot.slane %v6064_v29, 4 }
 0x89a   :  { %v3823_v18 = vrot.slane %v6064_v29, 5  ;;  %v6099_v21 = vadd.f32 %v3528_v37, %v5991_v53  ;;  %v3676_v27 = vsel %vm3570_vm7, %v3675_v58, %v3674_v36  ;;  %v6107_v30 = vadd.f32 %v3530_v2, %v5995_v62 }
 0x89b   :  { %v6110_v25 = vsel %vm3573_vm8, %v3757_v19, %v3756_v55  ;;  %v3791_v59 = vsel %vm3573_vm8, %v3790_v20, %v3789_v47  ;;  %v3678_v41 = vsel %vm3573_vm8, %v3677_v44, %v3676_v27  ;;  %v3690_v37 = vsel %vm3570_vm7, %v3689_v57, %v3688_v10 }
 0x89c   :  { %v3824_v0 = vsel %vm3573_vm8, %v3823_v18, %v3822_v33  ;;  %v3575_v11 = vrot.slane %v6099_v21, 5  ;;  %v3612_v36 = vrot.slane %v6099_v21, 6  ;;  %v3645_v58 = vrot.slane %v6099_v21, 7 }
 0x89d   :  { %v3679_v22 = vsel %vm3576_vm9, %v6099_v21, %v3678_v41  ;;  %v3712_v46 = vrot.slane %v6099_v21, 1  ;;  %v3745_v31 = vrot.slane %v6099_v21, 2  ;;  %v3778_v2 = vrot.slane %v6099_v21, 3 }
 0x89e   :  { %v3577_v42 = vsel %vm3576_vm9, %v3575_v11, %v3574_v63  ;;  %v3613_v10 = vsel %vm3576_vm9, %v3612_v36, %v3611_v3  ;;  %v3646_v1 = vsel %vm3576_vm9, %v3645_v58, %v3644_v49  ;;  %v3811_v57 = vrot.slane %v6099_v21, 4 }
 0x89f   :  { %v6131_v61 = vsel %vm3576_vm9, %v3778_v2, %v3777_v14  ;;  %v3594_v28 = vrot.slane %v6107_v30, 5  ;;  %v3626_v35 = vrot.slane %v6107_v30, 6  ;;  %v3659_v54 = vrot.slane %v6107_v30, 7 }
 0x8a0   :  { %v3812_v24 = vsel %vm3576_vm9, %v3811_v57, %v3810_v15  ;;  %v3692_v32 = vsel %vm3573_vm8, %v3691_v16, %v3690_v37  ;;  %v3726_v55 = vrot.slane %v6107_v30, 1  ;;  %v3759_v29 = vrot.slane %v6107_v30, 2 }
 0x8a1   :  { %v3595_v48 = vsel %vm3576_vm9, %v3594_v28, %v3593_v51  ;;  %v3627_v47 = vsel %vm3576_vm9, %v3626_v35, %v3625_v56  ;;  %v3660_v33 = vsel %vm3576_vm9, %v3659_v54, %v3658_v12  ;;  %v3693_v50 = vsel %vm3576_vm9, %v6107_v30, %v3692_v32 }
 0x8a2   :  { %v3792_v60 = vrot.slane %v6107_v30, 3  ;;  %v3825_v49 = vrot.slane %v6107_v30, 4  ;;  %v3535_v44 = vadd.f32 %v3534_v38, %v5991_v53  ;;  %v3711_v43 = vsel %vm3573_vm8, %v3710_v45, %v6039_v52 }
 0x8a3   :  { %v3713_v63 = vsel %vm3576_vm9, %v3712_v46, %v3711_v43  ;;  %v3537_v3 = vadd.f32 %v3536_v6, %v5995_v62  ;;  %v3725_v4 = vsel %vm3573_vm8, %v3724_v17, %v6060_v34  ;;  %v6155_v5 = vadd.f32 %v3538_v13, %v5991_v53 }
 0x8a4   :  { %v3793_v8 = vsel %vm3576_vm9, %v3792_v60, %v3791_v59  ;;  %v3826_v9 = vsel %vm3576_vm9, %v3825_v49, %v3824_v0  ;;  %v3578_v12 = vrot.slane %v3535_v44, 4  ;;  %v3614_v38 = vrot.slane %v3535_v44, 5 }
 0x8a5   :  { %v3647_v14 = vrot.slane %v3535_v44, 6  ;;  %v3680_v15 = vrot.slane %v3535_v44, 7  ;;  %v3714_v52 = vsel %vm3579_vm10, %v3535_v44, %v3713_v63  ;;  %v3747_v45 = vrot.slane %v3535_v44, 1 }
 0x8a6   :  { %v3580_v16 = vsel %vm3579_vm10, %v3578_v12, %v3577_v42  ;;  %v3615_v6 = vsel %vm3579_vm10, %v3614_v38, %v3613_v10  ;;  %v3780_v51 = vrot.slane %v3535_v44, 2  ;;  %v3813_v34 = vrot.slane %v3535_v44, 3 }
 0x8a7   :  { %v3648_v13 = vsel %vm3579_vm10, %v3647_v14, %v3646_v1  ;;  %v3681_v17 = vsel %vm3579_vm10, %v3680_v15, %v3679_v22  ;;  %v3596_v56 = vrot.slane %v3537_v3, 4  ;;  %v3628_v19 = vrot.slane %v3537_v3, 5 }
 0x8a8   :  { %v3814_v20 = vsel %vm3579_vm10, %v3813_v34, %v3812_v24  ;;  %v3661_v18 = vrot.slane %v3537_v3, 6  ;;  %v3694_v21 = vrot.slane %v3537_v3, 7  ;;  %v3727_v27 = vsel %vm3576_vm9, %v3726_v55, %v3725_v4 }
 0x8a9   :  { %v3597_v30 = vsel %vm3579_vm10, %v3596_v56, %v3595_v48  ;;  %v3629_v59 = vsel %vm3579_vm10, %v3628_v19, %v3627_v47  ;;  %v3728_v41 = vsel %vm3579_vm10, %v3537_v3, %v3727_v27  ;;  %v3761_v37 = vrot.slane %v3537_v3, 1 }
 0x8aa   :  { %v3662_v0 = vsel %vm3579_vm10, %v3661_v18, %v3660_v33  ;;  %v3695_v11 = vsel %vm3579_vm10, %v3694_v21, %v3693_v50  ;;  %v3794_v36 = vrot.slane %v3537_v3, 2  ;;  %v3827_v58 = vrot.slane %v3537_v3, 3 }
 0x8ab   :  { %v3581_v22 = vrot.slane %v6155_v5, 3  ;;  %v3616_v46 = vrot.slane %v6155_v5, 4  ;;  %v3649_v2 = vrot.slane %v6155_v5, 5  ;;  %v3682_v42 = vrot.slane %v6155_v5, 6 }
 0x8ac   :  { %v3828_v10 = vsel %vm3579_vm10, %v3827_v58, %v3826_v9  ;;  %v3715_v1 = vrot.slane %v6155_v5, 7  ;;  %v3746_v57 = vsel %vm3576_vm9, %v3745_v31, %v6081_v7  ;;  %v3782_v28 = vrot.slane %v6155_v5, 1 }
 0x8ad   :  { %v3583_v35 = vsel %vm3582_vm11, %v3581_v22, %v3580_v16  ;;  %v3617_v54 = vsel %vm3582_vm11, %v3616_v46, %v3615_v6  ;;  %v3650_v24 = vsel %vm3582_vm11, %v3649_v2, %v3648_v13  ;;  %v3683_v32 = vsel %vm3582_vm11, %v3682_v42, %v3681_v17 }
 0x8ae   :  { %v3716_v55 = vsel %vm3582_vm11, %v3715_v1, %v3714_v52  ;;  %v3748_v48 = vsel %vm3579_vm10, %v3747_v45, %v3746_v57  ;;  %v3815_v47 = vrot.slane %v6155_v5, 2  ;;  %v3367_v33 = vmul.f32 %v6051_v23, %v6044_v26 }
 0x8af   :  { %v3749_v7 = vsel %vm3582_vm11, %v6155_v5, %v3748_v48  ;;  %v3541_v31 = vadd.f32 %v6091_v40, %v5995_v62  ;;  %v3760_v50 = vsel %vm3576_vm9, %v3759_v29, %v6110_v25  ;;  %v3781_v60 = vsel %vm3579_vm10, %v3780_v51, %v6131_v61 }
 0x8b0   :  { %v3371_v49 = vpack.c.bf16 %v3367_v33, %v5897_v39  ;;  %v3762_v44 = vsel %vm3579_vm10, %v3761_v37, %v3760_v50  ;;  %v3783_v43 = vsel %vm3582_vm11, %v3782_v28, %v3781_v60  ;;  %v3795_v26 = vsel %vm3579_vm10, %v3794_v36, %v3793_v8 }
 0x8b1   :  { %v3598_v23 = vrot.slane %v3541_v31, 3  ;;  %v3630_v63 = vrot.slane %v3541_v31, 4  ;;  %v3663_v3 = vrot.slane %v3541_v31, 5  ;;  %v3696_v4 = vrot.slane %v3541_v31, 6 }
 0x8b2   :  { %3543 = vmatmul.mubr.bf16.gmra.mrb[40].mxu0 %v3371_v49  ;;  %v3729_v40 = vrot.slane %v3541_v31, 7  ;;  %v3763_v5 = vsel %vm3582_vm11, %v3541_v31, %v3762_v44  ;;  %v3796_v25 = vrot.slane %v3541_v31, 1  ;;  %v3829_v29 = vrot.slane %v3541_v31, 2 }
 0x8b3   :  { %v3599_v61 = vsel %vm3582_vm11, %v3598_v23, %v3597_v30  ;;  %v3631_v39 = vsel %vm3582_vm11, %v3630_v63, %v3629_v59  ;;  %v3664_v9 = vsel %vm3582_vm11, %v3663_v3, %v3662_v0  ;;  %v3697_v12 = vsel %vm3582_vm11, %v3696_v4, %v3695_v11 }
 0x8b4   :  { %v3730_v8 = vsel %vm3582_vm11, %v3729_v40, %v3728_v41  ;;  %v3797_v38 = vsel %vm3582_vm11, %v3796_v25, %v3795_v26  ;;  %v3816_v14 = vsel %vm3582_vm11, %v3815_v47, %v3814_v20  ;;  %v3830_v15 = vsel %vm3582_vm11, %v3829_v29, %v3828_v10 }
 0x985   :  { %v3544_v52 = vpop.f32.mrb[40].mxu0 }
 0x986   :  { %v3545_v45 = vadd.f32 %v3544_v52, %v5991_v53  ;;  %v3546_v16 = vpop.f32.mrb[41].mxu0 }
 0x987   :  { %v3547_v6 = vadd.f32 %v3546_v16, %v5995_v62  ;;  %v3548_v51 = vpop.f32.mrb[42].mxu0 }
 0x988   :  { %v3584_v34 = vrot.slane %v3545_v45, 2  ;;  %v3618_v13 = vrot.slane %v3545_v45, 3  ;;  %v3651_v17 = vrot.slane %v3545_v45, 4  ;;  %v3684_v56 = vrot.slane %v3545_v45, 5  ;;  %v3550_v19 = vpop.f32.mrb[43].mxu0 }
 0x989   :  { %v3717_v18 = vrot.slane %v3545_v45, 6  ;;  %v3750_v21 = vrot.slane %v3545_v45, 7  ;;  %v3784_v27 = vsel %vm3585_vm12, %v3545_v45, %v3783_v43  ;;  %v3817_v20 = vrot.slane %v3545_v45, 1 }
 0x98a   :  { %v3586_v30 = vsel %vm3585_vm12, %v3584_v34, %v3583_v35  ;;  %v3619_v59 = vsel %vm3585_vm12, %v3618_v13, %v3617_v54  ;;  %v3652_v41 = vsel %vm3585_vm12, %v3651_v17, %v3650_v24  ;;  %v3685_v37 = vsel %vm3585_vm12, %v3684_v56, %v3683_v32 }
 0x98b   :  { %v3718_v0 = vsel %vm3585_vm12, %v3717_v18, %v3716_v55  ;;  %v3751_v11 = vsel %vm3585_vm12, %v3750_v21, %v3749_v7  ;;  %v3600_v36 = vrot.slane %v3547_v6, 2  ;;  %v3632_v58 = vrot.slane %v3547_v6, 3 }
 0x98c   :  { %v3665_v22 = vrot.slane %v3547_v6, 4  ;;  %v3698_v46 = vrot.slane %v3547_v6, 5  ;;  %v3731_v2 = vrot.slane %v3547_v6, 6  ;;  %v3764_v42 = vrot.slane %v3547_v6, 7 }
 0x98d   :  { %v3601_v10 = vsel %vm3585_vm12, %v3600_v36, %v3599_v61  ;;  %v3633_v1 = vsel %vm3585_vm12, %v3632_v58, %v3631_v39  ;;  %v3798_v57 = vsel %vm3585_vm12, %v3547_v6, %v3797_v38  ;;  %v3831_v28 = vrot.slane %v3547_v6, 1 }
 0x98e   :  { %v3666_v35 = vsel %vm3585_vm12, %v3665_v22, %v3664_v9  ;;  %v3699_v54 = vsel %vm3585_vm12, %v3698_v46, %v3697_v12  ;;  %v3732_v24 = vsel %vm3585_vm12, %v3731_v2, %v3730_v8  ;;  %v3765_v32 = vsel %vm3585_vm12, %v3764_v42, %v3763_v5 }
 0x98f   :  { %v3549_v55 = vadd.f32 %v3548_v51, %v5991_v53  ;;  %v3818_v48 = vsel %vm3585_vm12, %v3817_v20, %v3816_v14  ;;  %v3832_v47 = vsel %vm3585_vm12, %v3831_v28, %v3830_v15  ;;  %v3551_v33 = vadd.f32 %v3550_v19, %v5995_v62 }
 0x991   :  { %v3587_v7 = vrot.slane %v3549_v55, 1  ;;  %v3620_v31 = vrot.slane %v3549_v55, 2  ;;  %v3653_v50 = vrot.slane %v3549_v55, 3  ;;  %v3686_v60 = vrot.slane %v3549_v55, 4 }
 0x992   :  { %v3719_v49 = vrot.slane %v3549_v55, 5  ;;  %v3752_v44 = vrot.slane %v3549_v55, 6  ;;  %v3785_v43 = vrot.slane %v3549_v55, 7  ;;  %v3819_v26 = vsel %vm3588_vm13, %v3549_v55, %v3818_v48 }
 0x993   :  { %v3589_v23 = vsel %vm3588_vm13, %v3587_v7, %v3586_v30  ;;  %v3621_v53 = vsel %vm3588_vm13, %v3620_v31, %v3619_v59  ;;  %v3654_v63 = vsel %vm3588_vm13, %v3653_v50, %v3652_v41  ;;  %v3687_v3 = vsel %vm3588_vm13, %v3686_v60, %v3685_v37  ;;  %3837 = vst [vmem:[#allocation10 + $0x70] sm:$0xff] %v3819_v26 }
 0x994   :  { %3606 = vst [vmem:[#allocation10] sm:$0xff] %v3589_v23  ;;  %3639 = vst [vmem:[#allocation10 + $0x10] sm:$0xff] %v3621_v53  ;;  %v3720_v62 = vsel %vm3588_vm13, %v3719_v49, %v3718_v0  ;;  %v3753_v4 = vsel %vm3588_vm13, %v3752_v44, %v3751_v11  ;;  %v3786_v40 = vsel %vm3588_vm13, %v3785_v43, %v3784_v27  ;;  %v3602_v5 = vrot.slane %v3551_v33, 1 }
 0x995   :  { %3672 = vst [vmem:[#allocation10 + $0x20] sm:$0xff] %v3654_v63  ;;  %3705 = vst [vmem:[#allocation10 + $0x30] sm:$0xff] %v3687_v3  ;;  %v3634_v25 = vrot.slane %v3551_v33, 2  ;;  %v3667_v29 = vrot.slane %v3551_v33, 3  ;;  %v3700_v61 = vrot.slane %v3551_v33, 4  ;;  %v3733_v39 = vrot.slane %v3551_v33, 5 }
 0x996   :  { %3738 = vst [vmem:[#allocation10 + $0x40] sm:$0xff] %v3720_v62  ;;  %3771 = vst [vmem:[#allocation10 + $0x50] sm:$0xff] %v3753_v4  ;;  %v3603_v9 = vsel %vm3588_vm13, %v3602_v5, %v3601_v10  ;;  %v3766_v12 = vrot.slane %v3551_v33, 6  ;;  %v3799_v8 = vrot.slane %v3551_v33, 7  ;;  %v3833_v38 = vsel %vm3588_vm13, %v3551_v33, %v3832_v47 }
 0x997   :  { %3804 = vst [vmem:[#allocation10 + $0x60] sm:$0xff] %v3786_v40  ;;  %3607 = vst [vmem:[#allocation10 + $0x8] sm:$0xff] %v3603_v9  ;;  %v3635_v14 = vsel %vm3588_vm13, %v3634_v25, %v3633_v1  ;;  %v3668_v15 = vsel %vm3588_vm13, %v3667_v29, %v3666_v35  ;;  %v3701_v52 = vsel %vm3588_vm13, %v3700_v61, %v3699_v54 }
 0x998   :  { %v3734_v45 = vsel %vm3588_vm13, %v3733_v39, %v3732_v24  ;;  %3838 = vst [vmem:[#allocation10 + $0x78] sm:$0xff] %v3833_v38  ;;  %3640 = vst [vmem:[#allocation10 + $0x18] sm:$0xff] %v3635_v14  ;;  %v3767_v16 = vsel %vm3588_vm13, %v3766_v12, %v3765_v32  ;;  %v3800_v6 = vsel %vm3588_vm13, %v3799_v8, %v3798_v57 }
 0x999   :  { %3673 = vst [vmem:[#allocation10 + $0x28] sm:$0xff] %v3668_v15  ;;  %3706 = vst [vmem:[#allocation10 + $0x38] sm:$0xff] %v3701_v52 }
 0x99a   :  { %3739 = vst [vmem:[#allocation10 + $0x48] sm:$0xff] %v3734_v45  ;;  %3772 = vst [vmem:[#allocation10 + $0x58] sm:$0xff] %v3767_v16 }
 0x99b   :  { %3805 = vst [vmem:[#allocation10 + $0x68] sm:$0xff] %v3800_v6 }
 0x99c   :  { %4739 = shalt.err (!%p4736_p3)
}
 0x99d   :  { %s4740_s30 = scalar_lea.hbm %s6266_s5, 2048 }
 0x99e   :  { %p4741_p4 = scmp.ne.s32.totalorder %s6266_s5, %s4740_s30  ;;  %p4744_p5 = scmp.lt.u32.totalorder %s4740_s30, %s6266_s5 }
 0x9a0   :  { %p4746_p6 = pnand %p4744_p5, %p4741_p4 }
 0x9a2   :  { %4749 = shalt.err (!%p4746_p6)
}
 0x9a3   :  { %3850 = dma.vmem_to_hbm [thread:$0]  %s3845_s0, 2048, %s6266_s5, [#allocation4], %s4759_s28, %s4759_s28, %s4760_s29  }
 0x9a4   :  { %4756 = dma.done.wait [#allocation4], 2048  }
 0x9a5   :  { %4757 = vsyncadd [#allocation4], 4294965248 }
 0x9a6   :  { %3854 = vsyncpa [#allocation3], 1 }
 0x9a7   :  { %3855 = vsyncpa [#allocation8], 1 }
 0x9a8   :  { %3856 = vsyncpa [#allocation4], 1 }
 0x9a9   :  { %3857 = vsyncpa [#allocation5], 1 }

</bundles_post_ra>
